<compile_context>
chip_gen: v6e
topology: v6e:2x2x1
jax: 0.10.0
libtpu: 0.0.40
codegen_flags: <defaults>
</compile_context>

<pallas_src>
import jax
import jax.numpy as jnp
from jax.experimental import pallas as pl
from jax.experimental.pallas import tpu as pltpu

LEAKY_SLOPE = 0.01  # torch leaky_relu_ default negative_slope


def _leaky_relu(x):
    return jnp.where(x >= 0, x, LEAKY_SLOPE * x)


# ----------------------------- fused kernel ---------------------------------

def make_decoder_kernel(gru_depth, T, Bp, Hp):
    """Single fused kernel: middle linear -> gru_depth x T GRU steps -> head."""

    def kernel(*refs):
        it = iter(refs)
        mask_ref = next(it)         # (T*Bp, 1) int32  1 if t < len(b), else 0
        enc_ref = next(it)          # (gru_depth*Bp, F) f32
        x_ref = next(it)            # (T*Bp, I) f32   time-major, original order
        midw_ref = next(it)         # (F, Hp) bf16
        midb_ref = next(it)         # (1, Hp) f32
        wih_refs, whh_refs, bx_refs, bhn_refs = [], [], [], []
        for _ in range(gru_depth):
            wih_refs.append(next(it))   # (I_l, 3*Hp) bf16, gate cols 128-padded
            whh_refs.append(next(it))   # (Hp,  3*Hp) bf16
            bx_refs.append(next(it))    # (1, 3*Hp) f32  [bir+bhr | biz+bhz | bin]
            bhn_refs.append(next(it))   # (1, Hp)   f32  bhn
        l1w_ref = next(it)          # (Hp, Hp) bf16
        l1b_ref = next(it)          # (1, Hp) f32
        l2w_ref = next(it)          # (Hp, Vp) bf16 (zero-padded rows/cols)
        l2b_ref = next(it)          # (1, Vp) f32
        score_ref = next(it)        # out: (T*Bp, Vp) f32, lane-dense
        act_ref = next(it)          # scratch: (T*Bp, Hp) f32, inter-layer acts
        gx_ref = next(it)           # scratch: (T*Bp, 3*Hp) f32, hoisted x-proj

        # ---- to_middle: leaky_relu(Linear(encoder_h)) -> initial hiddens ----
        h0_all = _leaky_relu(
            jnp.dot(enc_ref[...].astype(jnp.bfloat16), midw_ref[...],
                    preferred_element_type=jnp.float32) + midb_ref[...])
        # (gru_depth*Bp, Hp); padded lanes/rows stay exactly zero.

        # One compare for all (t, b) pairs; sliced per step below.
        valid = mask_ref[...] != 0                       # (T*Bp, 1) bool

        # ---- stacked GRU, unrolled over layers and time (all VMEM) ----------
        for layer in range(gru_depth):
            # Hoisted input->hidden projection for the whole sequence:
            # one batched MXU matmul instead of T tiny per-step pushes.
            x_all = x_ref[...] if layer == 0 else act_ref[...]
            gx_ref[...] = (jnp.dot(x_all.astype(jnp.bfloat16), wih_refs[layer][...],
                                   preferred_element_type=jnp.float32)
                           + bx_refs[layer][...])

            w_hh = whh_refs[layer][...]                              # (Hp, 3*Hp) bf16
            b_hn = jnp.broadcast_to(bhn_refs[layer][...], (Bp, Hp))  # hoisted bcast
            h = h0_all[layer * Bp:(layer + 1) * Bp, :]               # (Bp, Hp) f32

            for t in range(T):
                gx = gx_ref[t * Bp:(t + 1) * Bp, :]                  # (Bp, 3*Hp)
                gh = jnp.dot(h.astype(jnp.bfloat16), w_hh,
                             preferred_element_type=jnp.float32)     # (Bp, 3*Hp)
                # fused sigmoid over the 128-aligned r|z block
                rz = jax.nn.sigmoid(gx[:, 0:2 * Hp] + gh[:, 0:2 * Hp])
                r = rz[:, 0:Hp]
                z = rz[:, Hp:2 * Hp]
                n = jnp.tanh(gx[:, 2 * Hp:3 * Hp]
                             + r * (gh[:, 2 * Hp:3 * Hp] + b_hn))
                h_new = n + z * (h - n)                  # == (1-z)*n + z*h
                m = valid[t * Bp:(t + 1) * Bp, :]        # (Bp, 1) bool
                h = jnp.where(m, h_new, h)               # freeze past length
                act_ref[t * Bp:(t + 1) * Bp, :] = jnp.where(m, h_new, 0.0)

        # ---- output head: l2(leaky_relu(l1(padded_output))) -----------------
        a = _leaky_relu(
            jnp.dot(act_ref[...].astype(jnp.bfloat16), l1w_ref[...],
                    preferred_element_type=jnp.float32) + l1b_ref[...])
        score_ref[...] = (jnp.dot(a.astype(jnp.bfloat16), l2w_ref[...],
                                  preferred_element_type=jnp.float32)
                          + l2b_ref[...])

    return kernel


# ----------------------------- wrapper ---------------------------------------

def decoder_forward(params, padded_feats, sorted_lengths, encoder_h, perm_idx,
                    gru_depth, nFeats, vocab_size):
    T, B, I = padded_feats.shape
    D, _, F_enc = encoder_h.shape
    Hp = params["l1_w_t"].shape[0]           # padded hidden width (128)
    Vp = params["l2_w_pad"].shape[1]         # padded vocab width (128)
    Bp = 8 * ((B + 7) // 8)                  # sublane-aligned batch

    # Fold the packing permutation into the inputs (masked GRU is independent
    # per batch row, so original-order execution is equivalent and the kernel
    # output needs no unpermute gather).
    unperm_idx = jnp.argsort(perm_idx)
    feats = padded_feats[:, unperm_idx, :]                       # original order
    lengths = sorted_lengths[unperm_idx].astype(jnp.int32)       # (B,), original

    feats = jnp.pad(feats, ((0, 0), (0, Bp - B), (0, 0))).reshape(T * Bp, I)
    enc = jnp.pad(encoder_h, ((0, 0), (0, Bp - B), (0, 0))).reshape(D * Bp, F_enc)
    # per-(t, b) validity mask; padded batch rows get length 0
    mask = (jnp.arange(T, dtype=jnp.int32)[:, None] < lengths[None, :]).astype(jnp.int32)
    mask = jnp.pad(mask, ((0, 0), (0, Bp - B))).reshape(T * Bp, 1)

    inputs = [mask, enc, feats, params["middle_w_t"], params["middle_b"]]
    for layer in range(gru_depth):
        inputs += [params[f"gru_wih_{layer}"], params[f"gru_whh_{layer}"],
                   params[f"gru_bx_{layer}"], params[f"gru_bhn_{layer}"]]
    inputs += [params["l1_w_t"], params["l1_b"],
               params["l2_w_pad"], params["l2_b_pad"]]

    score = pl.pallas_call(
        make_decoder_kernel(gru_depth, T, Bp, Hp),
        out_shape=jax.ShapeDtypeStruct((T * Bp, Vp), jnp.float32),
        scratch_shapes=[pltpu.VMEM((T * Bp, Hp), jnp.float32),
                        pltpu.VMEM((T * Bp, 3 * Hp), jnp.float32)],
    )(*inputs)

    score = score.reshape(T, Bp, Vp)[:, :B, :vocab_size]
    return jnp.transpose(score, (1, 0, 2))      # (B, T, V), original order


# ----------------------------- parameter init --------------------------------

def init_params(key, nFeats, gru_depth, vocab_size, input_size):
    H = nFeats
    Hp = ((H + 127) // 128) * 128               # lane-padded hidden / gate width
    Vp = ((vocab_size + 127) // 128) * 128      # lane-dense score columns
    keys = jax.random.split(key, 6 + 4 * gru_depth)
    it = iter(keys)

    def uni(k, shape, fan):
        bound = 1.0 / (float(fan) ** 0.5)
        return jax.random.uniform(k, shape, jnp.float32, -bound, bound)

    p = {}
    # middle: Linear(nFeats, nFeats), kaiming_normal_ weight
    w_mid = jax.random.normal(next(it), (H, H), jnp.float32) * (2.0 / H) ** 0.5
    p["middle_w_t"] = (jnp.zeros((H, Hp), jnp.float32)
                       .at[:, :H].set(w_mid.T).astype(jnp.bfloat16))
    p["middle_b"] = jnp.zeros((1, Hp), jnp.float32).at[:, :H].set(uni(next(it), (H,), H))
    # l1: Linear(nFeats, nFeats)
    p["l1_w_t"] = (jnp.zeros((Hp, Hp), jnp.float32)
                   .at[:H, :H].set(uni(next(it), (H, H), H)).astype(jnp.bfloat16))
    p["l1_b"] = jnp.zeros((1, Hp), jnp.float32).at[:, :H].set(uni(next(it), (H,), H))
    # l2: Linear(nFeats, vocab_size), zero-padded to lane-dense Vp
    p["l2_w_pad"] = (jnp.zeros((Hp, Vp), jnp.float32)
                     .at[:H, :vocab_size].set(uni(next(it), (H, vocab_size), H))
                     .astype(jnp.bfloat16))
    p["l2_b_pad"] = (jnp.zeros((1, Vp), jnp.float32)
                     .at[:, :vocab_size].set(uni(next(it), (vocab_size,), H)))

    # GRU layers (torch gate order r, z, n). Gate column groups padded to Hp so
    # every gate slice in the kernel starts on a 128-lane boundary. r/z biases
    # (b_ih + b_hh) are pre-added into the hoisted x-projection bias; b_hn must
    # stay inside the r* term, so it is kept separate.
    for layer in range(gru_depth):
        I_l = input_size if layer == 0 else H
        I_pad = I_l if layer == 0 else Hp           # layer>0 consumes padded acts
        wih_t = uni(next(it), (I_l, 3 * H), H)
        whh_t = uni(next(it), (H, 3 * H), H)
        bih = uni(next(it), (3 * H,), H)
        bhh = uni(next(it), (3 * H,), H)

        wih_p = jnp.zeros((I_pad, 3 * Hp), jnp.float32)
        whh_p = jnp.zeros((Hp, 3 * Hp), jnp.float32)
        for g in range(3):
            wih_p = wih_p.at[:I_l, g * Hp:g * Hp + H].set(wih_t[:, g * H:(g + 1) * H])
            whh_p = whh_p.at[:H, g * Hp:g * Hp + H].set(whh_t[:, g * H:(g + 1) * H])
        bx = jnp.zeros((1, 3 * Hp), jnp.float32)
        bx = bx.at[0, 0:H].set(bih[0:H] + bhh[0:H])                      # r
        bx = bx.at[0, Hp:Hp + H].set(bih[H:2 * H] + bhh[H:2 * H])        # z
        bx = bx.at[0, 2 * Hp:2 * Hp + H].set(bih[2 * H:3 * H])           # n (x part)
        bhn = jnp.zeros((1, Hp), jnp.float32).at[0, :H].set(bhh[2 * H:3 * H])

        p[f"gru_wih_{layer}"] = wih_p.astype(jnp.bfloat16)
        p[f"gru_whh_{layer}"] = whh_p.astype(jnp.bfloat16)
        p[f"gru_bx_{layer}"] = bx
        p[f"gru_bhn_{layer}"] = bhn
    return p


# ----------------------------- main -------------------------------------------

if __name__ == "__main__":
    # args: nFeats=32, gru_depth=2, vocab_size=16, no_use_tree=True,
    #       bidirectional=False, dropout ignored (eval)
    nFeats, gru_depth, vocab_size = 32, 2, 16
    B, T = 4, 8
    input_size = nFeats  # no_use_tree=True

    key = jax.random.PRNGKey(0)
    kp, kx, kh = jax.random.split(key, 3)
    params = init_params(kp, nFeats, gru_depth, vocab_size, input_size)

    # original per-sample sequence lengths; perm_idx sorts them descending
    orig_lengths = jnp.array([5, 8, 3, 7], dtype=jnp.int32)
    perm_idx = jnp.argsort(-orig_lengths)            # e.g. [1, 3, 0, 2]
    sorted_lengths = orig_lengths[perm_idx]          # [8, 7, 5, 3]

    # padded_feats already in packed (length-descending) batch order, time-major
    padded_feats = jax.random.normal(kx, (T, B, input_size), jnp.float32)
    # encoder_h in original batch order (forward handles the permutation)
    encoder_h = jax.random.normal(kh, (gru_depth, B, nFeats), jnp.float32)

    fwd = jax.jit(decoder_forward, static_argnums=(5, 6, 7))
    score = fwd(params, padded_feats, sorted_lengths, encoder_h,
                perm_idx, gru_depth, nFeats, vocab_size)
    score = jax.block_until_ready(score)
    assert score.shape == (B, T, vocab_size), score.shape
    assert bool(jnp.all(jnp.isfinite(score)))
    print("KERNEL_OK")
</pallas_src>

<mosaic_0001>
module attributes {stable_mosaic.version = 11 : i64} {
  func.func @kernel(%arg0: memref<64x1xi32, #tpu.memory_space<vmem>>, %arg1: memref<16x32xf32, #tpu.memory_space<vmem>>, %arg2: memref<64x32xf32, #tpu.memory_space<vmem>>, %arg3: memref<32x128xbf16, #tpu.memory_space<vmem>>, %arg4: memref<1x128xf32, #tpu.memory_space<vmem>>, %arg5: memref<32x384xbf16, #tpu.memory_space<vmem>>, %arg6: memref<128x384xbf16, #tpu.memory_space<vmem>>, %arg7: memref<1x384xf32, #tpu.memory_space<vmem>>, %arg8: memref<1x128xf32, #tpu.memory_space<vmem>>, %arg9: memref<128x384xbf16, #tpu.memory_space<vmem>>, %arg10: memref<128x384xbf16, #tpu.memory_space<vmem>>, %arg11: memref<1x384xf32, #tpu.memory_space<vmem>>, %arg12: memref<1x128xf32, #tpu.memory_space<vmem>>, %arg13: memref<128x128xbf16, #tpu.memory_space<vmem>>, %arg14: memref<1x128xf32, #tpu.memory_space<vmem>>, %arg15: memref<128x128xbf16, #tpu.memory_space<vmem>>, %arg16: memref<1x128xf32, #tpu.memory_space<vmem>>, %arg17: memref<64x128xf32, #tpu.memory_space<vmem>>, %arg18: memref<64x128xf32, #tpu.memory_space<vmem>>, %arg19: memref<64x384xf32, #tpu.memory_space<vmem>>) attributes {dimension_semantics = [], scalar_prefetch = 0 : i64, scratch_operands = 2 : i64, tpu.core_type = #tpu.core_type<tc>} {
    %c0 = arith.constant 0 : index
    %c0_0 = arith.constant 0 : index
    %0 = vector.load %arg1[%c0, %c0_0] : memref<16x32xf32, #tpu.memory_space<vmem>>, vector<16x32xf32>
    %1 = arith.truncf %0 : vector<16x32xf32> to vector<16x32xbf16>
    %c0_1 = arith.constant 0 : index
    %c0_2 = arith.constant 0 : index
    %2 = vector.load %arg3[%c0_1, %c0_2] : memref<32x128xbf16, #tpu.memory_space<vmem>>, vector<32x128xbf16>
    %cst = arith.constant dense<0.000000e+00> : vector<16x128xf32>
    %3 = tpu.matmul %1, %2, %cst {dimension_numbers = #tpu.dot_dimension_numbers<[1], [0], [0], [1], [0, 0, 1, 1], [], []>} : vector<16x32xbf16>, vector<32x128xbf16>, vector<16x128xf32> -> vector<16x128xf32>
    %c0_3 = arith.constant 0 : index
    %c0_4 = arith.constant 0 : index
    %4 = vector.load %arg4[%c0_3, %c0_4] : memref<1x128xf32, #tpu.memory_space<vmem>>, vector<1x128xf32>
    %5 = vector.broadcast %4 : vector<1x128xf32> to vector<16x128xf32>
    %6 = arith.addf %3, %5 : vector<16x128xf32>
    %cst_5 = arith.constant 0.000000e+00 : f32
    %7 = vector.broadcast %cst_5 : f32 to vector<16x128xf32>
    %8 = arith.cmpf oge, %6, %7 : vector<16x128xf32>
    %cst_6 = arith.constant 0.00999999977 : f32
    %9 = vector.broadcast %cst_6 : f32 to vector<16x128xf32>
    %10 = arith.mulf %9, %6 : vector<16x128xf32>
    %11 = arith.select %8, %6, %10 : vector<16x128xi1>, vector<16x128xf32>
    %c0_7 = arith.constant 0 : index
    %c0_8 = arith.constant 0 : index
    %12 = vector.load %arg0[%c0_7, %c0_8] : memref<64x1xi32, #tpu.memory_space<vmem>>, vector<64x1xi32>
    %c0_i32 = arith.constant 0 : i32
    %13 = vector.broadcast %c0_i32 : i32 to vector<64x1xi32>
    %14 = arith.cmpi ne, %12, %13 : vector<64x1xi32>
    %c0_9 = arith.constant 0 : index
    %c0_10 = arith.constant 0 : index
    %15 = vector.load %arg2[%c0_9, %c0_10] : memref<64x32xf32, #tpu.memory_space<vmem>>, vector<64x32xf32>
    %16 = arith.truncf %15 : vector<64x32xf32> to vector<64x32xbf16>
    %c0_11 = arith.constant 0 : index
    %c0_12 = arith.constant 0 : index
    %17 = vector.load %arg5[%c0_11, %c0_12] : memref<32x384xbf16, #tpu.memory_space<vmem>>, vector<32x384xbf16>
    %cst_13 = arith.constant dense<0.000000e+00> : vector<64x384xf32>
    %18 = tpu.matmul %16, %17, %cst_13 {dimension_numbers = #tpu.dot_dimension_numbers<[1], [0], [0], [1], [0, 0, 1, 1], [], []>} : vector<64x32xbf16>, vector<32x384xbf16>, vector<64x384xf32> -> vector<64x384xf32>
    %c0_14 = arith.constant 0 : index
    %c0_15 = arith.constant 0 : index
    %19 = vector.load %arg7[%c0_14, %c0_15] : memref<1x384xf32, #tpu.memory_space<vmem>>, vector<1x384xf32>
    %20 = vector.broadcast %19 : vector<1x384xf32> to vector<64x384xf32>
    %21 = arith.addf %18, %20 : vector<64x384xf32>
    %c0_16 = arith.constant 0 : index
    %c0_17 = arith.constant 0 : index
    %22 = vector.load %arg19[%c0_16, %c0_17] : memref<64x384xf32, #tpu.memory_space<vmem>>, vector<64x384xf32>
    tpu.vector_store %arg19[%c0_16, %c0_17], %21 {strides = array<i32>} : memref<64x384xf32, #tpu.memory_space<vmem>>, vector<64x384xf32>,
    %c0_18 = arith.constant 0 : index
    %c0_19 = arith.constant 0 : index
    %23 = vector.load %arg6[%c0_18, %c0_19] : memref<128x384xbf16, #tpu.memory_space<vmem>>, vector<128x384xbf16>
    %c0_20 = arith.constant 0 : index
    %c0_21 = arith.constant 0 : index
    %24 = vector.load %arg8[%c0_20, %c0_21] : memref<1x128xf32, #tpu.memory_space<vmem>>, vector<1x128xf32>
    %25 = vector.shape_cast %24 : vector<1x128xf32> to vector<1x128xf32>
    %26 = vector.broadcast %25 : vector<1x128xf32> to vector<8x128xf32>
    %27 = vector.extract_strided_slice %11 {offsets = [0, 0], sizes = [8, 128], strides = [1, 1]} : vector<16x128xf32> to vector<8x128xf32>
    %c0_22 = arith.constant 0 : index
    %c0_23 = arith.constant 0 : index
    %28 = vector.load %arg19[%c0_22, %c0_23] : memref<64x384xf32, #tpu.memory_space<vmem>>, vector<8x384xf32>
    %29 = arith.truncf %27 : vector<8x128xf32> to vector<8x128xbf16>
    %cst_24 = arith.constant dense<0.000000e+00> : vector<8x384xf32>
    %30 = tpu.matmul %29, %23, %cst_24 {dimension_numbers = #tpu.dot_dimension_numbers<[1], [0], [0], [1], [0, 0, 1, 1], [], []>} : vector<8x128xbf16>, vector<128x384xbf16>, vector<8x384xf32> -> vector<8x384xf32>
    %31 = vector.extract_strided_slice %28 {offsets = [0, 0], sizes = [8, 256], strides = [1, 1]} : vector<8x384xf32> to vector<8x256xf32>
    %32 = vector.extract_strided_slice %30 {offsets = [0, 0], sizes = [8, 256], strides = [1, 1]} : vector<8x384xf32> to vector<8x256xf32>
    %33 = arith.addf %31, %32 : vector<8x256xf32>
    %34 = arith.negf %33 : vector<8x256xf32>
    %35 = math.exp %34 : vector<8x256xf32>
    %cst_25 = arith.constant 1.000000e+00 : f32
    %36 = vector.broadcast %cst_25 : f32 to vector<8x256xf32>
    %37 = arith.addf %36, %35 : vector<8x256xf32>
    %38 = arith.divf %36, %37 : vector<8x256xf32>
    %39 = vector.extract_strided_slice %38 {offsets = [0, 0], sizes = [8, 128], strides = [1, 1]} : vector<8x256xf32> to vector<8x128xf32>
    %40 = vector.extract_strided_slice %38 {offsets = [0, 128], sizes = [8, 128], strides = [1, 1]} : vector<8x256xf32> to vector<8x128xf32>
    %41 = vector.extract_strided_slice %28 {offsets = [0, 256], sizes = [8, 128], strides = [1, 1]} : vector<8x384xf32> to vector<8x128xf32>
    %42 = vector.extract_strided_slice %30 {offsets = [0, 256], sizes = [8, 128], strides = [1, 1]} : vector<8x384xf32> to vector<8x128xf32>
    %43 = arith.addf %42, %26 : vector<8x128xf32>
    %44 = arith.mulf %39, %43 : vector<8x128xf32>
    %45 = arith.addf %41, %44 : vector<8x128xf32>
    %46 = math.tanh %45 : vector<8x128xf32>
    %47 = arith.subf %27, %46 : vector<8x128xf32>
    %48 = arith.mulf %40, %47 : vector<8x128xf32>
    %49 = arith.addf %46, %48 : vector<8x128xf32>
    %50 = vector.extract_strided_slice %14 {offsets = [0, 0], sizes = [8, 1], strides = [1, 1]} : vector<64x1xi1> to vector<8x1xi1>
    %51 = vector.shape_cast %50 : vector<8x1xi1> to vector<8x1xi1>
    %52 = vector.broadcast %51 : vector<8x1xi1> to vector<8x128xi1>
    %53 = arith.select %52, %49, %27 : vector<8x128xi1>, vector<8x128xf32>
    %cst_26 = arith.constant 0.000000e+00 : f32
    %54 = vector.shape_cast %50 : vector<8x1xi1> to vector<8x1xi1>
    %55 = vector.broadcast %54 : vector<8x1xi1> to vector<8x128xi1>
    %56 = vector.broadcast %cst_26 : f32 to vector<8x128xf32>
    %57 = arith.select %55, %49, %56 : vector<8x128xi1>, vector<8x128xf32>
    %c0_27 = arith.constant 0 : index
    %c0_28 = arith.constant 0 : index
    %58 = vector.load %arg18[%c0_27, %c0_28] : memref<64x128xf32, #tpu.memory_space<vmem>>, vector<8x128xf32>
    tpu.vector_store %arg18[%c0_27, %c0_28], %57 {strides = array<i32>} : memref<64x128xf32, #tpu.memory_space<vmem>>, vector<8x128xf32>,
    %c8 = arith.constant 8 : index
    %c0_29 = arith.constant 0 : index
    %59 = vector.load %arg19[%c8, %c0_29] : memref<64x384xf32, #tpu.memory_space<vmem>>, vector<8x384xf32>
    %60 = arith.truncf %53 : vector<8x128xf32> to vector<8x128xbf16>
    %cst_30 = arith.constant dense<0.000000e+00> : vector<8x384xf32>
    %61 = tpu.matmul %60, %23, %cst_30 {dimension_numbers = #tpu.dot_dimension_numbers<[1], [0], [0], [1], [0, 0, 1, 1], [], []>} : vector<8x128xbf16>, vector<128x384xbf16>, vector<8x384xf32> -> vector<8x384xf32>
    %62 = vector.extract_strided_slice %59 {offsets = [0, 0], sizes = [8, 256], strides = [1, 1]} : vector<8x384xf32> to vector<8x256xf32>
    %63 = vector.extract_strided_slice %61 {offsets = [0, 0], sizes = [8, 256], strides = [1, 1]} : vector<8x384xf32> to vector<8x256xf32>
    %64 = arith.addf %62, %63 : vector<8x256xf32>
    %65 = arith.negf %64 : vector<8x256xf32>
    %66 = math.exp %65 : vector<8x256xf32>
    %cst_31 = arith.constant 1.000000e+00 : f32
    %67 = vector.broadcast %cst_31 : f32 to vector<8x256xf32>
    %68 = arith.addf %67, %66 : vector<8x256xf32>
    %69 = arith.divf %67, %68 : vector<8x256xf32>
    %70 = vector.extract_strided_slice %69 {offsets = [0, 0], sizes = [8, 128], strides = [1, 1]} : vector<8x256xf32> to vector<8x128xf32>
    %71 = vector.extract_strided_slice %69 {offsets = [0, 128], sizes = [8, 128], strides = [1, 1]} : vector<8x256xf32> to vector<8x128xf32>
    %72 = vector.extract_strided_slice %59 {offsets = [0, 256], sizes = [8, 128], strides = [1, 1]} : vector<8x384xf32> to vector<8x128xf32>
    %73 = vector.extract_strided_slice %61 {offsets = [0, 256], sizes = [8, 128], strides = [1, 1]} : vector<8x384xf32> to vector<8x128xf32>
    %74 = arith.addf %73, %26 : vector<8x128xf32>
    %75 = arith.mulf %70, %74 : vector<8x128xf32>
    %76 = arith.addf %72, %75 : vector<8x128xf32>
    %77 = math.tanh %76 : vector<8x128xf32>
    %78 = arith.subf %53, %77 : vector<8x128xf32>
    %79 = arith.mulf %71, %78 : vector<8x128xf32>
    %80 = arith.addf %77, %79 : vector<8x128xf32>
    %81 = vector.extract_strided_slice %14 {offsets = [8, 0], sizes = [8, 1], strides = [1, 1]} : vector<64x1xi1> to vector<8x1xi1>
    %82 = vector.shape_cast %81 : vector<8x1xi1> to vector<8x1xi1>
    %83 = vector.broadcast %82 : vector<8x1xi1> to vector<8x128xi1>
    %84 = arith.select %83, %80, %53 : vector<8x128xi1>, vector<8x128xf32>
    %cst_32 = arith.constant 0.000000e+00 : f32
    %85 = vector.shape_cast %81 : vector<8x1xi1> to vector<8x1xi1>
    %86 = vector.broadcast %85 : vector<8x1xi1> to vector<8x128xi1>
    %87 = vector.broadcast %cst_32 : f32 to vector<8x128xf32>
    %88 = arith.select %86, %80, %87 : vector<8x128xi1>, vector<8x128xf32>
    %c8_33 = arith.constant 8 : index
    %c0_34 = arith.constant 0 : index
    %89 = vector.load %arg18[%c8_33, %c0_34] : memref<64x128xf32, #tpu.memory_space<vmem>>, vector<8x128xf32>
    tpu.vector_store %arg18[%c8_33, %c0_34], %88 {strides = array<i32>} : memref<64x128xf32, #tpu.memory_space<vmem>>, vector<8x128xf32>,
    %c16 = arith.constant 16 : index
    %c0_35 = arith.constant 0 : index
    %90 = vector.load %arg19[%c16, %c0_35] : memref<64x384xf32, #tpu.memory_space<vmem>>, vector<8x384xf32>
    %91 = arith.truncf %84 : vector<8x128xf32> to vector<8x128xbf16>
    %cst_36 = arith.constant dense<0.000000e+00> : vector<8x384xf32>
    %92 = tpu.matmul %91, %23, %cst_36 {dimension_numbers = #tpu.dot_dimension_numbers<[1], [0], [0], [1], [0, 0, 1, 1], [], []>} : vector<8x128xbf16>, vector<128x384xbf16>, vector<8x384xf32> -> vector<8x384xf32>
    %93 = vector.extract_strided_slice %90 {offsets = [0, 0], sizes = [8, 256], strides = [1, 1]} : vector<8x384xf32> to vector<8x256xf32>
    %94 = vector.extract_strided_slice %92 {offsets = [0, 0], sizes = [8, 256], strides = [1, 1]} : vector<8x384xf32> to vector<8x256xf32>
    %95 = arith.addf %93, %94 : vector<8x256xf32>
    %96 = arith.negf %95 : vector<8x256xf32>
    %97 = math.exp %96 : vector<8x256xf32>
    %cst_37 = arith.constant 1.000000e+00 : f32
    %98 = vector.broadcast %cst_37 : f32 to vector<8x256xf32>
    %99 = arith.addf %98, %97 : vector<8x256xf32>
    %100 = arith.divf %98, %99 : vector<8x256xf32>
    %101 = vector.extract_strided_slice %100 {offsets = [0, 0], sizes = [8, 128], strides = [1, 1]} : vector<8x256xf32> to vector<8x128xf32>
    %102 = vector.extract_strided_slice %100 {offsets = [0, 128], sizes = [8, 128], strides = [1, 1]} : vector<8x256xf32> to vector<8x128xf32>
    %103 = vector.extract_strided_slice %90 {offsets = [0, 256], sizes = [8, 128], strides = [1, 1]} : vector<8x384xf32> to vector<8x128xf32>
    %104 = vector.extract_strided_slice %92 {offsets = [0, 256], sizes = [8, 128], strides = [1, 1]} : vector<8x384xf32> to vector<8x128xf32>
    %105 = arith.addf %104, %26 : vector<8x128xf32>
    %106 = arith.mulf %101, %105 : vector<8x128xf32>
    %107 = arith.addf %103, %106 : vector<8x128xf32>
    %108 = math.tanh %107 : vector<8x128xf32>
    %109 = arith.subf %84, %108 : vector<8x128xf32>
    %110 = arith.mulf %102, %109 : vector<8x128xf32>
    %111 = arith.addf %108, %110 : vector<8x128xf32>
    %112 = vector.extract_strided_slice %14 {offsets = [16, 0], sizes = [8, 1], strides = [1, 1]} : vector<64x1xi1> to vector<8x1xi1>
    %113 = vector.shape_cast %112 : vector<8x1xi1> to vector<8x1xi1>
    %114 = vector.broadcast %113 : vector<8x1xi1> to vector<8x128xi1>
    %115 = arith.select %114, %111, %84 : vector<8x128xi1>, vector<8x128xf32>
    %cst_38 = arith.constant 0.000000e+00 : f32
    %116 = vector.shape_cast %112 : vector<8x1xi1> to vector<8x1xi1>
    %117 = vector.broadcast %116 : vector<8x1xi1> to vector<8x128xi1>
    %118 = vector.broadcast %cst_38 : f32 to vector<8x128xf32>
    %119 = arith.select %117, %111, %118 : vector<8x128xi1>, vector<8x128xf32>
    %c16_39 = arith.constant 16 : index
    %c0_40 = arith.constant 0 : index
    %120 = vector.load %arg18[%c16_39, %c0_40] : memref<64x128xf32, #tpu.memory_space<vmem>>, vector<8x128xf32>
    tpu.vector_store %arg18[%c16_39, %c0_40], %119 {strides = array<i32>} : memref<64x128xf32, #tpu.memory_space<vmem>>, vector<8x128xf32>,
    %c24 = arith.constant 24 : index
    %c0_41 = arith.constant 0 : index
    %121 = vector.load %arg19[%c24, %c0_41] : memref<64x384xf32, #tpu.memory_space<vmem>>, vector<8x384xf32>
    %122 = arith.truncf %115 : vector<8x128xf32> to vector<8x128xbf16>
    %cst_42 = arith.constant dense<0.000000e+00> : vector<8x384xf32>
    %123 = tpu.matmul %122, %23, %cst_42 {dimension_numbers = #tpu.dot_dimension_numbers<[1], [0], [0], [1], [0, 0, 1, 1], [], []>} : vector<8x128xbf16>, vector<128x384xbf16>, vector<8x384xf32> -> vector<8x384xf32>
    %124 = vector.extract_strided_slice %121 {offsets = [0, 0], sizes = [8, 256], strides = [1, 1]} : vector<8x384xf32> to vector<8x256xf32>
    %125 = vector.extract_strided_slice %123 {offsets = [0, 0], sizes = [8, 256], strides = [1, 1]} : vector<8x384xf32> to vector<8x256xf32>
    %126 = arith.addf %124, %125 : vector<8x256xf32>
    %127 = arith.negf %126 : vector<8x256xf32>
    %128 = math.exp %127 : vector<8x256xf32>
    %cst_43 = arith.constant 1.000000e+00 : f32
    %129 = vector.broadcast %cst_43 : f32 to vector<8x256xf32>
    %130 = arith.addf %129, %128 : vector<8x256xf32>
    %131 = arith.divf %129, %130 : vector<8x256xf32>
    %132 = vector.extract_strided_slice %131 {offsets = [0, 0], sizes = [8, 128], strides = [1, 1]} : vector<8x256xf32> to vector<8x128xf32>
    %133 = vector.extract_strided_slice %131 {offsets = [0, 128], sizes = [8, 128], strides = [1, 1]} : vector<8x256xf32> to vector<8x128xf32>
    %134 = vector.extract_strided_slice %121 {offsets = [0, 256], sizes = [8, 128], strides = [1, 1]} : vector<8x384xf32> to vector<8x128xf32>
    %135 = vector.extract_strided_slice %123 {offsets = [0, 256], sizes = [8, 128], strides = [1, 1]} : vector<8x384xf32> to vector<8x128xf32>
    %136 = arith.addf %135, %26 : vector<8x128xf32>
    %137 = arith.mulf %132, %136 : vector<8x128xf32>
    %138 = arith.addf %134, %137 : vector<8x128xf32>
    %139 = math.tanh %138 : vector<8x128xf32>
    %140 = arith.subf %115, %139 : vector<8x128xf32>
    %141 = arith.mulf %133, %140 : vector<8x128xf32>
    %142 = arith.addf %139, %141 : vector<8x128xf32>
    %143 = vector.extract_strided_slice %14 {offsets = [24, 0], sizes = [8, 1], strides = [1, 1]} : vector<64x1xi1> to vector<8x1xi1>
    %144 = vector.shape_cast %143 : vector<8x1xi1> to vector<8x1xi1>
    %145 = vector.broadcast %144 : vector<8x1xi1> to vector<8x128xi1>
    %146 = arith.select %145, %142, %115 : vector<8x128xi1>, vector<8x128xf32>
    %cst_44 = arith.constant 0.000000e+00 : f32
    %147 = vector.shape_cast %143 : vector<8x1xi1> to vector<8x1xi1>
    %148 = vector.broadcast %147 : vector<8x1xi1> to vector<8x128xi1>
    %149 = vector.broadcast %cst_44 : f32 to vector<8x128xf32>
    %150 = arith.select %148, %142, %149 : vector<8x128xi1>, vector<8x128xf32>
    %c24_45 = arith.constant 24 : index
    %c0_46 = arith.constant 0 : index
    %151 = vector.load %arg18[%c24_45, %c0_46] : memref<64x128xf32, #tpu.memory_space<vmem>>, vector<8x128xf32>
    tpu.vector_store %arg18[%c24_45, %c0_46], %150 {strides = array<i32>} : memref<64x128xf32, #tpu.memory_space<vmem>>, vector<8x128xf32>,
    %c32 = arith.constant 32 : index
    %c0_47 = arith.constant 0 : index
    %152 = vector.load %arg19[%c32, %c0_47] : memref<64x384xf32, #tpu.memory_space<vmem>>, vector<8x384xf32>
    %153 = arith.truncf %146 : vector<8x128xf32> to vector<8x128xbf16>
    %cst_48 = arith.constant dense<0.000000e+00> : vector<8x384xf32>
    %154 = tpu.matmul %153, %23, %cst_48 {dimension_numbers = #tpu.dot_dimension_numbers<[1], [0], [0], [1], [0, 0, 1, 1], [], []>} : vector<8x128xbf16>, vector<128x384xbf16>, vector<8x384xf32> -> vector<8x384xf32>
    %155 = vector.extract_strided_slice %152 {offsets = [0, 0], sizes = [8, 256], strides = [1, 1]} : vector<8x384xf32> to vector<8x256xf32>
    %156 = vector.extract_strided_slice %154 {offsets = [0, 0], sizes = [8, 256], strides = [1, 1]} : vector<8x384xf32> to vector<8x256xf32>
    %157 = arith.addf %155, %156 : vector<8x256xf32>
    %158 = arith.negf %157 : vector<8x256xf32>
    %159 = math.exp %158 : vector<8x256xf32>
    %cst_49 = arith.constant 1.000000e+00 : f32
    %160 = vector.broadcast %cst_49 : f32 to vector<8x256xf32>
    %161 = arith.addf %160, %159 : vector<8x256xf32>
    %162 = arith.divf %160, %161 : vector<8x256xf32>
    %163 = vector.extract_strided_slice %162 {offsets = [0, 0], sizes = [8, 128], strides = [1, 1]} : vector<8x256xf32> to vector<8x128xf32>
    %164 = vector.extract_strided_slice %162 {offsets = [0, 128], sizes = [8, 128], strides = [1, 1]} : vector<8x256xf32> to vector<8x128xf32>
    %165 = vector.extract_strided_slice %152 {offsets = [0, 256], sizes = [8, 128], strides = [1, 1]} : vector<8x384xf32> to vector<8x128xf32>
    %166 = vector.extract_strided_slice %154 {offsets = [0, 256], sizes = [8, 128], strides = [1, 1]} : vector<8x384xf32> to vector<8x128xf32>
    %167 = arith.addf %166, %26 : vector<8x128xf32>
    %168 = arith.mulf %163, %167 : vector<8x128xf32>
    %169 = arith.addf %165, %168 : vector<8x128xf32>
    %170 = math.tanh %169 : vector<8x128xf32>
    %171 = arith.subf %146, %170 : vector<8x128xf32>
    %172 = arith.mulf %164, %171 : vector<8x128xf32>
    %173 = arith.addf %170, %172 : vector<8x128xf32>
    %174 = vector.extract_strided_slice %14 {offsets = [32, 0], sizes = [8, 1], strides = [1, 1]} : vector<64x1xi1> to vector<8x1xi1>
    %175 = vector.shape_cast %174 : vector<8x1xi1> to vector<8x1xi1>
    %176 = vector.broadcast %175 : vector<8x1xi1> to vector<8x128xi1>
    %177 = arith.select %176, %173, %146 : vector<8x128xi1>, vector<8x128xf32>
    %cst_50 = arith.constant 0.000000e+00 : f32
    %178 = vector.shape_cast %174 : vector<8x1xi1> to vector<8x1xi1>
    %179 = vector.broadcast %178 : vector<8x1xi1> to vector<8x128xi1>
    %180 = vector.broadcast %cst_50 : f32 to vector<8x128xf32>
    %181 = arith.select %179, %173, %180 : vector<8x128xi1>, vector<8x128xf32>
    %c32_51 = arith.constant 32 : index
    %c0_52 = arith.constant 0 : index
    %182 = vector.load %arg18[%c32_51, %c0_52] : memref<64x128xf32, #tpu.memory_space<vmem>>, vector<8x128xf32>
    tpu.vector_store %arg18[%c32_51, %c0_52], %181 {strides = array<i32>} : memref<64x128xf32, #tpu.memory_space<vmem>>, vector<8x128xf32>,
    %c40 = arith.constant 40 : index
    %c0_53 = arith.constant 0 : index
    %183 = vector.load %arg19[%c40, %c0_53] : memref<64x384xf32, #tpu.memory_space<vmem>>, vector<8x384xf32>
    %184 = arith.truncf %177 : vector<8x128xf32> to vector<8x128xbf16>
    %cst_54 = arith.constant dense<0.000000e+00> : vector<8x384xf32>
    %185 = tpu.matmul %184, %23, %cst_54 {dimension_numbers = #tpu.dot_dimension_numbers<[1], [0], [0], [1], [0, 0, 1, 1], [], []>} : vector<8x128xbf16>, vector<128x384xbf16>, vector<8x384xf32> -> vector<8x384xf32>
    %186 = vector.extract_strided_slice %183 {offsets = [0, 0], sizes = [8, 256], strides = [1, 1]} : vector<8x384xf32> to vector<8x256xf32>
    %187 = vector.extract_strided_slice %185 {offsets = [0, 0], sizes = [8, 256], strides = [1, 1]} : vector<8x384xf32> to vector<8x256xf32>
    %188 = arith.addf %186, %187 : vector<8x256xf32>
    %189 = arith.negf %188 : vector<8x256xf32>
    %190 = math.exp %189 : vector<8x256xf32>
    %cst_55 = arith.constant 1.000000e+00 : f32
    %191 = vector.broadcast %cst_55 : f32 to vector<8x256xf32>
    %192 = arith.addf %191, %190 : vector<8x256xf32>
    %193 = arith.divf %191, %192 : vector<8x256xf32>
    %194 = vector.extract_strided_slice %193 {offsets = [0, 0], sizes = [8, 128], strides = [1, 1]} : vector<8x256xf32> to vector<8x128xf32>
    %195 = vector.extract_strided_slice %193 {offsets = [0, 128], sizes = [8, 128], strides = [1, 1]} : vector<8x256xf32> to vector<8x128xf32>
    %196 = vector.extract_strided_slice %183 {offsets = [0, 256], sizes = [8, 128], strides = [1, 1]} : vector<8x384xf32> to vector<8x128xf32>
    %197 = vector.extract_strided_slice %185 {offsets = [0, 256], sizes = [8, 128], strides = [1, 1]} : vector<8x384xf32> to vector<8x128xf32>
    %198 = arith.addf %197, %26 : vector<8x128xf32>
    %199 = arith.mulf %194, %198 : vector<8x128xf32>
    %200 = arith.addf %196, %199 : vector<8x128xf32>
    %201 = math.tanh %200 : vector<8x128xf32>
    %202 = arith.subf %177, %201 : vector<8x128xf32>
    %203 = arith.mulf %195, %202 : vector<8x128xf32>
    %204 = arith.addf %201, %203 : vector<8x128xf32>
    %205 = vector.extract_strided_slice %14 {offsets = [40, 0], sizes = [8, 1], strides = [1, 1]} : vector<64x1xi1> to vector<8x1xi1>
    %206 = vector.shape_cast %205 : vector<8x1xi1> to vector<8x1xi1>
    %207 = vector.broadcast %206 : vector<8x1xi1> to vector<8x128xi1>
    %208 = arith.select %207, %204, %177 : vector<8x128xi1>, vector<8x128xf32>
    %cst_56 = arith.constant 0.000000e+00 : f32
    %209 = vector.shape_cast %205 : vector<8x1xi1> to vector<8x1xi1>
    %210 = vector.broadcast %209 : vector<8x1xi1> to vector<8x128xi1>
    %211 = vector.broadcast %cst_56 : f32 to vector<8x128xf32>
    %212 = arith.select %210, %204, %211 : vector<8x128xi1>, vector<8x128xf32>
    %c40_57 = arith.constant 40 : index
    %c0_58 = arith.constant 0 : index
    %213 = vector.load %arg18[%c40_57, %c0_58] : memref<64x128xf32, #tpu.memory_space<vmem>>, vector<8x128xf32>
    tpu.vector_store %arg18[%c40_57, %c0_58], %212 {strides = array<i32>} : memref<64x128xf32, #tpu.memory_space<vmem>>, vector<8x128xf32>,
    %c48 = arith.constant 48 : index
    %c0_59 = arith.constant 0 : index
    %214 = vector.load %arg19[%c48, %c0_59] : memref<64x384xf32, #tpu.memory_space<vmem>>, vector<8x384xf32>
    %215 = arith.truncf %208 : vector<8x128xf32> to vector<8x128xbf16>
    %cst_60 = arith.constant dense<0.000000e+00> : vector<8x384xf32>
    %216 = tpu.matmul %215, %23, %cst_60 {dimension_numbers = #tpu.dot_dimension_numbers<[1], [0], [0], [1], [0, 0, 1, 1], [], []>} : vector<8x128xbf16>, vector<128x384xbf16>, vector<8x384xf32> -> vector<8x384xf32>
    %217 = vector.extract_strided_slice %214 {offsets = [0, 0], sizes = [8, 256], strides = [1, 1]} : vector<8x384xf32> to vector<8x256xf32>
    %218 = vector.extract_strided_slice %216 {offsets = [0, 0], sizes = [8, 256], strides = [1, 1]} : vector<8x384xf32> to vector<8x256xf32>
    %219 = arith.addf %217, %218 : vector<8x256xf32>
    %220 = arith.negf %219 : vector<8x256xf32>
    %221 = math.exp %220 : vector<8x256xf32>
    %cst_61 = arith.constant 1.000000e+00 : f32
    %222 = vector.broadcast %cst_61 : f32 to vector<8x256xf32>
    %223 = arith.addf %222, %221 : vector<8x256xf32>
    %224 = arith.divf %222, %223 : vector<8x256xf32>
    %225 = vector.extract_strided_slice %224 {offsets = [0, 0], sizes = [8, 128], strides = [1, 1]} : vector<8x256xf32> to vector<8x128xf32>
    %226 = vector.extract_strided_slice %224 {offsets = [0, 128], sizes = [8, 128], strides = [1, 1]} : vector<8x256xf32> to vector<8x128xf32>
    %227 = vector.extract_strided_slice %214 {offsets = [0, 256], sizes = [8, 128], strides = [1, 1]} : vector<8x384xf32> to vector<8x128xf32>
    %228 = vector.extract_strided_slice %216 {offsets = [0, 256], sizes = [8, 128], strides = [1, 1]} : vector<8x384xf32> to vector<8x128xf32>
    %229 = arith.addf %228, %26 : vector<8x128xf32>
    %230 = arith.mulf %225, %229 : vector<8x128xf32>
    %231 = arith.addf %227, %230 : vector<8x128xf32>
    %232 = math.tanh %231 : vector<8x128xf32>
    %233 = arith.subf %208, %232 : vector<8x128xf32>
    %234 = arith.mulf %226, %233 : vector<8x128xf32>
    %235 = arith.addf %232, %234 : vector<8x128xf32>
    %236 = vector.extract_strided_slice %14 {offsets = [48, 0], sizes = [8, 1], strides = [1, 1]} : vector<64x1xi1> to vector<8x1xi1>
    %237 = vector.shape_cast %236 : vector<8x1xi1> to vector<8x1xi1>
    %238 = vector.broadcast %237 : vector<8x1xi1> to vector<8x128xi1>
    %239 = arith.select %238, %235, %208 : vector<8x128xi1>, vector<8x128xf32>
    %cst_62 = arith.constant 0.000000e+00 : f32
    %240 = vector.shape_cast %236 : vector<8x1xi1> to vector<8x1xi1>
    %241 = vector.broadcast %240 : vector<8x1xi1> to vector<8x128xi1>
    %242 = vector.broadcast %cst_62 : f32 to vector<8x128xf32>
    %243 = arith.select %241, %235, %242 : vector<8x128xi1>, vector<8x128xf32>
    %c48_63 = arith.constant 48 : index
    %c0_64 = arith.constant 0 : index
    %244 = vector.load %arg18[%c48_63, %c0_64] : memref<64x128xf32, #tpu.memory_space<vmem>>, vector<8x128xf32>
    tpu.vector_store %arg18[%c48_63, %c0_64], %243 {strides = array<i32>} : memref<64x128xf32, #tpu.memory_space<vmem>>, vector<8x128xf32>,
    %c56 = arith.constant 56 : index
    %c0_65 = arith.constant 0 : index
    %245 = vector.load %arg19[%c56, %c0_65] : memref<64x384xf32, #tpu.memory_space<vmem>>, vector<8x384xf32>
    %246 = arith.truncf %239 : vector<8x128xf32> to vector<8x128xbf16>
    %cst_66 = arith.constant dense<0.000000e+00> : vector<8x384xf32>
    %247 = tpu.matmul %246, %23, %cst_66 {dimension_numbers = #tpu.dot_dimension_numbers<[1], [0], [0], [1], [0, 0, 1, 1], [], []>} : vector<8x128xbf16>, vector<128x384xbf16>, vector<8x384xf32> -> vector<8x384xf32>
    %248 = vector.extract_strided_slice %245 {offsets = [0, 0], sizes = [8, 256], strides = [1, 1]} : vector<8x384xf32> to vector<8x256xf32>
    %249 = vector.extract_strided_slice %247 {offsets = [0, 0], sizes = [8, 256], strides = [1, 1]} : vector<8x384xf32> to vector<8x256xf32>
    %250 = arith.addf %248, %249 : vector<8x256xf32>
    %251 = arith.negf %250 : vector<8x256xf32>
    %252 = math.exp %251 : vector<8x256xf32>
    %cst_67 = arith.constant 1.000000e+00 : f32
    %253 = vector.broadcast %cst_67 : f32 to vector<8x256xf32>
    %254 = arith.addf %253, %252 : vector<8x256xf32>
    %255 = arith.divf %253, %254 : vector<8x256xf32>
    %256 = vector.extract_strided_slice %255 {offsets = [0, 0], sizes = [8, 128], strides = [1, 1]} : vector<8x256xf32> to vector<8x128xf32>
    %257 = vector.extract_strided_slice %255 {offsets = [0, 128], sizes = [8, 128], strides = [1, 1]} : vector<8x256xf32> to vector<8x128xf32>
    %258 = vector.extract_strided_slice %245 {offsets = [0, 256], sizes = [8, 128], strides = [1, 1]} : vector<8x384xf32> to vector<8x128xf32>
    %259 = vector.extract_strided_slice %247 {offsets = [0, 256], sizes = [8, 128], strides = [1, 1]} : vector<8x384xf32> to vector<8x128xf32>
    %260 = arith.addf %259, %26 : vector<8x128xf32>
    %261 = arith.mulf %256, %260 : vector<8x128xf32>
    %262 = arith.addf %258, %261 : vector<8x128xf32>
    %263 = math.tanh %262 : vector<8x128xf32>
    %264 = arith.subf %239, %263 : vector<8x128xf32>
    %265 = arith.mulf %257, %264 : vector<8x128xf32>
    %266 = arith.addf %263, %265 : vector<8x128xf32>
    %267 = vector.extract_strided_slice %14 {offsets = [56, 0], sizes = [8, 1], strides = [1, 1]} : vector<64x1xi1> to vector<8x1xi1>
    %cst_68 = arith.constant 0.000000e+00 : f32
    %268 = vector.shape_cast %267 : vector<8x1xi1> to vector<8x1xi1>
    %269 = vector.broadcast %268 : vector<8x1xi1> to vector<8x128xi1>
    %270 = vector.broadcast %cst_68 : f32 to vector<8x128xf32>
    %271 = arith.select %269, %266, %270 : vector<8x128xi1>, vector<8x128xf32>
    %c56_69 = arith.constant 56 : index
    %c0_70 = arith.constant 0 : index
    %272 = vector.load %arg18[%c56_69, %c0_70] : memref<64x128xf32, #tpu.memory_space<vmem>>, vector<8x128xf32>
    tpu.vector_store %arg18[%c56_69, %c0_70], %271 {strides = array<i32>} : memref<64x128xf32, #tpu.memory_space<vmem>>, vector<8x128xf32>,
    %c0_71 = arith.constant 0 : index
    %c0_72 = arith.constant 0 : index
    %273 = vector.load %arg18[%c0_71, %c0_72] : memref<64x128xf32, #tpu.memory_space<vmem>>, vector<64x128xf32>
    %274 = arith.truncf %273 : vector<64x128xf32> to vector<64x128xbf16>
    %c0_73 = arith.constant 0 : index
    %c0_74 = arith.constant 0 : index
    %275 = vector.load %arg9[%c0_73, %c0_74] : memref<128x384xbf16, #tpu.memory_space<vmem>>, vector<128x384xbf16>
    %cst_75 = arith.constant dense<0.000000e+00> : vector<64x384xf32>
    %276 = tpu.matmul %274, %275, %cst_75 {dimension_numbers = #tpu.dot_dimension_numbers<[1], [0], [0], [1], [0, 0, 1, 1], [], []>} : vector<64x128xbf16>, vector<128x384xbf16>, vector<64x384xf32> -> vector<64x384xf32>
    %c0_76 = arith.constant 0 : index
    %c0_77 = arith.constant 0 : index
    %277 = vector.load %arg11[%c0_76, %c0_77] : memref<1x384xf32, #tpu.memory_space<vmem>>, vector<1x384xf32>
    %278 = vector.broadcast %277 : vector<1x384xf32> to vector<64x384xf32>
    %279 = arith.addf %276, %278 : vector<64x384xf32>
    %c0_78 = arith.constant 0 : index
    %c0_79 = arith.constant 0 : index
    %280 = vector.load %arg19[%c0_78, %c0_79] : memref<64x384xf32, #tpu.memory_space<vmem>>, vector<64x384xf32>
    tpu.vector_store %arg19[%c0_78, %c0_79], %279 {strides = array<i32>} : memref<64x384xf32, #tpu.memory_space<vmem>>, vector<64x384xf32>,
    %c0_80 = arith.constant 0 : index
    %c0_81 = arith.constant 0 : index
    %281 = vector.load %arg10[%c0_80, %c0_81] : memref<128x384xbf16, #tpu.memory_space<vmem>>, vector<128x384xbf16>
    %c0_82 = arith.constant 0 : index
    %c0_83 = arith.constant 0 : index
    %282 = vector.load %arg12[%c0_82, %c0_83] : memref<1x128xf32, #tpu.memory_space<vmem>>, vector<1x128xf32>
    %283 = vector.shape_cast %282 : vector<1x128xf32> to vector<1x128xf32>
    %284 = vector.broadcast %283 : vector<1x128xf32> to vector<8x128xf32>
    %285 = vector.extract_strided_slice %11 {offsets = [8, 0], sizes = [8, 128], strides = [1, 1]} : vector<16x128xf32> to vector<8x128xf32>
    %c0_84 = arith.constant 0 : index
    %c0_85 = arith.constant 0 : index
    %286 = vector.load %arg19[%c0_84, %c0_85] : memref<64x384xf32, #tpu.memory_space<vmem>>, vector<8x384xf32>
    %287 = arith.truncf %285 : vector<8x128xf32> to vector<8x128xbf16>
    %cst_86 = arith.constant dense<0.000000e+00> : vector<8x384xf32>
    %288 = tpu.matmul %287, %281, %cst_86 {dimension_numbers = #tpu.dot_dimension_numbers<[1], [0], [0], [1], [0, 0, 1, 1], [], []>} : vector<8x128xbf16>, vector<128x384xbf16>, vector<8x384xf32> -> vector<8x384xf32>
    %289 = vector.extract_strided_slice %286 {offsets = [0, 0], sizes = [8, 256], strides = [1, 1]} : vector<8x384xf32> to vector<8x256xf32>
    %290 = vector.extract_strided_slice %288 {offsets = [0, 0], sizes = [8, 256], strides = [1, 1]} : vector<8x384xf32> to vector<8x256xf32>
    %291 = arith.addf %289, %290 : vector<8x256xf32>
    %292 = arith.negf %291 : vector<8x256xf32>
    %293 = math.exp %292 : vector<8x256xf32>
    %cst_87 = arith.constant 1.000000e+00 : f32
    %294 = vector.broadcast %cst_87 : f32 to vector<8x256xf32>
    %295 = arith.addf %294, %293 : vector<8x256xf32>
    %296 = arith.divf %294, %295 : vector<8x256xf32>
    %297 = vector.extract_strided_slice %296 {offsets = [0, 0], sizes = [8, 128], strides = [1, 1]} : vector<8x256xf32> to vector<8x128xf32>
    %298 = vector.extract_strided_slice %296 {offsets = [0, 128], sizes = [8, 128], strides = [1, 1]} : vector<8x256xf32> to vector<8x128xf32>
    %299 = vector.extract_strided_slice %286 {offsets = [0, 256], sizes = [8, 128], strides = [1, 1]} : vector<8x384xf32> to vector<8x128xf32>
    %300 = vector.extract_strided_slice %288 {offsets = [0, 256], sizes = [8, 128], strides = [1, 1]} : vector<8x384xf32> to vector<8x128xf32>
    %301 = arith.addf %300, %284 : vector<8x128xf32>
    %302 = arith.mulf %297, %301 : vector<8x128xf32>
    %303 = arith.addf %299, %302 : vector<8x128xf32>
    %304 = math.tanh %303 : vector<8x128xf32>
    %305 = arith.subf %285, %304 : vector<8x128xf32>
    %306 = arith.mulf %298, %305 : vector<8x128xf32>
    %307 = arith.addf %304, %306 : vector<8x128xf32>
    %308 = vector.extract_strided_slice %14 {offsets = [0, 0], sizes = [8, 1], strides = [1, 1]} : vector<64x1xi1> to vector<8x1xi1>
    %309 = vector.shape_cast %308 : vector<8x1xi1> to vector<8x1xi1>
    %310 = vector.broadcast %309 : vector<8x1xi1> to vector<8x128xi1>
    %311 = arith.select %310, %307, %285 : vector<8x128xi1>, vector<8x128xf32>
    %cst_88 = arith.constant 0.000000e+00 : f32
    %312 = vector.shape_cast %308 : vector<8x1xi1> to vector<8x1xi1>
    %313 = vector.broadcast %312 : vector<8x1xi1> to vector<8x128xi1>
    %314 = vector.broadcast %cst_88 : f32 to vector<8x128xf32>
    %315 = arith.select %313, %307, %314 : vector<8x128xi1>, vector<8x128xf32>
    %c0_89 = arith.constant 0 : index
    %c0_90 = arith.constant 0 : index
    %316 = vector.load %arg18[%c0_89, %c0_90] : memref<64x128xf32, #tpu.memory_space<vmem>>, vector<8x128xf32>
    tpu.vector_store %arg18[%c0_89, %c0_90], %315 {strides = array<i32>} : memref<64x128xf32, #tpu.memory_space<vmem>>, vector<8x128xf32>,
    %c8_91 = arith.constant 8 : index
    %c0_92 = arith.constant 0 : index
    %317 = vector.load %arg19[%c8_91, %c0_92] : memref<64x384xf32, #tpu.memory_space<vmem>>, vector<8x384xf32>
    %318 = arith.truncf %311 : vector<8x128xf32> to vector<8x128xbf16>
    %cst_93 = arith.constant dense<0.000000e+00> : vector<8x384xf32>
    %319 = tpu.matmul %318, %281, %cst_93 {dimension_numbers = #tpu.dot_dimension_numbers<[1], [0], [0], [1], [0, 0, 1, 1], [], []>} : vector<8x128xbf16>, vector<128x384xbf16>, vector<8x384xf32> -> vector<8x384xf32>
    %320 = vector.extract_strided_slice %317 {offsets = [0, 0], sizes = [8, 256], strides = [1, 1]} : vector<8x384xf32> to vector<8x256xf32>
    %321 = vector.extract_strided_slice %319 {offsets = [0, 0], sizes = [8, 256], strides = [1, 1]} : vector<8x384xf32> to vector<8x256xf32>
    %322 = arith.addf %320, %321 : vector<8x256xf32>
    %323 = arith.negf %322 : vector<8x256xf32>
    %324 = math.exp %323 : vector<8x256xf32>
    %cst_94 = arith.constant 1.000000e+00 : f32
    %325 = vector.broadcast %cst_94 : f32 to vector<8x256xf32>
    %326 = arith.addf %325, %324 : vector<8x256xf32>
    %327 = arith.divf %325, %326 : vector<8x256xf32>
    %328 = vector.extract_strided_slice %327 {offsets = [0, 0], sizes = [8, 128], strides = [1, 1]} : vector<8x256xf32> to vector<8x128xf32>
    %329 = vector.extract_strided_slice %327 {offsets = [0, 128], sizes = [8, 128], strides = [1, 1]} : vector<8x256xf32> to vector<8x128xf32>
    %330 = vector.extract_strided_slice %317 {offsets = [0, 256], sizes = [8, 128], strides = [1, 1]} : vector<8x384xf32> to vector<8x128xf32>
    %331 = vector.extract_strided_slice %319 {offsets = [0, 256], sizes = [8, 128], strides = [1, 1]} : vector<8x384xf32> to vector<8x128xf32>
    %332 = arith.addf %331, %284 : vector<8x128xf32>
    %333 = arith.mulf %328, %332 : vector<8x128xf32>
    %334 = arith.addf %330, %333 : vector<8x128xf32>
    %335 = math.tanh %334 : vector<8x128xf32>
    %336 = arith.subf %311, %335 : vector<8x128xf32>
    %337 = arith.mulf %329, %336 : vector<8x128xf32>
    %338 = arith.addf %335, %337 : vector<8x128xf32>
    %339 = vector.extract_strided_slice %14 {offsets = [8, 0], sizes = [8, 1], strides = [1, 1]} : vector<64x1xi1> to vector<8x1xi1>
    %340 = vector.shape_cast %339 : vector<8x1xi1> to vector<8x1xi1>
    %341 = vector.broadcast %340 : vector<8x1xi1> to vector<8x128xi1>
    %342 = arith.select %341, %338, %311 : vector<8x128xi1>, vector<8x128xf32>
    %cst_95 = arith.constant 0.000000e+00 : f32
    %343 = vector.shape_cast %339 : vector<8x1xi1> to vector<8x1xi1>
    %344 = vector.broadcast %343 : vector<8x1xi1> to vector<8x128xi1>
    %345 = vector.broadcast %cst_95 : f32 to vector<8x128xf32>
    %346 = arith.select %344, %338, %345 : vector<8x128xi1>, vector<8x128xf32>
    %c8_96 = arith.constant 8 : index
    %c0_97 = arith.constant 0 : index
    %347 = vector.load %arg18[%c8_96, %c0_97] : memref<64x128xf32, #tpu.memory_space<vmem>>, vector<8x128xf32>
    tpu.vector_store %arg18[%c8_96, %c0_97], %346 {strides = array<i32>} : memref<64x128xf32, #tpu.memory_space<vmem>>, vector<8x128xf32>,
    %c16_98 = arith.constant 16 : index
    %c0_99 = arith.constant 0 : index
    %348 = vector.load %arg19[%c16_98, %c0_99] : memref<64x384xf32, #tpu.memory_space<vmem>>, vector<8x384xf32>
    %349 = arith.truncf %342 : vector<8x128xf32> to vector<8x128xbf16>
    %cst_100 = arith.constant dense<0.000000e+00> : vector<8x384xf32>
    %350 = tpu.matmul %349, %281, %cst_100 {dimension_numbers = #tpu.dot_dimension_numbers<[1], [0], [0], [1], [0, 0, 1, 1], [], []>} : vector<8x128xbf16>, vector<128x384xbf16>, vector<8x384xf32> -> vector<8x384xf32>
    %351 = vector.extract_strided_slice %348 {offsets = [0, 0], sizes = [8, 256], strides = [1, 1]} : vector<8x384xf32> to vector<8x256xf32>
    %352 = vector.extract_strided_slice %350 {offsets = [0, 0], sizes = [8, 256], strides = [1, 1]} : vector<8x384xf32> to vector<8x256xf32>
    %353 = arith.addf %351, %352 : vector<8x256xf32>
    %354 = arith.negf %353 : vector<8x256xf32>
    %355 = math.exp %354 : vector<8x256xf32>
    %cst_101 = arith.constant 1.000000e+00 : f32
    %356 = vector.broadcast %cst_101 : f32 to vector<8x256xf32>
    %357 = arith.addf %356, %355 : vector<8x256xf32>
    %358 = arith.divf %356, %357 : vector<8x256xf32>
    %359 = vector.extract_strided_slice %358 {offsets = [0, 0], sizes = [8, 128], strides = [1, 1]} : vector<8x256xf32> to vector<8x128xf32>
    %360 = vector.extract_strided_slice %358 {offsets = [0, 128], sizes = [8, 128], strides = [1, 1]} : vector<8x256xf32> to vector<8x128xf32>
    %361 = vector.extract_strided_slice %348 {offsets = [0, 256], sizes = [8, 128], strides = [1, 1]} : vector<8x384xf32> to vector<8x128xf32>
    %362 = vector.extract_strided_slice %350 {offsets = [0, 256], sizes = [8, 128], strides = [1, 1]} : vector<8x384xf32> to vector<8x128xf32>
    %363 = arith.addf %362, %284 : vector<8x128xf32>
    %364 = arith.mulf %359, %363 : vector<8x128xf32>
    %365 = arith.addf %361, %364 : vector<8x128xf32>
    %366 = math.tanh %365 : vector<8x128xf32>
    %367 = arith.subf %342, %366 : vector<8x128xf32>
    %368 = arith.mulf %360, %367 : vector<8x128xf32>
    %369 = arith.addf %366, %368 : vector<8x128xf32>
    %370 = vector.extract_strided_slice %14 {offsets = [16, 0], sizes = [8, 1], strides = [1, 1]} : vector<64x1xi1> to vector<8x1xi1>
    %371 = vector.shape_cast %370 : vector<8x1xi1> to vector<8x1xi1>
    %372 = vector.broadcast %371 : vector<8x1xi1> to vector<8x128xi1>
    %373 = arith.select %372, %369, %342 : vector<8x128xi1>, vector<8x128xf32>
    %cst_102 = arith.constant 0.000000e+00 : f32
    %374 = vector.shape_cast %370 : vector<8x1xi1> to vector<8x1xi1>
    %375 = vector.broadcast %374 : vector<8x1xi1> to vector<8x128xi1>
    %376 = vector.broadcast %cst_102 : f32 to vector<8x128xf32>
    %377 = arith.select %375, %369, %376 : vector<8x128xi1>, vector<8x128xf32>
    %c16_103 = arith.constant 16 : index
    %c0_104 = arith.constant 0 : index
    %378 = vector.load %arg18[%c16_103, %c0_104] : memref<64x128xf32, #tpu.memory_space<vmem>>, vector<8x128xf32>
    tpu.vector_store %arg18[%c16_103, %c0_104], %377 {strides = array<i32>} : memref<64x128xf32, #tpu.memory_space<vmem>>, vector<8x128xf32>,
    %c24_105 = arith.constant 24 : index
    %c0_106 = arith.constant 0 : index
    %379 = vector.load %arg19[%c24_105, %c0_106] : memref<64x384xf32, #tpu.memory_space<vmem>>, vector<8x384xf32>
    %380 = arith.truncf %373 : vector<8x128xf32> to vector<8x128xbf16>
    %cst_107 = arith.constant dense<0.000000e+00> : vector<8x384xf32>
    %381 = tpu.matmul %380, %281, %cst_107 {dimension_numbers = #tpu.dot_dimension_numbers<[1], [0], [0], [1], [0, 0, 1, 1], [], []>} : vector<8x128xbf16>, vector<128x384xbf16>, vector<8x384xf32> -> vector<8x384xf32>
    %382 = vector.extract_strided_slice %379 {offsets = [0, 0], sizes = [8, 256], strides = [1, 1]} : vector<8x384xf32> to vector<8x256xf32>
    %383 = vector.extract_strided_slice %381 {offsets = [0, 0], sizes = [8, 256], strides = [1, 1]} : vector<8x384xf32> to vector<8x256xf32>
    %384 = arith.addf %382, %383 : vector<8x256xf32>
    %385 = arith.negf %384 : vector<8x256xf32>
    %386 = math.exp %385 : vector<8x256xf32>
    %cst_108 = arith.constant 1.000000e+00 : f32
    %387 = vector.broadcast %cst_108 : f32 to vector<8x256xf32>
    %388 = arith.addf %387, %386 : vector<8x256xf32>
    %389 = arith.divf %387, %388 : vector<8x256xf32>
    %390 = vector.extract_strided_slice %389 {offsets = [0, 0], sizes = [8, 128], strides = [1, 1]} : vector<8x256xf32> to vector<8x128xf32>
    %391 = vector.extract_strided_slice %389 {offsets = [0, 128], sizes = [8, 128], strides = [1, 1]} : vector<8x256xf32> to vector<8x128xf32>
    %392 = vector.extract_strided_slice %379 {offsets = [0, 256], sizes = [8, 128], strides = [1, 1]} : vector<8x384xf32> to vector<8x128xf32>
    %393 = vector.extract_strided_slice %381 {offsets = [0, 256], sizes = [8, 128], strides = [1, 1]} : vector<8x384xf32> to vector<8x128xf32>
    %394 = arith.addf %393, %284 : vector<8x128xf32>
    %395 = arith.mulf %390, %394 : vector<8x128xf32>
    %396 = arith.addf %392, %395 : vector<8x128xf32>
    %397 = math.tanh %396 : vector<8x128xf32>
    %398 = arith.subf %373, %397 : vector<8x128xf32>
    %399 = arith.mulf %391, %398 : vector<8x128xf32>
    %400 = arith.addf %397, %399 : vector<8x128xf32>
    %401 = vector.extract_strided_slice %14 {offsets = [24, 0], sizes = [8, 1], strides = [1, 1]} : vector<64x1xi1> to vector<8x1xi1>
    %402 = vector.shape_cast %401 : vector<8x1xi1> to vector<8x1xi1>
    %403 = vector.broadcast %402 : vector<8x1xi1> to vector<8x128xi1>
    %404 = arith.select %403, %400, %373 : vector<8x128xi1>, vector<8x128xf32>
    %cst_109 = arith.constant 0.000000e+00 : f32
    %405 = vector.shape_cast %401 : vector<8x1xi1> to vector<8x1xi1>
    %406 = vector.broadcast %405 : vector<8x1xi1> to vector<8x128xi1>
    %407 = vector.broadcast %cst_109 : f32 to vector<8x128xf32>
    %408 = arith.select %406, %400, %407 : vector<8x128xi1>, vector<8x128xf32>
    %c24_110 = arith.constant 24 : index
    %c0_111 = arith.constant 0 : index
    %409 = vector.load %arg18[%c24_110, %c0_111] : memref<64x128xf32, #tpu.memory_space<vmem>>, vector<8x128xf32>
    tpu.vector_store %arg18[%c24_110, %c0_111], %408 {strides = array<i32>} : memref<64x128xf32, #tpu.memory_space<vmem>>, vector<8x128xf32>,
    %c32_112 = arith.constant 32 : index
    %c0_113 = arith.constant 0 : index
    %410 = vector.load %arg19[%c32_112, %c0_113] : memref<64x384xf32, #tpu.memory_space<vmem>>, vector<8x384xf32>
    %411 = arith.truncf %404 : vector<8x128xf32> to vector<8x128xbf16>
    %cst_114 = arith.constant dense<0.000000e+00> : vector<8x384xf32>
    %412 = tpu.matmul %411, %281, %cst_114 {dimension_numbers = #tpu.dot_dimension_numbers<[1], [0], [0], [1], [0, 0, 1, 1], [], []>} : vector<8x128xbf16>, vector<128x384xbf16>, vector<8x384xf32> -> vector<8x384xf32>
    %413 = vector.extract_strided_slice %410 {offsets = [0, 0], sizes = [8, 256], strides = [1, 1]} : vector<8x384xf32> to vector<8x256xf32>
    %414 = vector.extract_strided_slice %412 {offsets = [0, 0], sizes = [8, 256], strides = [1, 1]} : vector<8x384xf32> to vector<8x256xf32>
    %415 = arith.addf %413, %414 : vector<8x256xf32>
    %416 = arith.negf %415 : vector<8x256xf32>
    %417 = math.exp %416 : vector<8x256xf32>
    %cst_115 = arith.constant 1.000000e+00 : f32
    %418 = vector.broadcast %cst_115 : f32 to vector<8x256xf32>
    %419 = arith.addf %418, %417 : vector<8x256xf32>
    %420 = arith.divf %418, %419 : vector<8x256xf32>
    %421 = vector.extract_strided_slice %420 {offsets = [0, 0], sizes = [8, 128], strides = [1, 1]} : vector<8x256xf32> to vector<8x128xf32>
    %422 = vector.extract_strided_slice %420 {offsets = [0, 128], sizes = [8, 128], strides = [1, 1]} : vector<8x256xf32> to vector<8x128xf32>
    %423 = vector.extract_strided_slice %410 {offsets = [0, 256], sizes = [8, 128], strides = [1, 1]} : vector<8x384xf32> to vector<8x128xf32>
    %424 = vector.extract_strided_slice %412 {offsets = [0, 256], sizes = [8, 128], strides = [1, 1]} : vector<8x384xf32> to vector<8x128xf32>
    %425 = arith.addf %424, %284 : vector<8x128xf32>
    %426 = arith.mulf %421, %425 : vector<8x128xf32>
    %427 = arith.addf %423, %426 : vector<8x128xf32>
    %428 = math.tanh %427 : vector<8x128xf32>
    %429 = arith.subf %404, %428 : vector<8x128xf32>
    %430 = arith.mulf %422, %429 : vector<8x128xf32>
    %431 = arith.addf %428, %430 : vector<8x128xf32>
    %432 = vector.extract_strided_slice %14 {offsets = [32, 0], sizes = [8, 1], strides = [1, 1]} : vector<64x1xi1> to vector<8x1xi1>
    %433 = vector.shape_cast %432 : vector<8x1xi1> to vector<8x1xi1>
    %434 = vector.broadcast %433 : vector<8x1xi1> to vector<8x128xi1>
    %435 = arith.select %434, %431, %404 : vector<8x128xi1>, vector<8x128xf32>
    %cst_116 = arith.constant 0.000000e+00 : f32
    %436 = vector.shape_cast %432 : vector<8x1xi1> to vector<8x1xi1>
    %437 = vector.broadcast %436 : vector<8x1xi1> to vector<8x128xi1>
    %438 = vector.broadcast %cst_116 : f32 to vector<8x128xf32>
    %439 = arith.select %437, %431, %438 : vector<8x128xi1>, vector<8x128xf32>
    %c32_117 = arith.constant 32 : index
    %c0_118 = arith.constant 0 : index
    %440 = vector.load %arg18[%c32_117, %c0_118] : memref<64x128xf32, #tpu.memory_space<vmem>>, vector<8x128xf32>
    tpu.vector_store %arg18[%c32_117, %c0_118], %439 {strides = array<i32>} : memref<64x128xf32, #tpu.memory_space<vmem>>, vector<8x128xf32>,
    %c40_119 = arith.constant 40 : index
    %c0_120 = arith.constant 0 : index
    %441 = vector.load %arg19[%c40_119, %c0_120] : memref<64x384xf32, #tpu.memory_space<vmem>>, vector<8x384xf32>
    %442 = arith.truncf %435 : vector<8x128xf32> to vector<8x128xbf16>
    %cst_121 = arith.constant dense<0.000000e+00> : vector<8x384xf32>
    %443 = tpu.matmul %442, %281, %cst_121 {dimension_numbers = #tpu.dot_dimension_numbers<[1], [0], [0], [1], [0, 0, 1, 1], [], []>} : vector<8x128xbf16>, vector<128x384xbf16>, vector<8x384xf32> -> vector<8x384xf32>
    %444 = vector.extract_strided_slice %441 {offsets = [0, 0], sizes = [8, 256], strides = [1, 1]} : vector<8x384xf32> to vector<8x256xf32>
    %445 = vector.extract_strided_slice %443 {offsets = [0, 0], sizes = [8, 256], strides = [1, 1]} : vector<8x384xf32> to vector<8x256xf32>
    %446 = arith.addf %444, %445 : vector<8x256xf32>
    %447 = arith.negf %446 : vector<8x256xf32>
    %448 = math.exp %447 : vector<8x256xf32>
    %cst_122 = arith.constant 1.000000e+00 : f32
    %449 = vector.broadcast %cst_122 : f32 to vector<8x256xf32>
    %450 = arith.addf %449, %448 : vector<8x256xf32>
    %451 = arith.divf %449, %450 : vector<8x256xf32>
    %452 = vector.extract_strided_slice %451 {offsets = [0, 0], sizes = [8, 128], strides = [1, 1]} : vector<8x256xf32> to vector<8x128xf32>
    %453 = vector.extract_strided_slice %451 {offsets = [0, 128], sizes = [8, 128], strides = [1, 1]} : vector<8x256xf32> to vector<8x128xf32>
    %454 = vector.extract_strided_slice %441 {offsets = [0, 256], sizes = [8, 128], strides = [1, 1]} : vector<8x384xf32> to vector<8x128xf32>
    %455 = vector.extract_strided_slice %443 {offsets = [0, 256], sizes = [8, 128], strides = [1, 1]} : vector<8x384xf32> to vector<8x128xf32>
    %456 = arith.addf %455, %284 : vector<8x128xf32>
    %457 = arith.mulf %452, %456 : vector<8x128xf32>
    %458 = arith.addf %454, %457 : vector<8x128xf32>
    %459 = math.tanh %458 : vector<8x128xf32>
    %460 = arith.subf %435, %459 : vector<8x128xf32>
    %461 = arith.mulf %453, %460 : vector<8x128xf32>
    %462 = arith.addf %459, %461 : vector<8x128xf32>
    %463 = vector.extract_strided_slice %14 {offsets = [40, 0], sizes = [8, 1], strides = [1, 1]} : vector<64x1xi1> to vector<8x1xi1>
    %464 = vector.shape_cast %463 : vector<8x1xi1> to vector<8x1xi1>
    %465 = vector.broadcast %464 : vector<8x1xi1> to vector<8x128xi1>
    %466 = arith.select %465, %462, %435 : vector<8x128xi1>, vector<8x128xf32>
    %cst_123 = arith.constant 0.000000e+00 : f32
    %467 = vector.shape_cast %463 : vector<8x1xi1> to vector<8x1xi1>
    %468 = vector.broadcast %467 : vector<8x1xi1> to vector<8x128xi1>
    %469 = vector.broadcast %cst_123 : f32 to vector<8x128xf32>
    %470 = arith.select %468, %462, %469 : vector<8x128xi1>, vector<8x128xf32>
    %c40_124 = arith.constant 40 : index
    %c0_125 = arith.constant 0 : index
    %471 = vector.load %arg18[%c40_124, %c0_125] : memref<64x128xf32, #tpu.memory_space<vmem>>, vector<8x128xf32>
    tpu.vector_store %arg18[%c40_124, %c0_125], %470 {strides = array<i32>} : memref<64x128xf32, #tpu.memory_space<vmem>>, vector<8x128xf32>,
    %c48_126 = arith.constant 48 : index
    %c0_127 = arith.constant 0 : index
    %472 = vector.load %arg19[%c48_126, %c0_127] : memref<64x384xf32, #tpu.memory_space<vmem>>, vector<8x384xf32>
    %473 = arith.truncf %466 : vector<8x128xf32> to vector<8x128xbf16>
    %cst_128 = arith.constant dense<0.000000e+00> : vector<8x384xf32>
    %474 = tpu.matmul %473, %281, %cst_128 {dimension_numbers = #tpu.dot_dimension_numbers<[1], [0], [0], [1], [0, 0, 1, 1], [], []>} : vector<8x128xbf16>, vector<128x384xbf16>, vector<8x384xf32> -> vector<8x384xf32>
    %475 = vector.extract_strided_slice %472 {offsets = [0, 0], sizes = [8, 256], strides = [1, 1]} : vector<8x384xf32> to vector<8x256xf32>
    %476 = vector.extract_strided_slice %474 {offsets = [0, 0], sizes = [8, 256], strides = [1, 1]} : vector<8x384xf32> to vector<8x256xf32>
    %477 = arith.addf %475, %476 : vector<8x256xf32>
    %478 = arith.negf %477 : vector<8x256xf32>
    %479 = math.exp %478 : vector<8x256xf32>
    %cst_129 = arith.constant 1.000000e+00 : f32
    %480 = vector.broadcast %cst_129 : f32 to vector<8x256xf32>
    %481 = arith.addf %480, %479 : vector<8x256xf32>
    %482 = arith.divf %480, %481 : vector<8x256xf32>
    %483 = vector.extract_strided_slice %482 {offsets = [0, 0], sizes = [8, 128], strides = [1, 1]} : vector<8x256xf32> to vector<8x128xf32>
    %484 = vector.extract_strided_slice %482 {offsets = [0, 128], sizes = [8, 128], strides = [1, 1]} : vector<8x256xf32> to vector<8x128xf32>
    %485 = vector.extract_strided_slice %472 {offsets = [0, 256], sizes = [8, 128], strides = [1, 1]} : vector<8x384xf32> to vector<8x128xf32>
    %486 = vector.extract_strided_slice %474 {offsets = [0, 256], sizes = [8, 128], strides = [1, 1]} : vector<8x384xf32> to vector<8x128xf32>
    %487 = arith.addf %486, %284 : vector<8x128xf32>
    %488 = arith.mulf %483, %487 : vector<8x128xf32>
    %489 = arith.addf %485, %488 : vector<8x128xf32>
    %490 = math.tanh %489 : vector<8x128xf32>
    %491 = arith.subf %466, %490 : vector<8x128xf32>
    %492 = arith.mulf %484, %491 : vector<8x128xf32>
    %493 = arith.addf %490, %492 : vector<8x128xf32>
    %494 = vector.extract_strided_slice %14 {offsets = [48, 0], sizes = [8, 1], strides = [1, 1]} : vector<64x1xi1> to vector<8x1xi1>
    %495 = vector.shape_cast %494 : vector<8x1xi1> to vector<8x1xi1>
    %496 = vector.broadcast %495 : vector<8x1xi1> to vector<8x128xi1>
    %497 = arith.select %496, %493, %466 : vector<8x128xi1>, vector<8x128xf32>
    %cst_130 = arith.constant 0.000000e+00 : f32
    %498 = vector.shape_cast %494 : vector<8x1xi1> to vector<8x1xi1>
    %499 = vector.broadcast %498 : vector<8x1xi1> to vector<8x128xi1>
    %500 = vector.broadcast %cst_130 : f32 to vector<8x128xf32>
    %501 = arith.select %499, %493, %500 : vector<8x128xi1>, vector<8x128xf32>
    %c48_131 = arith.constant 48 : index
    %c0_132 = arith.constant 0 : index
    %502 = vector.load %arg18[%c48_131, %c0_132] : memref<64x128xf32, #tpu.memory_space<vmem>>, vector<8x128xf32>
    tpu.vector_store %arg18[%c48_131, %c0_132], %501 {strides = array<i32>} : memref<64x128xf32, #tpu.memory_space<vmem>>, vector<8x128xf32>,
    %c56_133 = arith.constant 56 : index
    %c0_134 = arith.constant 0 : index
    %503 = vector.load %arg19[%c56_133, %c0_134] : memref<64x384xf32, #tpu.memory_space<vmem>>, vector<8x384xf32>
    %504 = arith.truncf %497 : vector<8x128xf32> to vector<8x128xbf16>
    %cst_135 = arith.constant dense<0.000000e+00> : vector<8x384xf32>
    %505 = tpu.matmul %504, %281, %cst_135 {dimension_numbers = #tpu.dot_dimension_numbers<[1], [0], [0], [1], [0, 0, 1, 1], [], []>} : vector<8x128xbf16>, vector<128x384xbf16>, vector<8x384xf32> -> vector<8x384xf32>
    %506 = vector.extract_strided_slice %503 {offsets = [0, 0], sizes = [8, 256], strides = [1, 1]} : vector<8x384xf32> to vector<8x256xf32>
    %507 = vector.extract_strided_slice %505 {offsets = [0, 0], sizes = [8, 256], strides = [1, 1]} : vector<8x384xf32> to vector<8x256xf32>
    %508 = arith.addf %506, %507 : vector<8x256xf32>
    %509 = arith.negf %508 : vector<8x256xf32>
    %510 = math.exp %509 : vector<8x256xf32>
    %cst_136 = arith.constant 1.000000e+00 : f32
    %511 = vector.broadcast %cst_136 : f32 to vector<8x256xf32>
    %512 = arith.addf %511, %510 : vector<8x256xf32>
    %513 = arith.divf %511, %512 : vector<8x256xf32>
    %514 = vector.extract_strided_slice %513 {offsets = [0, 0], sizes = [8, 128], strides = [1, 1]} : vector<8x256xf32> to vector<8x128xf32>
    %515 = vector.extract_strided_slice %513 {offsets = [0, 128], sizes = [8, 128], strides = [1, 1]} : vector<8x256xf32> to vector<8x128xf32>
    %516 = vector.extract_strided_slice %503 {offsets = [0, 256], sizes = [8, 128], strides = [1, 1]} : vector<8x384xf32> to vector<8x128xf32>
    %517 = vector.extract_strided_slice %505 {offsets = [0, 256], sizes = [8, 128], strides = [1, 1]} : vector<8x384xf32> to vector<8x128xf32>
    %518 = arith.addf %517, %284 : vector<8x128xf32>
    %519 = arith.mulf %514, %518 : vector<8x128xf32>
    %520 = arith.addf %516, %519 : vector<8x128xf32>
    %521 = math.tanh %520 : vector<8x128xf32>
    %522 = arith.subf %497, %521 : vector<8x128xf32>
    %523 = arith.mulf %515, %522 : vector<8x128xf32>
    %524 = arith.addf %521, %523 : vector<8x128xf32>
    %525 = vector.extract_strided_slice %14 {offsets = [56, 0], sizes = [8, 1], strides = [1, 1]} : vector<64x1xi1> to vector<8x1xi1>
    %cst_137 = arith.constant 0.000000e+00 : f32
    %526 = vector.shape_cast %525 : vector<8x1xi1> to vector<8x1xi1>
    %527 = vector.broadcast %526 : vector<8x1xi1> to vector<8x128xi1>
    %528 = vector.broadcast %cst_137 : f32 to vector<8x128xf32>
    %529 = arith.select %527, %524, %528 : vector<8x128xi1>, vector<8x128xf32>
    %c56_138 = arith.constant 56 : index
    %c0_139 = arith.constant 0 : index
    %530 = vector.load %arg18[%c56_138, %c0_139] : memref<64x128xf32, #tpu.memory_space<vmem>>, vector<8x128xf32>
    tpu.vector_store %arg18[%c56_138, %c0_139], %529 {strides = array<i32>} : memref<64x128xf32, #tpu.memory_space<vmem>>, vector<8x128xf32>,
    %c0_140 = arith.constant 0 : index
    %c0_141 = arith.constant 0 : index
    %531 = vector.load %arg18[%c0_140, %c0_141] : memref<64x128xf32, #tpu.memory_space<vmem>>, vector<64x128xf32>
    %532 = arith.truncf %531 : vector<64x128xf32> to vector<64x128xbf16>
    %c0_142 = arith.constant 0 : index
    %c0_143 = arith.constant 0 : index
    %533 = vector.load %arg13[%c0_142, %c0_143] : memref<128x128xbf16, #tpu.memory_space<vmem>>, vector<128x128xbf16>
    %cst_144 = arith.constant dense<0.000000e+00> : vector<64x128xf32>
    %534 = tpu.matmul %532, %533, %cst_144 {dimension_numbers = #tpu.dot_dimension_numbers<[1], [0], [0], [1], [0, 0, 1, 1], [], []>} : vector<64x128xbf16>, vector<128x128xbf16>, vector<64x128xf32> -> vector<64x128xf32>
    %c0_145 = arith.constant 0 : index
    %c0_146 = arith.constant 0 : index
    %535 = vector.load %arg14[%c0_145, %c0_146] : memref<1x128xf32, #tpu.memory_space<vmem>>, vector<1x128xf32>
    %536 = vector.broadcast %535 : vector<1x128xf32> to vector<64x128xf32>
    %537 = arith.addf %534, %536 : vector<64x128xf32>
    %cst_147 = arith.constant 0.000000e+00 : f32
    %538 = vector.broadcast %cst_147 : f32 to vector<64x128xf32>
    %539 = arith.cmpf oge, %537, %538 : vector<64x128xf32>
    %cst_148 = arith.constant 0.00999999977 : f32
    %540 = vector.broadcast %cst_148 : f32 to vector<64x128xf32>
    %541 = arith.mulf %540, %537 : vector<64x128xf32>
    %542 = arith.select %539, %537, %541 : vector<64x128xi1>, vector<64x128xf32>
    %543 = arith.truncf %542 : vector<64x128xf32> to vector<64x128xbf16>
    %c0_149 = arith.constant 0 : index
    %c0_150 = arith.constant 0 : index
    %544 = vector.load %arg15[%c0_149, %c0_150] : memref<128x128xbf16, #tpu.memory_space<vmem>>, vector<128x128xbf16>
    %cst_151 = arith.constant dense<0.000000e+00> : vector<64x128xf32>
    %545 = tpu.matmul %543, %544, %cst_151 {dimension_numbers = #tpu.dot_dimension_numbers<[1], [0], [0], [1], [0, 0, 1, 1], [], []>} : vector<64x128xbf16>, vector<128x128xbf16>, vector<64x128xf32> -> vector<64x128xf32>
    %c0_152 = arith.constant 0 : index
    %c0_153 = arith.constant 0 : index
    %546 = vector.load %arg16[%c0_152, %c0_153] : memref<1x128xf32, #tpu.memory_space<vmem>>, vector<1x128xf32>
    %547 = vector.broadcast %546 : vector<1x128xf32> to vector<64x128xf32>
    %548 = arith.addf %545, %547 : vector<64x128xf32>
    %c0_154 = arith.constant 0 : index
    %c0_155 = arith.constant 0 : index
    %549 = vector.load %arg17[%c0_154, %c0_155] : memref<64x128xf32, #tpu.memory_space<vmem>>, vector<64x128xf32>
    tpu.vector_store %arg17[%c0_154, %c0_155], %548 {strides = array<i32>} : memref<64x128xf32, #tpu.memory_space<vmem>>, vector<64x128xf32>,
    return
  }
}

</mosaic_0001>

<bundles_post_ra>
// kernel: decoder_forward.1
= control target key start
LH: loop header
LB: loop body
LE: loop exit
PB: predicated region body
PF: predicated region fallthrough
CT: control target
= control target key end

     0   :  { %v6143_v0 = vmov 0.0   ;;  %vm4301_vm0 = vmmov 0   ;;  %v6138_v3 = vmov 0   ;;  %vm83_vm1 = vcmask 261120   ;;  %s6115_s3 = inlined_call_operand.vmem [shape: bf16[32,128], index: 3, kind: input, shape index: {}]   ;;  %s6116_s1 = inlined_call_operand.vmem [shape: f32[16,32], index: 1, kind: input, shape index: {}]   ;;  %s6117_s5 = inlined_call_operand.vmem [shape: bf16[32,384], index: 5, kind: input, shape index: {}]   ;;  %s6118_s2 = inlined_call_operand.vmem [shape: f32[64,32], index: 2, kind: input, shape index: {}]   ;;  %s6119_s6 = inlined_call_operand.vmem [shape: bf16[128,384], index: 6, kind: input, shape index: {}]   ;;  %s6120_s0 = inlined_call_operand.vmem [shape: s32[64,1], index: 0, kind: input, shape index: {}]   ;;  %s6121_s4 = inlined_call_operand.vmem [shape: f32[1,128], index: 4, kind: input, shape index: {}]   ;;  %s6122_s7 = inlined_call_operand.vmem [shape: f32[1,384], index: 7, kind: input, shape index: {}]   ;;  %s6123_s8 = inlined_call_operand.vmem [shape: f32[1,128], index: 8, kind: input, shape index: {}]   ;;  %s6124_s9 = inlined_call_operand.vmem [shape: bf16[128,384], index: 9, kind: input, shape index: {}]   ;;  %s6125_s10 = inlined_call_operand.vmem [shape: bf16[128,384], index: 10, kind: input, shape index: {}]   ;;  %s6126_s11 = inlined_call_operand.vmem [shape: f32[1,384], index: 11, kind: input, shape index: {}]   ;;  %s6127_s12 = inlined_call_operand.vmem [shape: f32[1,128], index: 12, kind: input, shape index: {}]   ;;  %s6128_s13 = inlined_call_operand.vmem [shape: bf16[128,128], index: 13, kind: input, shape index: {}]   ;;  %s6129_s15 = inlined_call_operand.vmem [shape: bf16[128,128], index: 15, kind: input, shape index: {}]   ;;  %s6130_s14 = inlined_call_operand.vmem [shape: f32[1,128], index: 14, kind: input, shape index: {}]   ;;  %s6131_s16 = inlined_call_operand.vmem [shape: f32[1,128], index: 16, kind: input, shape index: {}]   ;;  %s6132_s17 = inlined_call_operand.vmem [shape: f32[64,128], index: 17, kind: output, shape index: {}]  }
   0x1   :  { %6155 = sst [smem:[#allocation22_spill]] %s6115_s3  ;;  %3551 = vmatprep.subr.bf16.mxu0 %v6143_v0  ;;  %3555 = vmatprep.mubr.msk.bf16.mxu0 %vm4301_vm0, %v6143_v0  ;;  %v3970_v6 = vld [vmem:[%s6117_s5 + $0x1c] ss:$12 sps:$4 sm:$0xff]   ;;  %v3972_v7 = vld [vmem:[%s6117_s5 + $0x18] ss:$12 sps:$4 sm:$0xff]   ;;  %v152_v18 = vld [vmem:[%s6118_s2 + $0x10] sm:$0xff] }
   0x2   :  { %6156 = sst [smem:[#allocation23_spill]] %s6116_s1  ;;  %263 = vmatprep.mubr.bf16.mxu1 %v6138_v3  ;;  %3967 = vset.pattern.permute.xlu1 %v6138_v3  ;;  %v3973_v8 = vld [vmem:[%s6117_s5 + $0x4] ss:$12 sps:$4 sm:$0xff]   ;;  %v3975_v10 = vld [vmem:[%s6117_s5] ss:$12 sps:$4 sm:$0xff]   ;;  %v153_v19 = vld [vmem:[%s6118_s2 + $0x18] sm:$0xff] }
   0x3   :  { %s6157_s26 = sld [smem:[#allocation22_spill]]  ;;  %3966 = vset.pattern.permute.xlu0 %v6138_v3  ;;  %243 = vmatprep.subr.bf16.mxu1 %v3970_v6  ;;  %v3976_v11 = vld [vmem:[%s6117_s5 + $0x20] ss:$12 sps:$4 sm:$0xff]   ;;  %v3977_v14 = vld [vmem:[%s6117_s5 + $0x8] ss:$12 sps:$4 sm:$0xff]   ;;  %v159_v21 = vpack.c.bf16 %v153_v19, %v152_v18  ;;  %v157_v32 = vld [vmem:[%s6118_s2 + $0x38] sm:$0xff] }
   0x4   :  { %s6158_s30 = sld [smem:[#allocation23_spill]]  ;;  %244 = vmatpush1.bf16.msra.mxu1 %v3972_v7  ;;  %v150_v12 = vld [vmem:[%s6118_s2] sm:$0xff]  ;;  %v151_v13 = vld [vmem:[%s6118_s2 + $0x8] sm:$0xff]  ;;  %v4465_v22 = vld [vmem:[%s6119_s6 + $0xb0] ss:$12 sps:$4 sm:$0xff]  }
   0x5   :  { %245 = vmatprep.subr.bf16.mxu1 %v3973_v8  ;;  %v4439_v15 = vld [vmem:[%s6119_s6 + $0xac] ss:$12 sps:$4 sm:$0xff]   ;;  %v158_v16 = vpack.c.bf16 %v151_v13, %v150_v12  ;;  %v4445_v17 = vld [vmem:[%s6119_s6 + $0xa8] ss:$12 sps:$4 sm:$0xff]   ;;  %v4470_v23 = vld [vmem:[%s6119_s6 + $0x90] ss:$12 sps:$4 sm:$0xff]  }
   0x6   :  { %v4458_v20 = vld [vmem:[%s6119_s6 + $0x94] ss:$12 sps:$4 sm:$0xff]   ;;  %v4477_v24 = vld [vmem:[%s6119_s6 + $0x7c] ss:$12 sps:$4 sm:$0xff]   ;;  %v4490_v27 = vld [vmem:[%s6119_s6 + $0x98] ss:$12 sps:$4 sm:$0xff]  }
   0x7   :  { %v154_v25 = vld [vmem:[%s6118_s2 + $0x20] sm:$0xff]  ;;  %v155_v26 = vld [vmem:[%s6118_s2 + $0x28] sm:$0xff]  ;;  %v156_v31 = vld [vmem:[%s6118_s2 + $0x30] sm:$0xff] }
   0x8   :  { %246 = vmatpush1.bf16.msra.mxu1 %v3975_v10  ;;  %v4497_v28 = vld [vmem:[%s6119_s6 + $0x78] ss:$12 sps:$4 sm:$0xff]   ;;  %v160_v29 = vpack.c.bf16 %v155_v26, %v154_v25  ;;  %v4519_v33 = vld [vmem:[%s6119_s6 + $0x80] ss:$12 sps:$4 sm:$0xff]   ;;  %v161_v36 = vpack.c.bf16 %v157_v32, %v156_v31  ;;  %v4537_v37 = vld [vmem:[%s6119_s6 + $0x68] ss:$12 sps:$4 sm:$0xff]  }
   0x9   :  { %v3968_v1 = vld [vmem:[%s6157_s26 + $0x8] sm:$0xff]   ;;  %v3969_v2 = vld [vmem:[%s6157_s26] sm:$0xff]   ;;  %564 = vmatprep.subr.bf16.mxu1 %v4439_v15  ;;  %v4562_v40 = vld [vmem:[%s6119_s6 + $0x50] ss:$12 sps:$4 sm:$0xff]  }
   0xa   :  { %3552 = vmatpush3.bf16.msra.mxu0 %v3968_v1  ;;  %v57_v4 = vld [vmem:[%s6158_s30] sm:$0xff]  ;;  %v58_v5 = vld [vmem:[%s6158_s30 + $0x8] sm:$0xff]  ;;  %v4567_v41 = vld [vmem:[%s6119_s6 + $0x30] ss:$12 sps:$4 sm:$0xff]  }
   0xb   :  { %3553 = vmatprep.subr.bf16.mxu0 %v6143_v0  ;;  %v59_v9 = vpack.c.bf16 %v58_v5, %v57_v4  ;;  %3194 = vmatmul.mubr.msk.bf16.vlgmr.msra.gmra.mxu1 %vm83_vm1, %v158_v16  ;;  %v4504_v30 = vld [vmem:[%s6119_s6 + $0x64] ss:$12 sps:$4 sm:$0xff]   ;;  %v4524_v34 = vld [vmem:[%s6119_s6 + $0x60] ss:$12 sps:$4 sm:$0xff]   ;;  %v4542_v38 = vld [vmem:[%s6119_s6 + $0x48] ss:$12 sps:$4 sm:$0xff]  }
   0xc   :  { %565 = vmatpush1.bf16.msra.mxu1 %v4445_v17  ;;  %273 = vmatprep.mubr.bf16.mxu1 %v6138_v3  ;;  %v4531_v35 = vld [vmem:[%s6119_s6 + $0x4c] ss:$12 sps:$4 sm:$0xff]   ;;  %v4552_v39 = vld [vmem:[%s6119_s6 + $0x34] ss:$12 sps:$4 sm:$0xff]   ;;  %v4574_v42 = vld [vmem:[%s6119_s6 + $0x1c] ss:$12 sps:$4 sm:$0xff]  }
   0xd   :  { %566 = vmatprep.subr.bf16.mxu1 %v4458_v20  ;;  %v4582_v43 = vld [vmem:[%s6119_s6 + $0x38] ss:$12 sps:$4 sm:$0xff]   ;;  %v4598_v45 = vld [vmem:[%s6119_s6 + $0x20] ss:$12 sps:$4 sm:$0xff]   ;;  %v4616_v48 = vld [vmem:[%s6119_s6 + $0x8] ss:$12 sps:$4 sm:$0xff]  }
   0xe   :  { %3554 = vmatpush3.bf16.msra.mxu0 %v3969_v2  ;;  %v4593_v44 = vld [vmem:[%s6119_s6 + $0x18] ss:$12 sps:$4 sm:$0xff]   ;;  %v4611_v47 = vld [vmem:[%s6119_s6] ss:$12 sps:$4 sm:$0xff]   ;;  %v136_v49 = vld [vmem:[%s6120_s0 + $0x10] sm:$0xff]  ;;  %v172_v2 = vlaneseq }
   0xf   :  { %3559 = vmatprep.subr.bf16.mxu0 %v3976_v11  ;;  %v4605_v46 = vld [vmem:[%s6119_s6 + $0x4] ss:$12 sps:$4 sm:$0xff]   ;;  %v137_v51 = vld [vmem:[%s6120_s0 + $0x18] sm:$0xff]  ;;  %vm144_vm2 = vcmp.ne.s32.totalorder %v136_v49, 0  ;;  %v135_v52 = vld [vmem:[%s6120_s0 + $0x8] sm:$0xff] }
  0x10   :  { %567 = vmatpush1.bf16.msra.mxu1 %v4470_v23  ;;  %v134_v50 = vld [vmem:[%s6120_s0] sm:$0xff]  ;;  %vm145_vm4 = vcmp.ne.s32.totalorder %v137_v51, 0  ;;  %v894_v53 = vsel %vm144_vm2, 1, %v6138_v3  ;;  %vm143_vm5 = vcmp.ne.s32.totalorder %v135_v52, 0  ;;  %v139_v55 = vld [vmem:[%s6120_s0 + $0x28] sm:$0xff]  ;;  %v141_v59 = vld [vmem:[%s6120_s0 + $0x38] sm:$0xff] }
  0x11   :  { %3556 = vmatmul.mubr.msk.bf16.vlgmr.msra.gmra.mxu0 %vm83_vm1, %v59_v9  ;;  %568 = vmatprep.subr.bf16.mxu1 %v4477_v24  ;;  %vm142_vm3 = vcmp.ne.s32.totalorder %v134_v50, 0  ;;  %v138_v56 = vld [vmem:[%s6120_s0 + $0x20] sm:$0xff]  ;;  %v1008_v57 = vsel %vm145_vm4, 1, %v6138_v3  ;;  %v780_v58 = vsel %vm143_vm5, 1, %v6138_v3  ;;  %vm147_vm6 = vcmp.ne.s32.totalorder %v139_v55, 0  ;;  %v140_v60 = vld [vmem:[%s6120_s0 + $0x30] sm:$0xff] }
  0x12   :  { %3560 = vmatpush3.bf16.msra.mxu0 %v3976_v11  ;;  %3563 = vmatprep.mubr.msk.bf16.mxu0 %vm83_vm1, %v158_v16  ;;  %v666_v54 = vsel %vm142_vm3, 1, %v6138_v3  ;;  %vm146_vm7 = vcmp.ne.s32.totalorder %v138_v56, 0  ;;  %v1236_v61 = vsel %vm147_vm6, 1, %v6138_v3  ;;  %vm149_vm8 = vcmp.ne.s32.totalorder %v141_v59, 0  ;;  %v3184_v5 = vld [vmem:[%s6121_s4] ss:$0 sm:$0xff] }
  0x13   :  { %3561 = vmatprep.subr.bf16.mxu0 %v3977_v14  ;;  %3195 = vmatmul.mubr.msk.bf16.gmra.mxu1 %vm83_vm1, %v159_v21  ;;  %v1122_v62 = vsel %vm146_vm7, 1, %v6138_v3  ;;  %vm148_vm9 = vcmp.ne.s32.totalorder %v140_v60, 0  ;;  %v1464_v63 = vsel %vm149_vm8, 1, %v6138_v3  ;;  %v4655_v4 = vshrl.u32 %v172_v2, 7  ;;  %v170_v11 = vld [vmem:[%s6122_s7] sm:$0x7] }
  0x14   :  { %569 = vmatpush1.bf16.msra.mxu1 %v4497_v28  ;;  %283 = vmatprep.mubr.bf16.mxu1 %v6138_v3  ;;  %v1350_v1 = vsel %vm148_vm9, 1, %v6138_v3 }
  0x15   :  { %570 = vmatprep.subr.bf16.mxu1 %v4504_v30  ;;  %896 = vperm.xlu1 %3967, %v894_v53   ;;  %6159 = vst [vmem:[#allocation4_spill] sm:$0xff] %v4655_v4  ;;  %v6137_v8 = vsub.s32 0, %v4655_v4  ;;  %v6135_v9 = vsub.s32 2, %v4655_v4  ;;  %v6136_v13 = vsub.s32 1, %v4655_v4 }
  0x16   :  { %3562 = vmatpush3.bf16.msra.mxu0 %v3977_v14  ;;  %668 = vperm.xlu0 %3966, %v666_v54  }
  0x17   :  { %3571 = vmatprep.subr.bf16.mxu0 %v6143_v0  ;;  %v4678_v25 = vrot.slane %v170_v11, %v6135_v9  ;;  %v4686_v32 = vrot.slane %v170_v11, %v6136_v13 }
  0x18   :  { %571 = vmatpush1.bf16.msra.mxu1 %v4524_v34 }
  0x19   :  { %3564 = vmatmul.mubr.msk.bf16.vlgmr.msra.gmra.mxu0 %vm83_vm1, %v159_v21  ;;  %572 = vmatprep.subr.bf16.mxu1 %v4531_v35  ;;  %v4674_v21 = vrot.slane %v170_v11, %v6137_v8  ;;  %6161 = vst [vmem:[#allocation6_spill] sm:$0xff] %v4686_v32 }
  0x1a   :  { %3572 = vmatpush3.bf16.msra.mxu0 %v4465_v22  ;;  %3567 = vmatprep.mubr.msk.bf16.mxu0 %vm83_vm1, %v160_v29 }
  0x1b   :  { %3573 = vmatprep.subr.bf16.mxu0 %v6143_v0  ;;  %3196 = vmatmul.mubr.msk.bf16.gmra.mxu1 %vm83_vm1, %v160_v29 }
  0x1c   :  { %573 = vmatpush1.bf16.msra.mxu1 %v4542_v38  ;;  %293 = vmatprep.mubr.bf16.mxu1 %v6138_v3 }
  0x1d   :  { %574 = vmatprep.subr.bf16.mxu1 %v4552_v39  ;;  %1010 = vperm.xlu1 %3967, %v1008_v57  }
  0x1e   :  { %3574 = vmatpush3.bf16.msra.mxu0 %v4490_v27  ;;  %782 = vperm.xlu0 %3966, %v780_v58  }
  0x1f   :  { %3575 = vmatprep.subr.bf16.mxu0 %v6143_v0 }
  0x20   :  { %575 = vmatpush1.bf16.msra.mxu1 %v4567_v41 }
  0x21   :  { %3568 = vmatmul.mubr.msk.bf16.gmra.mxu0 %vm83_vm1, %v161_v36  ;;  %576 = vmatprep.subr.bf16.mxu1 %v4574_v42 }
  0x22   :  { %3576 = vmatpush3.bf16.msra.mxu0 %v4519_v33  ;;  %3587 = vmatprep.mubr.msk.bf16.mxu0 %vm4301_vm0, %v6143_v0 }
  0x23   :  { %3577 = vmatprep.subr.bf16.mxu0 %v6143_v0  ;;  %3197 = vmatmul.mubr.msk.bf16.gmra.mxu1 %vm83_vm1, %v161_v36 }
  0x24   :  { %596 = vmatprep.mubr.bf16.mxu1 %v6138_v3  ;;  %577 = vmatpush1.bf16.msra.mxu1 %v4593_v44 }
  0x25   :  { %578 = vmatprep.subr.bf16.mxu1 %v4605_v46  ;;  %1238 = vperm.xlu1 %3967, %v1236_v61  }
  0x26   :  { %3578 = vmatpush3.bf16.msra.mxu0 %v4537_v37  ;;  %1124 = vperm.xlu0 %3966, %v1122_v62  }
  0x27   :  { %3579 = vmatprep.subr.bf16.mxu0 %v6143_v0 }
  0x28   :  { %579 = vmatpush1.bf16.msra.mxu1 %v4611_v47 }
  0x29   :  { %678 = vmatprep.subr.bf16.mxu1 %v4439_v15  ;;  %1466 = vperm.xlu1 %3967, %v1464_v63  }
  0x2a   :  { %3580 = vmatpush3.bf16.msra.mxu0 %v4562_v40  ;;  %1352 = vperm.xlu0 %3966, %v1350_v1  }
  0x2b   :  { %3581 = vmatprep.subr.bf16.mxu0 %v6143_v0 }
  0x2e   :  { %3582 = vmatpush3.bf16.msra.mxu0 %v4582_v43 }
  0x2f   :  { %3583 = vmatprep.subr.bf16.mxu0 %v6143_v0 }
  0x32   :  { %3584 = vmatpush3.bf16.msra.mxu0 %v4598_v45 }
  0x33   :  { %3585 = vmatprep.subr.bf16.mxu0 %v6143_v0 }
  0x36   :  { %3586 = vmatpush3.bf16.msra.mxu0 %v4616_v48 }
  0x37   :  { %3591 = vmatprep.subr.bf16.mxu0 %v6143_v0 }
  0xcb   :  { %v4666_v16 = vpop.f32.mrf.mxu1 }
  0xcd   :  { %v4682_v31 = vpop.f32.mrf.mxu1 }
  0xcf   :  { %v269_v36 = vpop.f32.mrf.mxu1 }
  0xd0   :  { %v4689_v50 = vadd.f32 %v269_v36, %v4674_v21 }
  0xd1   :  { %v121_v6 = vpop.f32.mrf.mxu0  ;;  %v271_v52 = vpop.f32.mrf.mxu1 }
  0xd2   :  { %v122_v7 = vadd.f32 %v3184_v5, %v121_v6  ;;  %v4701_v54 = vadd.f32 %v271_v52, %v4686_v32 }
  0xd3   :  { %v3557_v10 = vpop.f32.mrf.mxu0  ;;  %v275_v55 = vpop.f32.mrf.mxu1 }
  0xd4   :  { %vm128_vm10 = vcmp.ge.f32.partialorder %v122_v7, 0.0  ;;  %v130_v12 = vmul.f32 0.01, %v122_v7  ;;  %v4707_v57 = vadd.f32 %v275_v55, %v4674_v21 }
  0xd5   :  { %v124_v14 = vpop.f32.mrf.mxu0  ;;  %v277_v59 = vpop.f32.mrf.mxu1 }
  0xd6   :  { %v4668_v18 = vsel %vm128_vm10, %v122_v7, %v130_v12  ;;  %v4670_v19 = vadd.f32 %v3184_v5, %v124_v14  ;;  %v4717_v61 = vadd.f32 %v277_v59, %v4686_v32 }
  0xd7   :  { %v435_v26 = vpack.c.bf16 %v4668_v18, %v4668_v18  ;;  %v3558_v29 = vpop.f32.mrf.mxu0  ;;  %v279_v63 = vpop.f32.mrf.mxu1 }
  0xd8   :  { %6160 = vst [vmem:[#allocation5_spill] sm:$0xff] %v4670_v19  ;;  %v4723_v2 = vadd.f32 %v279_v63, %v4674_v21 }
  0xd9   :  { %597 = vmatmul.mubr.bf16.vlgmr.msra.gmra.mxu1 %v435_v26  ;;  %3588 = vmatmul.mubr.bf16.vlgmr.msra.gmra.mxu0 %v435_v26  ;;  %v3565_v49 = vpop.f32.mrf.mxu0  ;;  %v281_v6 = vpop.f32.mrf.mxu1 }
  0xda   :  { %v4692_v51 = vadd.f32 %v3565_v49, %v4678_v25  ;;  %679 = vmatpush1.bf16.msra.mxu1 %v4445_v17  ;;  %3592 = vmatpush3.bf16.msra.mxu0 %v4465_v22  ;;  %v4733_v10 = vadd.f32 %v281_v6, %v4686_v32 }
  0xdb   :  { %v4696_v53 = vpop.f32.mrf.mxu0  ;;  %680 = vmatprep.subr.bf16.mxu1 %v4458_v20  ;;  %3593 = vmatprep.subr.bf16.mxu0 %v6143_v0  ;;  %v285_v12 = vpop.f32.mrf.mxu1 }
  0xdc   :  { %710 = vmatprep.mubr.bf16.mxu1 %v6138_v3  ;;  %3607 = vmatprep.mubr.msk.bf16.mxu0 %vm4301_vm0, %v6143_v0  ;;  %v4739_v26 = vadd.f32 %v285_v12, %v4674_v21 }
  0xdd   :  { %v3566_v56 = vpop.f32.mrf.mxu0  ;;  %v287_v36 = vpop.f32.mrf.mxu1 }
  0xde   :  { %v4710_v58 = vadd.f32 %v3566_v56, %v4678_v25  ;;  %681 = vmatpush1.bf16.msra.mxu1 %v4470_v23  ;;  %3594 = vmatpush3.bf16.msra.mxu0 %v4490_v27  ;;  %v4749_v49 = vadd.f32 %v287_v36, %v4686_v32 }
  0xdf   :  { %v341_v60 = vpop.f32.mrf.mxu0  ;;  %682 = vmatprep.subr.bf16.mxu1 %v4477_v24  ;;  %3595 = vmatprep.subr.bf16.mxu0 %v6143_v0  ;;  %v289_v52 = vpop.f32.mrf.mxu1 }
  0xe0   :  { %v4720_v62 = vadd.f32 %v341_v60, %v4678_v25  ;;  %v4752_v55 = vadd.f32 %v289_v52, %v4674_v21  ;;  %v266_v52 = vadd.f32 %v4666_v16, %v4674_v21  ;;  %v4793_v16 = vld [vmem:[%s6123_s8] ss:$0 sm:$0xff] }
  0xe1   :  { %v3569_v1 = vpop.f32.mrf.mxu0  ;;  %v291_v56 = vpop.f32.mrf.mxu1 }
  0xe2   :  { %v4726_v5 = vadd.f32 %v3569_v1, %v4678_v25  ;;  %683 = vmatpush1.bf16.msra.mxu1 %v4497_v28  ;;  %3596 = vmatpush3.bf16.msra.mxu0 %v4519_v33  ;;  %v4759_v59 = vadd.f32 %v291_v56, %v4686_v32 }
  0xe3   :  { %v354_v7 = vpop.f32.mrf.mxu0  ;;  %684 = vmatprep.subr.bf16.mxu1 %v4504_v30  ;;  %3597 = vmatprep.subr.bf16.mxu0 %v6143_v0  ;;  %v295_v60 = vpop.f32.mrf.mxu1 }
  0xe4   :  { %6162 = vst [vmem:[#allocation7_spill] sm:$0xff] %v4726_v5  ;;  %v4736_v11 = vadd.f32 %v354_v7, %v4678_v25  ;;  %v4762_v63 = vadd.f32 %v295_v60, %v4674_v21 }
  0xe5   :  { %v3570_v14 = vpop.f32.mrf.mxu0  ;;  %v297_v1 = vpop.f32.mrf.mxu1 }
  0xe6   :  { %v4742_v29 = vadd.f32 %v3570_v14, %v4678_v25  ;;  %685 = vmatpush1.bf16.msra.mxu1 %v4524_v34  ;;  %3598 = vmatpush3.bf16.msra.mxu0 %v4537_v37  ;;  %v4769_v6 = vadd.f32 %v297_v1, %v4686_v32 }
  0xe7   :  { %686 = vmatprep.subr.bf16.mxu1 %v4531_v35  ;;  %3599 = vmatprep.subr.bf16.mxu0 %v6143_v0  ;;  %v299_v7 = vpop.f32.mrf.mxu1  ;;  %v4782_v14 = vpop.f32.mrf.mxu0 }
  0xe8   :  { %6163 = vst [vmem:[#allocation8_spill] sm:$0xff] %v4742_v29  ;;  %v4772_v12 = vadd.f32 %v299_v7, %v4674_v21 }
  0xe9   :  { %v4784_v36 = vpop.f32.mrf.mxu1 }
  0xea   :  { %687 = vmatpush1.bf16.msra.mxu1 %v4542_v38  ;;  %3600 = vmatpush3.bf16.msra.mxu0 %v4562_v40  ;;  %6164 = vst [vmem:[#allocation9_spill] sm:$0xff] %v4772_v12  ;;  %6165 = vst [vmem:[#allocation10_spill] sm:$0xff] %v4784_v36 }
  0xeb   :  { %688 = vmatprep.subr.bf16.mxu1 %v4552_v39  ;;  %3601 = vmatprep.subr.bf16.mxu0 %v6143_v0 }
  0xee   :  { %689 = vmatpush1.bf16.msra.mxu1 %v4567_v41  ;;  %3602 = vmatpush3.bf16.msra.mxu0 %v4582_v43 }
  0xef   :  { %690 = vmatprep.subr.bf16.mxu1 %v4574_v42  ;;  %3603 = vmatprep.subr.bf16.mxu0 %v6143_v0 }
  0xf2   :  { %691 = vmatpush1.bf16.msra.mxu1 %v4593_v44  ;;  %3604 = vmatpush3.bf16.msra.mxu0 %v4598_v45 }
  0xf3   :  { %692 = vmatprep.subr.bf16.mxu1 %v4605_v46  ;;  %3605 = vmatprep.subr.bf16.mxu0 %v6143_v0 }
  0xf6   :  { %693 = vmatpush1.bf16.msra.mxu1 %v4611_v47  ;;  %3606 = vmatpush3.bf16.msra.mxu0 %v4616_v48 }
  0xf7   :  { %792 = vmatprep.subr.bf16.mxu1 %v4439_v15  ;;  %3611 = vmatprep.subr.bf16.mxu0 %v6143_v0  ;;  %v268_v0 = vadd.f32 %v4682_v31, %v4686_v32 }
 0x199   :  { %v598_v56 = vpop.f32.mrf.mxu1  ;;  %v639_v60 = vpop.f32.mrf.mxu0 }
 0x19a   :  { %v645_v1 = vadd.f32 %v598_v56, %v266_v52  ;;  %v6167_v56 = vmov 0.0  }
 0x19b   :  { %v600_v7 = vpop.f32.mrf.mxu1  ;;  %v3589_v9 = vpop.f32.mrf.mxu0 }
 0x19c   :  { %v3227_v13 = vmul.f32 -1.442695, %v645_v1  ;;  %v646_v29 = vadd.f32 %v600_v7, %v268_v0 }
 0x19d   :  { %v602_v8 = vpop.f32.mrf.mxu1  ;;  %v642_v3 = vpop.f32.mrf.mxu0 }
 0x19e   :  { %4090 = vpow2.f32 %v3227_v13  ;;  %v3228_v12 = vmul.f32 -1.442695, %v646_v29  ;;  %v659_v3 = vadd.f32 %v4793_v16, %v639_v60  ;;  %v6168_v60 = vmov 0  }
 0x19f   :  { %v603_v4 = vpop.f32.mrf.mxu1  ;;  %v3590_v19 = vpop.f32.mrf.mxu0 }
 0x1a0   :  { %4092 = vpow2.f32 %v3228_v12  ;;  %v339_v4 = vadd.f32 %v4696_v53, %v4678_v25  ;;  %v4799_v12 = vpop.permute.xlu0 %668 }
 0x1a1   :  { %6166 = vst [vmem:[#allocation11_spill] sm:$0xff] %v4799_v12  ;;  %vm670_vm11 = vcmp.eq.s32.totalorder %v4799_v12, 1 }
 0x1ab   :  { %v4091_v36 = vpop.eup %4090 }
 0x1ac   :  { %v653_v5 = vadd.f32 1.0, %v4091_v36 }
 0x1ad   :  { %v4093_v9 = vpop.eup %4092 }
 0x1ae   :  { %4094 = vrcp.f32 %v653_v5  ;;  %v654_v0 = vadd.f32 1.0, %v4093_v9 }
 0x1bb   :  { %v4095_v8 = vpop.eup %4094 }
 0x1bc   :  { %v660_v13 = vmul.f32 %v4095_v8, %v659_v3 }
 0x1be   :  { %v661_v19 = vadd.f32 %v660_v13, %v339_v4 }
 0x1c0   :  { %4096 = vtanh.f32 %v661_v19 }
 0x1c1   :  { %4098 = vrcp.f32 %v654_v0 }
 0x1cd   :  { %v4097_v21 = vpop.eup %4096 }
 0x1ce   :  { %v663_v31 = vsub.f32 %v4668_v18, %v4097_v21  ;;  %v4099_v5 = vpop.eup %4098 }
 0x1d0   :  { %v664_v29 = vmul.f32 %v4099_v5, %v663_v31 }
 0x1d2   :  { %v4802_v36 = vadd.f32 %v4097_v21, %v664_v29 }
 0x1d4   :  { %v4808_v53 = vsel %vm670_vm11, %v4802_v36, %v4668_v18 }
 0x1d5   :  { %v677_v52 = vpack.c.bf16 %v4808_v53, %v4808_v53 }
 0x1d7   :  { %711 = vmatmul.mubr.bf16.vlgmr.msra.gmra.mxu1 %v677_v52  ;;  %3608 = vmatmul.mubr.bf16.vlgmr.msra.gmra.mxu0 %v677_v52 }
 0x1d8   :  { %793 = vmatpush1.bf16.msra.mxu1 %v4445_v17  ;;  %3612 = vmatpush3.bf16.msra.mxu0 %v4465_v22 }
 0x1d9   :  { %794 = vmatprep.subr.bf16.mxu1 %v4458_v20  ;;  %3613 = vmatprep.subr.bf16.mxu0 %v6167_v56 }
 0x1da   :  { %824 = vmatprep.mubr.bf16.mxu1 %v6168_v60  ;;  %3627 = vmatprep.mubr.msk.bf16.mxu0 %vm4301_vm0, %v6167_v56 }
 0x1dc   :  { %795 = vmatpush1.bf16.msra.mxu1 %v4470_v23  ;;  %3614 = vmatpush3.bf16.msra.mxu0 %v4490_v27 }
 0x1dd   :  { %796 = vmatprep.subr.bf16.mxu1 %v4477_v24  ;;  %3615 = vmatprep.subr.bf16.mxu0 %v6167_v56 }
 0x1e0   :  { %797 = vmatpush1.bf16.msra.mxu1 %v4497_v28  ;;  %3616 = vmatpush3.bf16.msra.mxu0 %v4519_v33 }
 0x1e1   :  { %798 = vmatprep.subr.bf16.mxu1 %v4504_v30  ;;  %3617 = vmatprep.subr.bf16.mxu0 %v6167_v56 }
 0x1e4   :  { %799 = vmatpush1.bf16.msra.mxu1 %v4524_v34  ;;  %3618 = vmatpush3.bf16.msra.mxu0 %v4537_v37 }
 0x1e5   :  { %800 = vmatprep.subr.bf16.mxu1 %v4531_v35  ;;  %3619 = vmatprep.subr.bf16.mxu0 %v6167_v56 }
 0x1e8   :  { %801 = vmatpush1.bf16.msra.mxu1 %v4542_v38  ;;  %3620 = vmatpush3.bf16.msra.mxu0 %v4562_v40 }
 0x1e9   :  { %802 = vmatprep.subr.bf16.mxu1 %v4552_v39  ;;  %3621 = vmatprep.subr.bf16.mxu0 %v6167_v56 }
 0x1ec   :  { %803 = vmatpush1.bf16.msra.mxu1 %v4567_v41  ;;  %3622 = vmatpush3.bf16.msra.mxu0 %v4582_v43 }
 0x1ed   :  { %804 = vmatprep.subr.bf16.mxu1 %v4574_v42  ;;  %3623 = vmatprep.subr.bf16.mxu0 %v6167_v56 }
 0x1f0   :  { %805 = vmatpush1.bf16.msra.mxu1 %v4593_v44  ;;  %3624 = vmatpush3.bf16.msra.mxu0 %v4598_v45 }
 0x1f1   :  { %806 = vmatprep.subr.bf16.mxu1 %v4605_v46  ;;  %3625 = vmatprep.subr.bf16.mxu0 %v6167_v56 }
 0x1f4   :  { %807 = vmatpush1.bf16.msra.mxu1 %v4611_v47  ;;  %3626 = vmatpush3.bf16.msra.mxu0 %v4616_v48 }
 0x1f5   :  { %906 = vmatprep.subr.bf16.mxu1 %v4439_v15  ;;  %3631 = vmatprep.subr.bf16.mxu0 %v6167_v56 }
 0x297   :  { %v712_v18 = vpop.f32.mrf.mxu1  ;;  %v753_v1 = vpop.f32.mrf.mxu0 }
 0x298   :  { %v759_v7 = vadd.f32 %v712_v18, %v4689_v50  ;;  %v773_v32 = vadd.f32 %v4793_v16, %v753_v1 }
 0x299   :  { %v714_v9 = vpop.f32.mrf.mxu1  ;;  %v3609_v3 = vpop.f32.mrf.mxu0 }
 0x29a   :  { %v3229_v8 = vmul.f32 -1.442695, %v759_v7  ;;  %v760_v21 = vadd.f32 %v714_v9, %v4701_v54  ;;  %v4852_v9 = vpop.permute.xlu0 %782 }
 0x29b   :  { %v716_v4 = vpop.f32.mrf.mxu1  ;;  %v756_v13 = vpop.f32.mrf.mxu0  ;;  %vm784_vm12 = vcmp.eq.s32.totalorder %v4852_v9, 1 }
 0x29c   :  { %4100 = vpow2.f32 %v3229_v8  ;;  %v3230_v31 = vmul.f32 -1.442695, %v760_v21  ;;  %vm5240_vm3 = vmpackc.low %vm784_vm12, %vm670_vm11 }
 0x29d   :  { %v717_v19 = vpop.f32.mrf.mxu1  ;;  %v3610_v0 = vpop.f32.mrf.mxu0 }
 0x29e   :  { %4102 = vpow2.f32 %v3230_v31 }
 0x2a9   :  { %v4101_v5 = vpop.eup %4100 }
 0x2aa   :  { %v767_v29 = vadd.f32 1.0, %v4101_v5 }
 0x2ab   :  { %v4103_v52 = vpop.eup %4102 }
 0x2ac   :  { %4104 = vrcp.f32 %v767_v29  ;;  %v768_v7 = vadd.f32 1.0, %v4103_v52 }
 0x2b9   :  { %v4105_v12 = vpop.eup %4104 }
 0x2ba   :  { %v774_v50 = vmul.f32 %v4105_v12, %v773_v32 }
 0x2bc   :  { %v775_v18 = vadd.f32 %v774_v50, %v4720_v62 }
 0x2be   :  { %4106 = vtanh.f32 %v775_v18 }
 0x2bf   :  { %4108 = vrcp.f32 %v768_v7 }
 0x2cb   :  { %v4107_v3 = vpop.eup %4106 }
 0x2cc   :  { %v777_v8 = vsub.f32 %v4808_v53, %v4107_v3  ;;  %v4109_v4 = vpop.eup %4108 }
 0x2ce   :  { %v778_v54 = vmul.f32 %v4109_v4, %v777_v8 }
 0x2d0   :  { %v4854_v13 = vadd.f32 %v4107_v3, %v778_v54 }
 0x2d2   :  { %v4861_v32 = vsel %vm784_vm12, %v4854_v13, %v4808_v53 }
 0x2d3   :  { %v791_v62 = vpack.c.bf16 %v4861_v32, %v4861_v32 }
 0x2d5   :  { %825 = vmatmul.mubr.bf16.vlgmr.msra.gmra.mxu1 %v791_v62  ;;  %3628 = vmatmul.mubr.bf16.vlgmr.msra.gmra.mxu0 %v791_v62 }
 0x2d6   :  { %907 = vmatpush1.bf16.msra.mxu1 %v4445_v17  ;;  %3632 = vmatpush3.bf16.msra.mxu0 %v4465_v22 }
 0x2d7   :  { %908 = vmatprep.subr.bf16.mxu1 %v4458_v20  ;;  %3633 = vmatprep.subr.bf16.mxu0 %v6167_v56 }
 0x2d8   :  { %938 = vmatprep.mubr.bf16.mxu1 %v6168_v60  ;;  %3647 = vmatprep.mubr.msk.bf16.mxu0 %vm4301_vm0, %v6167_v56 }
 0x2da   :  { %909 = vmatpush1.bf16.msra.mxu1 %v4470_v23  ;;  %3634 = vmatpush3.bf16.msra.mxu0 %v4490_v27 }
 0x2db   :  { %910 = vmatprep.subr.bf16.mxu1 %v4477_v24  ;;  %3635 = vmatprep.subr.bf16.mxu0 %v6167_v56 }
 0x2de   :  { %911 = vmatpush1.bf16.msra.mxu1 %v4497_v28  ;;  %3636 = vmatpush3.bf16.msra.mxu0 %v4519_v33 }
 0x2df   :  { %912 = vmatprep.subr.bf16.mxu1 %v4504_v30  ;;  %3637 = vmatprep.subr.bf16.mxu0 %v6167_v56 }
 0x2e2   :  { %913 = vmatpush1.bf16.msra.mxu1 %v4524_v34  ;;  %3638 = vmatpush3.bf16.msra.mxu0 %v4537_v37 }
 0x2e3   :  { %914 = vmatprep.subr.bf16.mxu1 %v4531_v35  ;;  %3639 = vmatprep.subr.bf16.mxu0 %v6167_v56 }
 0x2e6   :  { %915 = vmatpush1.bf16.msra.mxu1 %v4542_v38  ;;  %3640 = vmatpush3.bf16.msra.mxu0 %v4562_v40 }
 0x2e7   :  { %916 = vmatprep.subr.bf16.mxu1 %v4552_v39  ;;  %3641 = vmatprep.subr.bf16.mxu0 %v6167_v56 }
 0x2ea   :  { %917 = vmatpush1.bf16.msra.mxu1 %v4567_v41  ;;  %3642 = vmatpush3.bf16.msra.mxu0 %v4582_v43 }
 0x2eb   :  { %918 = vmatprep.subr.bf16.mxu1 %v4574_v42  ;;  %3643 = vmatprep.subr.bf16.mxu0 %v6167_v56 }
 0x2ee   :  { %919 = vmatpush1.bf16.msra.mxu1 %v4593_v44  ;;  %3644 = vmatpush3.bf16.msra.mxu0 %v4598_v45 }
 0x2ef   :  { %920 = vmatprep.subr.bf16.mxu1 %v4605_v46  ;;  %3645 = vmatprep.subr.bf16.mxu0 %v6167_v56 }
 0x2f2   :  { %921 = vmatpush1.bf16.msra.mxu1 %v4611_v47  ;;  %3646 = vmatpush3.bf16.msra.mxu0 %v4616_v48 }
 0x2f3   :  { %1020 = vmatprep.subr.bf16.mxu1 %v4439_v15  ;;  %3651 = vmatprep.subr.bf16.mxu0 %v6167_v56 }
 0x395   :  { %v826_v12 = vpop.f32.mrf.mxu1  ;;  %v867_v53 = vpop.f32.mrf.mxu0 }
 0x396   :  { %v873_v1 = vadd.f32 %v826_v12, %v4707_v57  ;;  %v887_v4 = vadd.f32 %v4793_v16, %v867_v53 }
 0x397   :  { %v828_v19 = vpop.f32.mrf.mxu1  ;;  %v3629_v0 = vpop.f32.mrf.mxu0 }
 0x398   :  { %v3231_v21 = vmul.f32 -1.442695, %v873_v1  ;;  %v874_v50 = vadd.f32 %v828_v19, %v4717_v61  ;;  %v4905_v61 = vpop.permute.xlu1 %896 }
 0x399   :  { %v830_v31 = vpop.f32.mrf.mxu1  ;;  %v870_v5 = vpop.f32.mrf.mxu0  ;;  %vm898_vm13 = vcmp.eq.s32.totalorder %v4905_v61, 1 }
 0x39a   :  { %4110 = vpow2.f32 %v3231_v21  ;;  %v3232_v18 = vmul.f32 -1.442695, %v874_v50 }
 0x39b   :  { %v831_v29 = vpop.f32.mrf.mxu1  ;;  %v3630_v52 = vpop.f32.mrf.mxu0 }
 0x39c   :  { %4112 = vpow2.f32 %v3232_v18 }
 0x3a7   :  { %v4111_v7 = vpop.eup %4110 }
 0x3a8   :  { %v881_v3 = vadd.f32 1.0, %v4111_v7 }
 0x3a9   :  { %v4113_v8 = vpop.eup %4112 }
 0x3aa   :  { %4114 = vrcp.f32 %v881_v3  ;;  %v882_v12 = vadd.f32 1.0, %v4113_v8 }
 0x3b7   :  { %v4115_v54 = vpop.eup %4114 }
 0x3b8   :  { %v888_v57 = vmul.f32 %v4115_v54, %v887_v4 }
 0x3ba   :  { %v889_v62 = vadd.f32 %v888_v57, %v4692_v51 }
 0x3bc   :  { %4116 = vtanh.f32 %v889_v62 }
 0x3bd   :  { %4118 = vrcp.f32 %v882_v12 }
 0x3c9   :  { %v4117_v1 = vpop.eup %4116 }
 0x3ca   :  { %v891_v0 = vsub.f32 %v4861_v32, %v4117_v1  ;;  %v4119_v21 = vpop.eup %4118 }
 0x3cc   :  { %v892_v19 = vmul.f32 %v4119_v21, %v891_v0 }
 0x3ce   :  { %v4908_v31 = vadd.f32 %v4117_v1, %v892_v19 }
 0x3d0   :  { %v4914_v53 = vsel %vm898_vm13, %v4908_v31, %v4861_v32 }
 0x3d1   :  { %v905_v51 = vpack.c.bf16 %v4914_v53, %v4914_v53 }
 0x3d3   :  { %939 = vmatmul.mubr.bf16.vlgmr.msra.gmra.mxu1 %v905_v51  ;;  %3648 = vmatmul.mubr.bf16.vlgmr.msra.gmra.mxu0 %v905_v51 }
 0x3d4   :  { %1021 = vmatpush1.bf16.msra.mxu1 %v4445_v17  ;;  %3652 = vmatpush3.bf16.msra.mxu0 %v4465_v22 }
 0x3d5   :  { %1022 = vmatprep.subr.bf16.mxu1 %v4458_v20  ;;  %3653 = vmatprep.subr.bf16.mxu0 %v6167_v56 }
 0x3d6   :  { %1052 = vmatprep.mubr.bf16.mxu1 %v6168_v60  ;;  %3667 = vmatprep.mubr.msk.bf16.mxu0 %vm4301_vm0, %v6167_v56 }
 0x3d8   :  { %1023 = vmatpush1.bf16.msra.mxu1 %v4470_v23  ;;  %3654 = vmatpush3.bf16.msra.mxu0 %v4490_v27 }
 0x3d9   :  { %1024 = vmatprep.subr.bf16.mxu1 %v4477_v24  ;;  %3655 = vmatprep.subr.bf16.mxu0 %v6167_v56 }
 0x3dc   :  { %1025 = vmatpush1.bf16.msra.mxu1 %v4497_v28  ;;  %3656 = vmatpush3.bf16.msra.mxu0 %v4519_v33 }
 0x3dd   :  { %1026 = vmatprep.subr.bf16.mxu1 %v4504_v30  ;;  %3657 = vmatprep.subr.bf16.mxu0 %v6167_v56 }
 0x3e0   :  { %1027 = vmatpush1.bf16.msra.mxu1 %v4524_v34  ;;  %3658 = vmatpush3.bf16.msra.mxu0 %v4537_v37 }
 0x3e1   :  { %1028 = vmatprep.subr.bf16.mxu1 %v4531_v35  ;;  %3659 = vmatprep.subr.bf16.mxu0 %v6167_v56 }
 0x3e4   :  { %1029 = vmatpush1.bf16.msra.mxu1 %v4542_v38  ;;  %3660 = vmatpush3.bf16.msra.mxu0 %v4562_v40 }
 0x3e5   :  { %1030 = vmatprep.subr.bf16.mxu1 %v4552_v39  ;;  %3661 = vmatprep.subr.bf16.mxu0 %v6167_v56 }
 0x3e8   :  { %1031 = vmatpush1.bf16.msra.mxu1 %v4567_v41  ;;  %3662 = vmatpush3.bf16.msra.mxu0 %v4582_v43 }
 0x3e9   :  { %1032 = vmatprep.subr.bf16.mxu1 %v4574_v42  ;;  %3663 = vmatprep.subr.bf16.mxu0 %v6167_v56 }
 0x3ec   :  { %1033 = vmatpush1.bf16.msra.mxu1 %v4593_v44  ;;  %3664 = vmatpush3.bf16.msra.mxu0 %v4598_v45 }
 0x3ed   :  { %1034 = vmatprep.subr.bf16.mxu1 %v4605_v46  ;;  %3665 = vmatprep.subr.bf16.mxu0 %v6167_v56 }
 0x3f0   :  { %1035 = vmatpush1.bf16.msra.mxu1 %v4611_v47  ;;  %3666 = vmatpush3.bf16.msra.mxu0 %v4616_v48 }
 0x3f1   :  { %1134 = vmatprep.subr.bf16.mxu1 %v4439_v15  ;;  %3671 = vmatprep.subr.bf16.mxu0 %v6167_v56 }
 0x493   :  { %v940_v32 = vpop.f32.mrf.mxu1  ;;  %v981_v5 = vpop.f32.mrf.mxu0 }
 0x494   :  { %v987_v29 = vadd.f32 %v940_v32, %v4723_v2  ;;  %v1001_v1 = vadd.f32 %v4793_v16, %v981_v5 }
 0x495   :  { %v942_v52 = vpop.f32.mrf.mxu1  ;;  %v3649_v50 = vpop.f32.mrf.mxu0 }
 0x496   :  { %v3233_v18 = vmul.f32 -1.442695, %v987_v29  ;;  %v988_v54 = vadd.f32 %v942_v52, %v4733_v10  ;;  %v4958_v52 = vpop.permute.xlu1 %1010 }
 0x497   :  { %v944_v7 = vpop.f32.mrf.mxu1  ;;  %v984_v3 = vpop.f32.mrf.mxu0  ;;  %vm1012_vm14 = vcmp.eq.s32.totalorder %v4958_v52, 1 }
 0x498   :  { %4120 = vpow2.f32 %v3233_v18  ;;  %v3234_v57 = vmul.f32 -1.442695, %v988_v54  ;;  %vm5311_vm4 = vmpackc.low %vm1012_vm14, %vm898_vm13 }
 0x499   :  { %v945_v8 = vpop.f32.mrf.mxu1  ;;  %v3650_v4 = vpop.f32.mrf.mxu0 }
 0x49a   :  { %4122 = vpow2.f32 %v3234_v57 }
 0x4a5   :  { %v4121_v62 = vpop.eup %4120 }
 0x4a6   :  { %v995_v12 = vadd.f32 1.0, %v4121_v62 }
 0x4a7   :  { %v4123_v15 = vpop.eup %4122 }
 0x4a8   :  { %4124 = vrcp.f32 %v995_v12  ;;  %v996_v19 = vadd.f32 1.0, %v4123_v15  ;;  %v5016_v15 = vpop.permute.xlu0 %1124 }
 0x4a9   :  { %6169 = vst [vmem:[#allocation12_spill] sm:$0xff] %v5016_v15  ;;  %vm1126_vm15 = vcmp.eq.s32.totalorder %v5016_v15, 1 }
 0x4b5   :  { %v4125_v0 = vpop.eup %4124 }
 0x4b6   :  { %v1002_v2 = vmul.f32 %v4125_v0, %v1001_v1 }
 0x4b8   :  { %v1003_v21 = vadd.f32 %v1002_v2, %v4710_v58  ;;  %v5032_v2 = vld [vmem:[%s6119_s6 + $0xa8] ss:$12 sps:$4 sm:$0xff]  }
 0x4ba   :  { %4126 = vtanh.f32 %v1003_v21  ;;  %v5038_v21 = vld [vmem:[%s6119_s6 + $0xb0] ss:$12 sps:$4 sm:$0xff]  }
 0x4bb   :  { %4128 = vrcp.f32 %v996_v19  ;;  %v5044_v19 = vld [vmem:[%s6119_s6 + $0x94] ss:$12 sps:$4 sm:$0xff]  }
 0x4c7   :  { %v4127_v51 = vpop.eup %4126 }
 0x4c8   :  { %v1005_v32 = vsub.f32 %v4914_v53, %v4127_v51  ;;  %v4129_v29 = vpop.eup %4128 }
 0x4ca   :  { %v1006_v10 = vmul.f32 %v4129_v29, %v1005_v32  ;;  %v5060_v32 = vld [vmem:[%s6119_s6 + $0x98] ss:$12 sps:$4 sm:$0xff]   ;;  %v5066_v29 = vld [vmem:[%s6119_s6 + $0x7c] ss:$12 sps:$4 sm:$0xff]  }
 0x4cc   :  { %v4960_v50 = vadd.f32 %v4127_v51, %v1006_v10  ;;  %v5054_v51 = vld [vmem:[%s6119_s6 + $0x90] ss:$12 sps:$4 sm:$0xff]   ;;  %v5073_v10 = vld [vmem:[%s6119_s6 + $0x78] ss:$12 sps:$4 sm:$0xff]  }
 0x4ce   :  { %v4967_v5 = vsel %vm1012_vm14, %v4960_v50, %v4914_v53 }
 0x4cf   :  { %v1019_v58 = vpack.c.bf16 %v4967_v5, %v4967_v5 }
 0x4d1   :  { %1053 = vmatmul.mubr.bf16.vlgmr.msra.gmra.mxu1 %v1019_v58  ;;  %3668 = vmatmul.mubr.bf16.vlgmr.msra.gmra.mxu0 %v1019_v58  ;;  %v5085_v58 = vld [vmem:[%s6119_s6 + $0x64] ss:$12 sps:$4 sm:$0xff]  }
 0x4d2   :  { %1135 = vmatpush1.bf16.msra.mxu1 %v4445_v17  ;;  %3672 = vmatpush3.bf16.msra.mxu0 %v4465_v22  ;;  %v5007_v17 = vld [vmem:[%s6119_s6 + $0xac] ss:$12 sps:$4 sm:$0xff]  }
 0x4d3   :  { %1136 = vmatprep.subr.bf16.mxu1 %v4458_v20  ;;  %3673 = vmatprep.subr.bf16.mxu0 %v6167_v56 }
 0x4d4   :  { %1166 = vmatprep.mubr.bf16.mxu1 %v6168_v60  ;;  %3687 = vmatprep.mubr.msk.bf16.mxu0 %vm4301_vm0, %v6167_v56 }
 0x4d6   :  { %1137 = vmatpush1.bf16.msra.mxu1 %v4470_v23  ;;  %3674 = vmatpush3.bf16.msra.mxu0 %v4490_v27 }
 0x4d7   :  { %1138 = vmatprep.subr.bf16.mxu1 %v4477_v24  ;;  %3675 = vmatprep.subr.bf16.mxu0 %v6167_v56 }
 0x4da   :  { %1139 = vmatpush1.bf16.msra.mxu1 %v4497_v28  ;;  %3676 = vmatpush3.bf16.msra.mxu0 %v4519_v33 }
 0x4db   :  { %1140 = vmatprep.subr.bf16.mxu1 %v4504_v30  ;;  %3677 = vmatprep.subr.bf16.mxu0 %v6167_v56 }
 0x4de   :  { %1141 = vmatpush1.bf16.msra.mxu1 %v4524_v34  ;;  %3678 = vmatpush3.bf16.msra.mxu0 %v4537_v37 }
 0x4df   :  { %1142 = vmatprep.subr.bf16.mxu1 %v4531_v35  ;;  %3679 = vmatprep.subr.bf16.mxu0 %v6167_v56 }
 0x4e2   :  { %1143 = vmatpush1.bf16.msra.mxu1 %v4542_v38  ;;  %3680 = vmatpush3.bf16.msra.mxu0 %v4562_v40 }
 0x4e3   :  { %1144 = vmatprep.subr.bf16.mxu1 %v4552_v39  ;;  %3681 = vmatprep.subr.bf16.mxu0 %v6167_v56 }
 0x4e6   :  { %1145 = vmatpush1.bf16.msra.mxu1 %v4567_v41  ;;  %3682 = vmatpush3.bf16.msra.mxu0 %v4582_v43 }
 0x4e7   :  { %1146 = vmatprep.subr.bf16.mxu1 %v4574_v42  ;;  %3683 = vmatprep.subr.bf16.mxu0 %v6167_v56 }
 0x4ea   :  { %1147 = vmatpush1.bf16.msra.mxu1 %v4593_v44  ;;  %3684 = vmatpush3.bf16.msra.mxu0 %v4598_v45 }
 0x4eb   :  { %1148 = vmatprep.subr.bf16.mxu1 %v4605_v46  ;;  %3685 = vmatprep.subr.bf16.mxu0 %v6167_v56 }
 0x4ee   :  { %1149 = vmatpush1.bf16.msra.mxu1 %v4611_v47  ;;  %3686 = vmatpush3.bf16.msra.mxu0 %v4616_v48 }
 0x4ef   :  { %1248 = vmatprep.subr.bf16.mxu1 %v5007_v17  ;;  %3691 = vmatprep.subr.bf16.mxu0 %v6167_v56 }
 0x591   :  { %v1054_v20 = vpop.f32.mrf.mxu1  ;;  %v1095_v22 = vpop.f32.mrf.mxu0 }
 0x592   :  { %v1101_v23 = vadd.f32 %v1054_v20, %v4739_v26  ;;  %v1115_v3 = vadd.f32 %v4793_v16, %v1095_v22  ;;  %v5092_v20 = vld [vmem:[%s6119_s6 + $0x60] ss:$12 sps:$4 sm:$0xff]   ;;  %v5098_v22 = vld [vmem:[%s6119_s6 + $0x68] ss:$12 sps:$4 sm:$0xff]  }
 0x593   :  { %v1056_v24 = vpop.f32.mrf.mxu1  ;;  %v3669_v27 = vpop.f32.mrf.mxu0 }
 0x594   :  { %v3235_v28 = vmul.f32 -1.442695, %v1101_v23  ;;  %v1102_v37 = vadd.f32 %v1056_v24, %v4749_v49  ;;  %v5104_v23 = vld [vmem:[%s6119_s6 + $0x4c] ss:$12 sps:$4 sm:$0xff]   ;;  %v5111_v24 = vld [vmem:[%s6119_s6 + $0x48] ss:$12 sps:$4 sm:$0xff]  }
 0x595   :  { %v1058_v30 = vpop.f32.mrf.mxu1  ;;  %v1098_v33 = vpop.f32.mrf.mxu0 }
 0x596   :  { %4130 = vpow2.f32 %v3235_v28  ;;  %v3236_v38 = vmul.f32 -1.442695, %v1102_v37 }
 0x597   :  { %v1059_v34 = vpop.f32.mrf.mxu1  ;;  %v3670_v35 = vpop.f32.mrf.mxu0 }
 0x598   :  { %4132 = vpow2.f32 %v3236_v38 }
 0x5a3   :  { %v4131_v53 = vpop.eup %4130 }
 0x5a4   :  { %v1109_v18 = vadd.f32 1.0, %v4131_v53 }
 0x5a5   :  { %v4133_v7 = vpop.eup %4132 }
 0x5a6   :  { %4134 = vrcp.f32 %v1109_v18  ;;  %v1110_v54 = vadd.f32 1.0, %v4133_v7 }
 0x5b3   :  { %v4135_v8 = vpop.eup %4134 }
 0x5b4   :  { %v1116_v26 = vmul.f32 %v4135_v8, %v1115_v3  ;;  %v5135_v8 = vpop.permute.xlu1 %1238 }
 0x5b5   :  { %6170 = vst [vmem:[#allocation13_spill] sm:$0xff] %v5135_v8  ;;  %vm1240_vm1 = vcmp.eq.s32.totalorder %v5135_v8, 1 }
 0x5b6   :  { %v1117_v4 = vadd.f32 %v1116_v26, %v4736_v11  ;;  %vm5321_vm5 = vmpackc.low %vm1240_vm1, %vm1126_vm15 }
 0x5b8   :  { %4136 = vtanh.f32 %v1117_v4  ;;  %v4264_v4 = vld [vmem:[%s6119_s6 + $0x50] ss:$12 sps:$4 sm:$0xff]  }
 0x5b9   :  { %4138 = vrcp.f32 %v1110_v54  ;;  %v4265_v54 = vld [vmem:[%s6119_s6 + $0x34] ss:$12 sps:$4 sm:$0xff]  }
 0x5c5   :  { %v4137_v57 = vpop.eup %4136 }
 0x5c6   :  { %v1119_v62 = vsub.f32 %v4967_v5, %v4137_v57  ;;  %v4139_v12 = vpop.eup %4138 }
 0x5c8   :  { %v1120_v49 = vmul.f32 %v4139_v12, %v1119_v62  ;;  %v4267_v62 = vld [vmem:[%s6119_s6 + $0x38] ss:$12 sps:$4 sm:$0xff]   ;;  %v4268_v12 = vld [vmem:[%s6119_s6 + $0x1c] ss:$12 sps:$4 sm:$0xff]  }
 0x5ca   :  { %v5018_v1 = vadd.f32 %v4137_v57, %v1120_v49  ;;  %v4266_v57 = vld [vmem:[%s6119_s6 + $0x30] ss:$12 sps:$4 sm:$0xff]   ;;  %v4269_v49 = vld [vmem:[%s6119_s6 + $0x18] ss:$12 sps:$4 sm:$0xff]  }
 0x5cc   :  { %v5025_v0 = vsel %vm1126_vm15, %v5018_v1, %v4967_v5  ;;  %v5079_v5 = vld [vmem:[%s6119_s6 + $0x80] ss:$12 sps:$4 sm:$0xff]  }
 0x5cd   :  { %v1133_v11 = vpack.c.bf16 %v5025_v0, %v5025_v0 }
 0x5cf   :  { %1167 = vmatmul.mubr.bf16.vlgmr.msra.gmra.mxu1 %v1133_v11  ;;  %3688 = vmatmul.mubr.bf16.vlgmr.msra.gmra.mxu0 %v1133_v11  ;;  %v4271_v11 = vld [vmem:[%s6119_s6 + $0x4] ss:$12 sps:$4 sm:$0xff]  }
 0x5d0   :  { %1249 = vmatpush1.bf16.msra.mxu1 %v5032_v2  ;;  %3692 = vmatpush3.bf16.msra.mxu0 %v5038_v21 }
 0x5d1   :  { %1250 = vmatprep.subr.bf16.mxu1 %v5044_v19  ;;  %3693 = vmatprep.subr.bf16.mxu0 %v6167_v56 }
 0x5d2   :  { %1280 = vmatprep.mubr.bf16.mxu1 %v6168_v60  ;;  %3707 = vmatprep.mubr.msk.bf16.mxu0 %vm4301_vm0, %v6167_v56 }
 0x5d4   :  { %1251 = vmatpush1.bf16.msra.mxu1 %v5054_v51  ;;  %3694 = vmatpush3.bf16.msra.mxu0 %v5060_v32 }
 0x5d5   :  { %1252 = vmatprep.subr.bf16.mxu1 %v5066_v29  ;;  %3695 = vmatprep.subr.bf16.mxu0 %v6167_v56 }
 0x5d8   :  { %1253 = vmatpush1.bf16.msra.mxu1 %v5073_v10  ;;  %3696 = vmatpush3.bf16.msra.mxu0 %v5079_v5 }
 0x5d9   :  { %1254 = vmatprep.subr.bf16.mxu1 %v5085_v58  ;;  %3697 = vmatprep.subr.bf16.mxu0 %v6167_v56 }
 0x5dc   :  { %1255 = vmatpush1.bf16.msra.mxu1 %v5092_v20  ;;  %3698 = vmatpush3.bf16.msra.mxu0 %v5098_v22 }
 0x5dd   :  { %1256 = vmatprep.subr.bf16.mxu1 %v5104_v23  ;;  %3699 = vmatprep.subr.bf16.mxu0 %v6167_v56 }
 0x5e0   :  { %1257 = vmatpush1.bf16.msra.mxu1 %v5111_v24  ;;  %3700 = vmatpush3.bf16.msra.mxu0 %v4562_v40 }
 0x5e1   :  { %1258 = vmatprep.subr.bf16.mxu1 %v4552_v39  ;;  %3701 = vmatprep.subr.bf16.mxu0 %v6167_v56 }
 0x5e4   :  { %1259 = vmatpush1.bf16.msra.mxu1 %v4567_v41  ;;  %3702 = vmatpush3.bf16.msra.mxu0 %v4582_v43 }
 0x5e5   :  { %1260 = vmatprep.subr.bf16.mxu1 %v4574_v42  ;;  %3703 = vmatprep.subr.bf16.mxu0 %v6167_v56 }
 0x5e8   :  { %1261 = vmatpush1.bf16.msra.mxu1 %v4593_v44  ;;  %3704 = vmatpush3.bf16.msra.mxu0 %v4598_v45 }
 0x5e9   :  { %1262 = vmatprep.subr.bf16.mxu1 %v4605_v46  ;;  %3705 = vmatprep.subr.bf16.mxu0 %v6167_v56 }
 0x5ec   :  { %1263 = vmatpush1.bf16.msra.mxu1 %v4611_v47  ;;  %3706 = vmatpush3.bf16.msra.mxu0 %v4616_v48 }
 0x5ed   :  { %1362 = vmatprep.subr.bf16.mxu1 %v5007_v17  ;;  %3711 = vmatprep.subr.bf16.mxu0 %v6167_v56 }
 0x68f   :  { %v1168_v39 = vpop.f32.mrf.mxu1  ;;  %v1209_v40 = vpop.f32.mrf.mxu0 }
 0x690   :  { %v1215_v41 = vadd.f32 %v1168_v39, %v4752_v55  ;;  %v1229_v34 = vadd.f32 %v4793_v16, %v1209_v40  ;;  %v358_v55 = vadd.f32 %v4782_v14, %v4678_v25 }
 0x691   :  { %v1170_v42 = vpop.f32.mrf.mxu1  ;;  %v3689_v43 = vpop.f32.mrf.mxu0 }
 0x692   :  { %v3237_v44 = vmul.f32 -1.442695, %v1215_v41  ;;  %v1216_v47 = vadd.f32 %v1170_v42, %v4759_v59 }
 0x693   :  { %v1172_v45 = vpop.f32.mrf.mxu1  ;;  %v1212_v27 = vpop.f32.mrf.mxu0 }
 0x694   :  { %4140 = vpow2.f32 %v3237_v44  ;;  %v3238_v30 = vmul.f32 -1.442695, %v1216_v47 }
 0x695   :  { %v1173_v46 = vpop.f32.mrf.mxu1  ;;  %v3690_v28 = vpop.f32.mrf.mxu0 }
 0x696   :  { %4142 = vpow2.f32 %v3238_v30  ;;  %v6171_v46 = vld [vmem:[#allocation7_spill] sm:$0xff] }
 0x6a1   :  { %v4141_v48 = vpop.eup %4140 }
 0x6a2   :  { %v1223_v33 = vadd.f32 1.0, %v4141_v48 }
 0x6a3   :  { %v4143_v17 = vpop.eup %4142 }
 0x6a4   :  { %4144 = vrcp.f32 %v1223_v33  ;;  %v1224_v53 = vadd.f32 1.0, %v4143_v17 }
 0x6b1   :  { %v4145_v35 = vpop.eup %4144 }
 0x6b2   :  { %v1230_v37 = vmul.f32 %v4145_v35, %v1229_v34 }
 0x6b4   :  { %v1231_v38 = vadd.f32 %v1230_v37, %v358_v55  ;;  %v4016_v37 = vld [vmem:[%s6124_s9 + $0x94] ss:$12 sps:$4 sm:$0xff]  }
 0x6b6   :  { %4146 = vtanh.f32 %v1231_v38  ;;  %v4017_v38 = vld [vmem:[%s6124_s9 + $0x98] ss:$12 sps:$4 sm:$0xff]  }
 0x6b7   :  { %4148 = vrcp.f32 %v1224_v53  ;;  %v3327_v53 = vpack.c.bf16 %v4854_v13, %v4802_v36  ;;  %v4020_v36 = vld [vmem:[%s6124_s9 + $0x7c] ss:$12 sps:$4 sm:$0xff]   ;;  %v4021_v13 = vld [vmem:[%s6124_s9 + $0x80] ss:$12 sps:$4 sm:$0xff]  }
 0x6c3   :  { %v4147_v18 = vpop.eup %4146 }
 0x6c4   :  { %v1233_v59 = vsub.f32 %v5025_v0, %v4147_v18  ;;  %v4149_v7 = vpop.eup %4148 }
 0x6c6   :  { %v1234_v3 = vmul.f32 %v4149_v7, %v1233_v59  ;;  %v6174_v59 = vmov 0  ;;  %v4014_v7 = vld [vmem:[%s6124_s9 + $0x90] ss:$12 sps:$4 sm:$0xff]  }
 0x6c7   :  { %v6175_v59 = vsel %vm5240_vm3, 4294967295, %v6174_v59 }
 0x6c8   :  { %v5137_v26 = vadd.f32 %v4147_v18, %v1234_v3  ;;  %6176 = vst [vmem:[#allocation11_spill] sm:$0xff] %v6175_v59  ;;  %v4018_v3 = vld [vmem:[%s6124_s9 + $0x78] ss:$12 sps:$4 sm:$0xff]  }
 0x6ca   :  { %v5144_v25 = vsel %vm1240_vm1, %v5137_v26, %v5025_v0  ;;  %v4270_v0 = vld [vmem:[%s6119_s6 + $0x20] ss:$12 sps:$4 sm:$0xff]  }
 0x6cb   :  { %v1247_v14 = vpack.c.bf16 %v5144_v25, %v5144_v25 }
 0x6cd   :  { %1281 = vmatmul.mubr.bf16.vlgmr.msra.gmra.mxu1 %v1247_v14  ;;  %3708 = vmatmul.mubr.bf16.vlgmr.msra.gmra.mxu0 %v1247_v14  ;;  %v4025_v14 = vld [vmem:[%s6124_s9 + $0x68] ss:$12 sps:$4 sm:$0xff]  }
 0x6ce   :  { %1363 = vmatpush1.bf16.msra.mxu1 %v5032_v2  ;;  %3712 = vmatpush3.bf16.msra.mxu0 %v5038_v21  ;;  %v4272_v2 = vld [vmem:[%s6119_s6] ss:$12 sps:$4 sm:$0xff]   ;;  %v4273_v21 = vld [vmem:[%s6119_s6 + $0x8] ss:$12 sps:$4 sm:$0xff]  }
 0x6cf   :  { %1364 = vmatprep.subr.bf16.mxu1 %v5044_v19  ;;  %3713 = vmatprep.subr.bf16.mxu0 %v6167_v56  ;;  %v4012_v19 = vld [vmem:[%s6124_s9 + $0xac] ss:$12 sps:$4 sm:$0xff]  }
 0x6d0   :  { %1394 = vmatprep.mubr.bf16.mxu1 %v6168_v60  ;;  %3727 = vmatprep.mubr.msk.bf16.mxu0 %vm4301_vm0, %v6167_v56 }
 0x6d2   :  { %1365 = vmatpush1.bf16.msra.mxu1 %v5054_v51  ;;  %3714 = vmatpush3.bf16.msra.mxu0 %v5060_v32  ;;  %v4013_v51 = vld [vmem:[%s6124_s9 + $0xb0] ss:$12 sps:$4 sm:$0xff]  }
 0x6d3   :  { %1366 = vmatprep.subr.bf16.mxu1 %v5066_v29  ;;  %3715 = vmatprep.subr.bf16.mxu0 %v6167_v56 }
 0x6d6   :  { %1367 = vmatpush1.bf16.msra.mxu1 %v5073_v10  ;;  %3716 = vmatpush3.bf16.msra.mxu0 %v5079_v5 }
 0x6d7   :  { %1368 = vmatprep.subr.bf16.mxu1 %v5085_v58  ;;  %3717 = vmatprep.subr.bf16.mxu0 %v6167_v56 }
 0x6da   :  { %1369 = vmatpush1.bf16.msra.mxu1 %v5092_v20  ;;  %3718 = vmatpush3.bf16.msra.mxu0 %v5098_v22 }
 0x6db   :  { %1370 = vmatprep.subr.bf16.mxu1 %v5104_v23  ;;  %3719 = vmatprep.subr.bf16.mxu0 %v6167_v56 }
 0x6de   :  { %1371 = vmatpush1.bf16.msra.mxu1 %v5111_v24  ;;  %3720 = vmatpush3.bf16.msra.mxu0 %v4264_v4  ;;  %v4022_v4 = vld [vmem:[%s6124_s9 + $0x60] ss:$12 sps:$4 sm:$0xff]  }
 0x6df   :  { %1372 = vmatprep.subr.bf16.mxu1 %v4265_v54  ;;  %3721 = vmatprep.subr.bf16.mxu0 %v6167_v56  ;;  %v4028_v54 = vld [vmem:[%s6124_s9 + $0x4c] ss:$12 sps:$4 sm:$0xff]  }
 0x6e2   :  { %1373 = vmatpush1.bf16.msra.mxu1 %v4266_v57  ;;  %3722 = vmatpush3.bf16.msra.mxu0 %v4267_v62  ;;  %v4029_v57 = vld [vmem:[%s6124_s9 + $0x50] ss:$12 sps:$4 sm:$0xff]   ;;  %v4026_v62 = vld [vmem:[%s6124_s9 + $0x48] ss:$12 sps:$4 sm:$0xff]  }
 0x6e3   :  { %1374 = vmatprep.subr.bf16.mxu1 %v4268_v12  ;;  %3723 = vmatprep.subr.bf16.mxu0 %v6167_v56  ;;  %v4032_v12 = vld [vmem:[%s6124_s9 + $0x34] ss:$12 sps:$4 sm:$0xff]  }
 0x6e6   :  { %1375 = vmatpush1.bf16.msra.mxu1 %v4269_v49  ;;  %3724 = vmatpush3.bf16.msra.mxu0 %v4270_v0  ;;  %v4033_v49 = vld [vmem:[%s6124_s9 + $0x38] ss:$12 sps:$4 sm:$0xff]   ;;  %v4030_v0 = vld [vmem:[%s6124_s9 + $0x30] ss:$12 sps:$4 sm:$0xff]  }
 0x6e7   :  { %1376 = vmatprep.subr.bf16.mxu1 %v4271_v11  ;;  %3725 = vmatprep.subr.bf16.mxu0 %v6167_v56  ;;  %v4036_v11 = vld [vmem:[%s6124_s9 + $0x1c] ss:$12 sps:$4 sm:$0xff]  }
 0x6ea   :  { %1377 = vmatpush1.bf16.msra.mxu1 %v4272_v2  ;;  %3726 = vmatpush3.bf16.msra.mxu0 %v4273_v21  ;;  %v4037_v2 = vld [vmem:[%s6124_s9 + $0x20] ss:$12 sps:$4 sm:$0xff]   ;;  %v4034_v21 = vld [vmem:[%s6124_s9 + $0x18] ss:$12 sps:$4 sm:$0xff]  }
 0x6eb   :  { %1660 = vmatprep.subr.bf16.mxu1 %v4012_v19  ;;  %3731 = vmatprep.subr.bf16.mxu0 %v4013_v51  ;;  %v4040_v19 = vld [vmem:[%s6124_s9 + $0x4] ss:$12 sps:$4 sm:$0xff]  }
 0x78d   :  { %v1282_v32 = vpop.f32.mrf.mxu1  ;;  %v1323_v29 = vpop.f32.mrf.mxu0 }
 0x78e   :  { %v1329_v10 = vadd.f32 %v1282_v32, %v4762_v63  ;;  %v1343_v45 = vadd.f32 %v4793_v16, %v1323_v29  ;;  %v4010_v16 = vld [vmem:[%s6124_s9 + $0xa8] ss:$12 sps:$4 sm:$0xff]   ;;  %v4038_v32 = vld [vmem:[%s6124_s9] ss:$12 sps:$4 sm:$0xff]   ;;  %v3330_v29 = vpack.c.bf16 %v4960_v50, %v4908_v31 }
 0x78f   :  { %v1284_v5 = vpop.f32.mrf.mxu1  ;;  %v3709_v58 = vpop.f32.mrf.mxu0  ;;  %v5341_v31 = vld [vmem:[%s6125_s10 + $0xac] ss:$12 sps:$4 sm:$0xff]   ;;  %v5346_v50 = vld [vmem:[%s6125_s10 + $0xa8] ss:$12 sps:$4 sm:$0xff]  }
 0x790   :  { %v3239_v20 = vmul.f32 -1.442695, %v1329_v10  ;;  %v1330_v40 = vadd.f32 %v1284_v5, %v4769_v6  ;;  %v5212_v6 = vpop.permute.xlu0 %1352  ;;  %v6177_v10 = vmov 0  ;;  %v3333_v5 = vpack.c.bf16 %v5137_v26, %v5018_v1  ;;  %v5352_v1 = vld [vmem:[%s6125_s10 + $0xb0] ss:$12 sps:$4 sm:$0xff]  }
 0x791   :  { %v1286_v22 = vpop.f32.mrf.mxu1  ;;  %v1326_v23 = vpop.f32.mrf.mxu0  ;;  %6172 = vst [vmem:[#allocation7_spill] sm:$0xff] %v5212_v6  ;;  %vm1354_vm2 = vcmp.eq.s32.totalorder %v5212_v6, 1  ;;  %v6178_v10 = vsel %vm5311_vm4, 4294967295, %v6177_v10  ;;  %v6180_v58 = vmov 0  ;;  %v5359_v26 = vld [vmem:[%s6125_s10 + $0x94] ss:$12 sps:$4 sm:$0xff]  }
 0x792   :  { %4150 = vpow2.f32 %v3239_v20  ;;  %v3240_v41 = vmul.f32 -1.442695, %v1330_v40  ;;  %6179 = vst [vmem:[#allocation14_spill] sm:$0xff] %v6178_v10  ;;  %v6181_v58 = vsel %vm5321_vm5, 4294967295, %v6180_v58  ;;  %v5364_v20 = vld [vmem:[%s6125_s10 + $0x90] ss:$12 sps:$4 sm:$0xff]  }
 0x793   :  { %v1287_v24 = vpop.f32.mrf.mxu1  ;;  %v3710_v39 = vpop.f32.mrf.mxu0  ;;  %6182 = vst [vmem:[#allocation15_spill] sm:$0xff] %v6181_v58  ;;  %v5370_v22 = vld [vmem:[%s6125_s10 + $0x98] ss:$12 sps:$4 sm:$0xff]   ;;  %v5378_v23 = vld [vmem:[%s6125_s10 + $0x7c] ss:$12 sps:$4 sm:$0xff]  }
 0x794   :  { %4152 = vpow2.f32 %v3240_v41  ;;  %v5383_v24 = vld [vmem:[%s6125_s10 + $0x78] ss:$12 sps:$4 sm:$0xff]   ;;  %v5389_v39 = vld [vmem:[%s6125_s10 + $0x80] ss:$12 sps:$4 sm:$0xff]  }
 0x795   :  { %v5397_v40 = vld [vmem:[%s6125_s10 + $0x64] ss:$12 sps:$4 sm:$0xff]   ;;  %v5402_v41 = vld [vmem:[%s6125_s10 + $0x60] ss:$12 sps:$4 sm:$0xff]  }
 0x79f   :  { %v4151_v42 = vpop.eup %4150 }
 0x7a0   :  { %v1337_v43 = vadd.f32 1.0, %v4151_v42  ;;  %v5408_v42 = vld [vmem:[%s6125_s10 + $0x68] ss:$12 sps:$4 sm:$0xff]  }
 0x7a1   :  { %v4153_v44 = vpop.eup %4152 }
 0x7a2   :  { %4154 = vrcp.f32 %v1337_v43  ;;  %v1338_v47 = vadd.f32 1.0, %v4153_v44  ;;  %v5416_v43 = vld [vmem:[%s6125_s10 + $0x4c] ss:$12 sps:$4 sm:$0xff]   ;;  %v5421_v44 = vld [vmem:[%s6125_s10 + $0x48] ss:$12 sps:$4 sm:$0xff]  }
 0x7af   :  { %v4155_v27 = vpop.eup %4154 }
 0x7b0   :  { %v1344_v63 = vmul.f32 %v4155_v27, %v1343_v45  ;;  %v5427_v45 = vld [vmem:[%s6125_s10 + $0x50] ss:$12 sps:$4 sm:$0xff]   ;;  %v5434_v27 = vld [vmem:[%s6125_s10 + $0x34] ss:$12 sps:$4 sm:$0xff]  }
 0x7b2   :  { %v1345_v28 = vadd.f32 %v1344_v63, %v6171_v46  ;;  %v5439_v63 = vld [vmem:[%s6125_s10 + $0x30] ss:$12 sps:$4 sm:$0xff]   ;;  %v5445_v46 = vld [vmem:[%s6125_s10 + $0x38] ss:$12 sps:$4 sm:$0xff]  }
 0x7b4   :  { %4156 = vtanh.f32 %v1345_v28  ;;  %v5450_v28 = vld [vmem:[%s6125_s10 + $0x1c] ss:$12 sps:$4 sm:$0xff]  }
 0x7b5   :  { %4158 = vrcp.f32 %v1338_v47  ;;  %v5460_v47 = vld [vmem:[%s6125_s10 + $0x18] ss:$12 sps:$4 sm:$0xff]  }
 0x7c1   :  { %v4157_v30 = vpop.eup %4156 }
 0x7c2   :  { %v1347_v48 = vsub.f32 %v5144_v25, %v4157_v30  ;;  %v4159_v33 = vpop.eup %4158 }
 0x7c4   :  { %v1348_v17 = vmul.f32 %v4159_v33, %v1347_v48  ;;  %v5471_v48 = vld [vmem:[%s6125_s10 + $0x4] ss:$12 sps:$4 sm:$0xff]   ;;  %v5477_v33 = vld [vmem:[%s6125_s10] ss:$12 sps:$4 sm:$0xff]  }
 0x7c6   :  { %v5214_v34 = vadd.f32 %v4157_v30, %v1348_v17  ;;  %v5466_v30 = vld [vmem:[%s6125_s10 + $0x20] ss:$12 sps:$4 sm:$0xff]   ;;  %v5484_v17 = vld [vmem:[%s6125_s10 + $0x8] ss:$12 sps:$4 sm:$0xff]  }
 0x7c8   :  { %v5224_v35 = vsel %vm1354_vm2, %v5214_v34, %v5144_v25  ;;  %v4024_v25 = vld [vmem:[%s6124_s9 + $0x64] ss:$12 sps:$4 sm:$0xff]  }
 0x7c9   :  { %v1361_v55 = vpack.c.bf16 %v5224_v35, %v5224_v35 }
 0x7cb   :  { %1395 = vmatmul.mubr.bf16.vlgmr.msra.gmra.mxu1 %v1361_v55  ;;  %3728 = vmatmul.mubr.bf16.vlgmr.msra.gmra.mxu0 %v1361_v55 }
 0x7cc   :  { %1661 = vmatpush1.bf16.msra.mxu1 %v4010_v16  ;;  %3732 = vmatpush3.bf16.msra.mxu0 %v4013_v51  ;;  %v4041_v51 = vld [vmem:[%s6124_s9 + $0x8] ss:$12 sps:$4 sm:$0xff]  }
 0x7cd   :  { %3747 = vmatprep.mubr.msk.bf16.mxu0 %vm5240_vm3, %v3327_v53  ;;  %1662 = vmatprep.subr.bf16.mxu1 %v4016_v37  ;;  %v6183_v37 = vld [vmem:[#allocation9_spill] sm:$0xff] }
 0x7ce   :  { %3733 = vmatprep.subr.bf16.mxu0 %v4017_v38  ;;  %1692 = vmatprep.mubr.bf16.mxu1 %v6168_v60 }
 0x7d0   :  { %1663 = vmatpush1.bf16.msra.mxu1 %v4014_v7  ;;  %3734 = vmatpush3.bf16.msra.mxu0 %v4017_v38 }
 0x7d1   :  { %1664 = vmatprep.subr.bf16.mxu1 %v4020_v36  ;;  %3735 = vmatprep.subr.bf16.mxu0 %v4021_v13 }
 0x7d4   :  { %1665 = vmatpush1.bf16.msra.mxu1 %v4018_v3  ;;  %3736 = vmatpush3.bf16.msra.mxu0 %v4021_v13 }
 0x7d5   :  { %1666 = vmatprep.subr.bf16.mxu1 %v4024_v25  ;;  %3737 = vmatprep.subr.bf16.mxu0 %v4025_v14 }
 0x7d8   :  { %1667 = vmatpush1.bf16.msra.mxu1 %v4022_v4  ;;  %3738 = vmatpush3.bf16.msra.mxu0 %v4025_v14  ;;  %v6184_v4 = vld [vmem:[#allocation6_spill] sm:$0xff] }
 0x7d9   :  { %1668 = vmatprep.subr.bf16.mxu1 %v4028_v54  ;;  %3739 = vmatprep.subr.bf16.mxu0 %v4029_v57  ;;  %v6185_v54 = vld [vmem:[#allocation10_spill] sm:$0xff] }
 0x7dc   :  { %1669 = vmatpush1.bf16.msra.mxu1 %v4026_v62  ;;  %3740 = vmatpush3.bf16.msra.mxu0 %v4029_v57  ;;  %v302_v57 = vadd.f32 %v6185_v54, %v6184_v4 }
 0x7dd   :  { %1670 = vmatprep.subr.bf16.mxu1 %v4032_v12  ;;  %3741 = vmatprep.subr.bf16.mxu0 %v4033_v49 }
 0x7e0   :  { %1671 = vmatpush1.bf16.msra.mxu1 %v4030_v0  ;;  %3742 = vmatpush3.bf16.msra.mxu0 %v4033_v49 }
 0x7e1   :  { %1672 = vmatprep.subr.bf16.mxu1 %v4036_v11  ;;  %3743 = vmatprep.subr.bf16.mxu0 %v4037_v2 }
 0x7e4   :  { %1673 = vmatpush1.bf16.msra.mxu1 %v4034_v21  ;;  %3744 = vmatpush3.bf16.msra.mxu0 %v4037_v2  ;;  %v4274_v2 = vld [vmem:[%s6123_s8] ss:$0 sm:$0xff] }
 0x7e5   :  { %1674 = vmatprep.subr.bf16.mxu1 %v4040_v19  ;;  %3745 = vmatprep.subr.bf16.mxu0 %v4041_v51 }
 0x7e8   :  { %1675 = vmatpush1.bf16.msra.mxu1 %v4038_v32  ;;  %3746 = vmatpush3.bf16.msra.mxu0 %v4041_v51  ;;  %v6186_v32 = vld [vmem:[#allocation8_spill] sm:$0xff] }
 0x7e9   :  { %3755 = vmatprep.subr.bf16.mxu0 %v6167_v56  ;;  %1993 = vmatprep.subr.bf16.mxu1 %v5341_v31 }
 0x7eb   :  { %3328 = vmatmul.mubr.msk.bf16.vlgmr.msra.gmra.mxu1 %vm5240_vm3, %v3327_v53  ;;  %3748 = vmatmul.mubr.msk.bf16.vlgmr.msra.gmra.mxu0 %vm5311_vm4, %v3330_v29 }
 0x7ec   :  { %3751 = vmatprep.mubr.msk.bf16.mxu0 %vm5321_vm5, %v3333_v5  ;;  %1702 = vmatprep.mubr.bf16.mxu1 %v6168_v60 }
 0x7ed   :  { %1994 = vmatpush1.bf16.msra.mxu1 %v5346_v50  ;;  %3756 = vmatpush3.bf16.msra.mxu0 %v5352_v1 }
 0x7ee   :  { %3757 = vmatprep.subr.bf16.mxu0 %v6167_v56  ;;  %1995 = vmatprep.subr.bf16.mxu1 %v5359_v26 }
 0x7f1   :  { %1996 = vmatpush1.bf16.msra.mxu1 %v5364_v20  ;;  %3758 = vmatpush3.bf16.msra.mxu0 %v5370_v22 }
 0x7f2   :  { %3759 = vmatprep.subr.bf16.mxu0 %v6167_v56  ;;  %1997 = vmatprep.subr.bf16.mxu1 %v5378_v23 }
 0x7f3   :  { %3331 = vmatmul.mubr.msk.bf16.gmra.mxu1 %vm5311_vm4, %v3330_v29 }
 0x7f4   :  { %1712 = vmatprep.mubr.bf16.mxu1 %v6168_v60 }
 0x7f5   :  { %1998 = vmatpush1.bf16.msra.mxu1 %v5383_v24  ;;  %3760 = vmatpush3.bf16.msra.mxu0 %v5389_v39 }
 0x7f6   :  { %3761 = vmatprep.subr.bf16.mxu0 %v6167_v56  ;;  %1999 = vmatprep.subr.bf16.mxu1 %v5397_v40 }
 0x7f9   :  { %2000 = vmatpush1.bf16.msra.mxu1 %v5402_v41  ;;  %3762 = vmatpush3.bf16.msra.mxu0 %v5408_v42 }
 0x7fa   :  { %3763 = vmatprep.subr.bf16.mxu0 %v6167_v56  ;;  %2001 = vmatprep.subr.bf16.mxu1 %v5416_v43 }
 0x7fb   :  { %3334 = vmatmul.mubr.msk.bf16.gmra.mxu1 %vm5321_vm5, %v3333_v5 }
 0x7fc   :  { %1722 = vmatprep.mubr.bf16.mxu1 %v6168_v60 }
 0x7fd   :  { %2002 = vmatpush1.bf16.msra.mxu1 %v5421_v44  ;;  %3764 = vmatpush3.bf16.msra.mxu0 %v5427_v45 }
 0x7fe   :  { %2003 = vmatprep.subr.bf16.mxu1 %v5434_v27  ;;  %3765 = vmatprep.subr.bf16.mxu0 %v6167_v56 }
 0x801   :  { %2004 = vmatpush1.bf16.msra.mxu1 %v5439_v63  ;;  %3766 = vmatpush3.bf16.msra.mxu0 %v5445_v46 }
 0x802   :  { %2005 = vmatprep.subr.bf16.mxu1 %v5450_v28  ;;  %3767 = vmatprep.subr.bf16.mxu0 %v6167_v56 }
 0x805   :  { %2006 = vmatpush1.bf16.msra.mxu1 %v5460_v47  ;;  %3768 = vmatpush3.bf16.msra.mxu0 %v5466_v30 }
 0x806   :  { %2007 = vmatprep.subr.bf16.mxu1 %v5471_v48  ;;  %3769 = vmatprep.subr.bf16.mxu0 %v6167_v56 }
 0x809   :  { %2008 = vmatpush1.bf16.msra.mxu1 %v5477_v33  ;;  %3770 = vmatpush3.bf16.msra.mxu0 %v5484_v17 }
 0x80a   :  { %2102 = vmatprep.subr.bf16.mxu1 %v5341_v31  ;;  %3775 = vmatprep.subr.bf16.mxu0 %v6167_v56 }
 0x88b   :  { %v1396_v16 = vpop.f32.mrf.mxu1  ;;  %v1437_v55 = vpop.f32.mrf.mxu0 }
 0x88c   :  { %v1443_v38 = vadd.f32 %v1396_v16, %v6183_v37  ;;  %v1457_v21 = vadd.f32 %v4274_v2, %v1437_v55  ;;  %v6188_v55 = vmov 0 }
 0x88d   :  { %v1398_v53 = vpop.f32.mrf.mxu1  ;;  %v3729_v7 = vpop.f32.mrf.mxu0 }
 0x88e   :  { %v3241_v36 = vmul.f32 -1.442695, %v1443_v38  ;;  %v1444_v62 = vadd.f32 %v1398_v53, %v302_v57  ;;  %v1467_v53 = vpop.permute.xlu1 %1466 }
 0x88f   :  { %v1400_v13 = vpop.f32.mrf.mxu1  ;;  %v1440_v3 = vpop.f32.mrf.mxu0  ;;  %vm1468_vm6 = vcmp.eq.s32.totalorder %v1467_v53, 1 }
 0x890   :  { %4160 = vpow2.f32 %v3241_v36  ;;  %v3242_v12 = vmul.f32 -1.442695, %v1444_v62  ;;  %v6187_v3 = vld [vmem:[#allocation5_spill] sm:$0xff]  ;;  %vm5503_vm7 = vmpackc.low %vm1468_vm6, %vm1354_vm2 }
 0x891   :  { %v1401_v25 = vpop.f32.mrf.mxu1  ;;  %v3730_v14 = vpop.f32.mrf.mxu0  ;;  %v6189_v55 = vsel %vm5503_vm7, 4294967295, %v6188_v55  ;;  %vm129_vm8 = vcmp.ge.f32.partialorder %v6187_v3, 0.0 }
 0x892   :  { %4162 = vpow2.f32 %v3242_v12  ;;  %v131_v25 = vmul.f32 0.01, %v6187_v3  ;;  %6190 = vst [vmem:[#allocation9_spill] sm:$0xff] %v6189_v55 }
 0x89d   :  { %v4161_v49 = vpop.eup %4160 }
 0x89e   :  { %v1451_v0 = vadd.f32 1.0, %v4161_v49 }
 0x89f   :  { %v4163_v11 = vpop.eup %4162 }
 0x8a0   :  { %4164 = vrcp.f32 %v1451_v0  ;;  %v1452_v5 = vadd.f32 1.0, %v4163_v11 }
 0x8ab   :  { %v1694_v14 = vpop.f32.mrf.mxu1  ;;  %v5567_v11 = vpop.f32.mrf.mxu0 }
 0x8ad   :  { %v4165_v19 = vpop.eup %4164  ;;  %v1696_v4 = vpop.f32.mrf.mxu1 }
 0x8ae   :  { %v1458_v51 = vmul.f32 %v4165_v19, %v1457_v21  ;;  %v1767_v21 = vpop.f32.mrf.mxu0 }
 0x8af   :  { %v5555_v54 = vpop.f32.mrf.mxu1 }
 0x8b0   :  { %v1459_v29 = vadd.f32 %v1458_v51, %v6186_v32  ;;  %v5573_v51 = vpop.f32.mrf.mxu0 }
 0x8b1   :  { %v5557_v57 = vpop.f32.mrf.mxu1 }
 0x8b2   :  { %4166 = vtanh.f32 %v1459_v29  ;;  %v5577_v29 = vpop.f32.mrf.mxu0 }
 0x8b3   :  { %4168 = vrcp.f32 %v1452_v5  ;;  %v5559_v62 = vpop.f32.mrf.mxu1 }
 0x8b5   :  { %v5561_v12 = vpop.f32.mrf.mxu1 }
 0x8b7   :  { %v5563_v49 = vpop.f32.mrf.mxu1 }
 0x8b9   :  { %v5565_v0 = vpop.f32.mrf.mxu1 }
 0x8bb   :  { %v5569_v2 = vpop.f32.mrf.mxu1 }
 0x8bd   :  { %v5571_v19 = vpop.f32.mrf.mxu1 }
 0x8be   :  { %6191 = vst [vmem:[#allocation6_spill] sm:$0xff] %v5571_v19 }
 0x8bf   :  { %v4167_v16 = vpop.eup %4166  ;;  %v5575_v32 = vpop.f32.mrf.mxu1 }
 0x8c0   :  { %v1461_v37 = vsub.f32 %v5224_v35, %v4167_v16  ;;  %v4169_v38 = vpop.eup %4168  ;;  %6192 = vst [vmem:[#allocation10_spill] sm:$0xff] %v5575_v32 }
 0x8c1   :  { %v5579_v5 = vpop.f32.mrf.mxu1 }
 0x8c2   :  { %v1462_v7 = vmul.f32 %v4169_v38, %v1461_v37  ;;  %6193 = vst [vmem:[#allocation8_spill] sm:$0xff] %v5579_v5 }
 0x8c4   :  { %v1463_v36 = vadd.f32 %v4167_v16, %v1462_v7  ;;  %v1515_v16 = vld [vmem:[%s6126_s11] sm:$0x7] }
 0x8c6   :  { %v3336_v13 = vpack.c.bf16 %v1463_v36, %v5214_v34  ;;  %v5516_v34 = vsel %vm129_vm8, %v6187_v3, %v131_v25  ;;  %v6198_v36 = vld [vmem:[#allocation4_spill] sm:$0xff] }
 0x8c7   :  { %v1864_v35 = vpack.c.bf16 %v5516_v34, %v5516_v34 }
 0x8c8   :  { %3337 = vmatmul.mubr.msk.bf16.gmra.mxu1 %vm5503_vm7, %v3336_v13  ;;  %3752 = vmatmul.mubr.msk.bf16.gmra.mxu0 %vm5503_vm7, %v3336_v13  ;;  %v6199_v13 = vsub.s32 0, %v6198_v36 }
 0x8c9   :  { %2025 = vmatprep.mubr.bf16.mxu1 %v6168_v60  ;;  %3771 = vmatprep.mubr.msk.bf16.mxu0 %vm4301_vm0, %v6167_v56 }
 0x8ca   :  { %v5594_v3 = vrot.slane %v1515_v16, %v6199_v13  ;;  %v6204_v13 = vsub.s32 1, %v6198_v36 }
 0x8cc   :  { %v1695_v10 = vadd.f32 %v1694_v14, %v5594_v3  ;;  %v1699_v18 = vadd.f32 %v5555_v54, %v5594_v3  ;;  %v1705_v9 = vadd.f32 %v5559_v62, %v5594_v3  ;;  %v1709_v61 = vadd.f32 %v5563_v49, %v5594_v3 }
 0x8cd   :  { %v1715_v52 = vadd.f32 %v5569_v2, %v5594_v3 }
 0x8d0   :  { %2026 = vmatmul.mubr.bf16.vlgmr.msra.gmra.mxu1 %v1864_v35  ;;  %3772 = vmatmul.mubr.bf16.vlgmr.msra.gmra.mxu0 %v1864_v35 }
 0x8d1   :  { %2103 = vmatpush1.bf16.msra.mxu1 %v5346_v50  ;;  %3776 = vmatpush3.bf16.msra.mxu0 %v5352_v1 }
 0x8d2   :  { %2104 = vmatprep.subr.bf16.mxu1 %v5359_v26  ;;  %3777 = vmatprep.subr.bf16.mxu0 %v6167_v56 }
 0x8d3   :  { %2134 = vmatprep.mubr.bf16.mxu1 %v6168_v60  ;;  %3791 = vmatprep.mubr.msk.bf16.mxu0 %vm4301_vm0, %v6167_v56 }
 0x8d5   :  { %2105 = vmatpush1.bf16.msra.mxu1 %v5364_v20  ;;  %3778 = vmatpush3.bf16.msra.mxu0 %v5370_v22 }
 0x8d6   :  { %2106 = vmatprep.subr.bf16.mxu1 %v5378_v23  ;;  %3779 = vmatprep.subr.bf16.mxu0 %v6167_v56 }
 0x8d9   :  { %2107 = vmatpush1.bf16.msra.mxu1 %v5383_v24  ;;  %3780 = vmatpush3.bf16.msra.mxu0 %v5389_v39 }
 0x8da   :  { %2108 = vmatprep.subr.bf16.mxu1 %v5397_v40  ;;  %3781 = vmatprep.subr.bf16.mxu0 %v6167_v56 }
 0x8dd   :  { %2109 = vmatpush1.bf16.msra.mxu1 %v5402_v41  ;;  %3782 = vmatpush3.bf16.msra.mxu0 %v5408_v42 }
 0x8de   :  { %2110 = vmatprep.subr.bf16.mxu1 %v5416_v43  ;;  %3783 = vmatprep.subr.bf16.mxu0 %v6167_v56 }
 0x8e1   :  { %2111 = vmatpush1.bf16.msra.mxu1 %v5421_v44  ;;  %3784 = vmatpush3.bf16.msra.mxu0 %v5427_v45 }
 0x8e2   :  { %2112 = vmatprep.subr.bf16.mxu1 %v5434_v27  ;;  %3785 = vmatprep.subr.bf16.mxu0 %v6167_v56 }
 0x8e5   :  { %2113 = vmatpush1.bf16.msra.mxu1 %v5439_v63  ;;  %3786 = vmatpush3.bf16.msra.mxu0 %v5445_v46 }
 0x8e6   :  { %2114 = vmatprep.subr.bf16.mxu1 %v5450_v28  ;;  %3787 = vmatprep.subr.bf16.mxu0 %v6167_v56 }
 0x8e9   :  { %2115 = vmatpush1.bf16.msra.mxu1 %v5460_v47  ;;  %3788 = vmatpush3.bf16.msra.mxu0 %v5466_v30 }
 0x8ea   :  { %2116 = vmatprep.subr.bf16.mxu1 %v5471_v48  ;;  %3789 = vmatprep.subr.bf16.mxu0 %v6167_v56 }
 0x8ed   :  { %2117 = vmatpush1.bf16.msra.mxu1 %v5477_v33  ;;  %3790 = vmatpush3.bf16.msra.mxu0 %v5484_v17 }
 0x8ee   :  { %2211 = vmatprep.subr.bf16.mxu1 %v5341_v31  ;;  %3795 = vmatprep.subr.bf16.mxu0 %v6167_v56 }
 0x988   :  { %v5584_v37 = vpop.f32.mrf.mxu1  ;;  %v5586_v38 = vpop.f32.mrf.mxu0 }
 0x989   :  { %6194 = vst [vmem:[#allocation5_spill] sm:$0xff] %v5584_v37  ;;  %6195 = vst [vmem:[#allocation16_spill] sm:$0xff] %v5586_v38 }
 0x98a   :  { %v5588_v53 = vpop.f32.mrf.mxu1  ;;  %v5590_v7 = vpop.f32.mrf.mxu0 }
 0x98b   :  { %6196 = vst [vmem:[#allocation17_spill] sm:$0xff] %v5588_v53  ;;  %6197 = vst [vmem:[#allocation18_spill] sm:$0xff] %v5590_v7 }
 0x98c   :  { %v5596_v25 = vpop.f32.mrf.mxu1  ;;  %v5598_v35 = vpop.f32.mrf.mxu0 }
 0x98d   :  { %6200 = vst [vmem:[#allocation4_spill] sm:$0xff] %v5596_v25  ;;  %6201 = vst [vmem:[#allocation19_spill] sm:$0xff] %v5598_v35  ;;  %v5607_v25 = vrot.slane %v1515_v16, %v6204_v13 }
 0x98e   :  { %v5600_v55 = vpop.f32.mrf.mxu1  ;;  %v5602_v58 = vpop.f32.mrf.mxu0 }
 0x98f   :  { %6202 = vst [vmem:[#allocation20_spill] sm:$0xff] %v5600_v55  ;;  %6203 = vst [vmem:[#allocation21_spill] sm:$0xff] %v5602_v58  ;;  %v1697_v55 = vadd.f32 %v1696_v4, %v5607_v25 }
 0x990   :  { %v2027_v59 = vpop.f32.mrf.mxu1  ;;  %v2068_v6 = vpop.f32.mrf.mxu0 }
 0x991   :  { %v2074_v38 = vadd.f32 %v2027_v59, %v1695_v10  ;;  %v5613_v59 = vld [vmem:[%s6127_s12] ss:$0 sm:$0xff]  ;;  %v6205_v10 = vsub.s32 2, %v6198_v36 }
 0x992   :  { %v2029_v53 = vpop.f32.mrf.mxu1  ;;  %v3773_v37 = vpop.f32.mrf.mxu0 }
 0x993   :  { %v3292_v8 = vmul.f32 -1.442695, %v2074_v38  ;;  %v2075_v58 = vadd.f32 %v2029_v53, %v1697_v55 }
 0x994   :  { %v2031_v5 = vpop.f32.mrf.mxu1  ;;  %v2071_v32 = vpop.f32.mrf.mxu0 }
 0x995   :  { %4170 = vpow2.f32 %v3292_v8  ;;  %v3293_v7 = vmul.f32 -1.442695, %v2075_v58  ;;  %v5617_v32 = vrot.slane %v1515_v16, %v6205_v10 }
 0x996   :  { %v2032_v35 = vpop.f32.mrf.mxu1  ;;  %v3774_v15 = vpop.f32.mrf.mxu0 }
 0x997   :  { %4172 = vpow2.f32 %v3293_v7  ;;  %v2088_v15 = vadd.f32 %v5613_v59, %v2068_v6  ;;  %v1768_v55 = vadd.f32 %v1767_v21, %v5617_v32 }
 0x9a2   :  { %v4171_v14 = vpop.eup %4170 }
 0x9a3   :  { %v2082_v19 = vadd.f32 1.0, %v4171_v14 }
 0x9a4   :  { %v4173_v8 = vpop.eup %4172 }
 0x9a5   :  { %4174 = vrcp.f32 %v2082_v19  ;;  %v2083_v37 = vadd.f32 1.0, %v4173_v8 }
 0x9b2   :  { %v4175_v5 = vpop.eup %4174 }
 0x9b3   :  { %v2089_v58 = vmul.f32 %v4175_v5, %v2088_v15 }
 0x9b5   :  { %v2090_v4 = vadd.f32 %v2089_v58, %v1768_v55  ;;  %v1701_v58 = vadd.f32 %v5557_v57, %v5607_v25 }
 0x9b7   :  { %4176 = vtanh.f32 %v2090_v4 }
 0x9b8   :  { %4178 = vrcp.f32 %v2083_v37 }
 0x9c4   :  { %v4177_v19 = vpop.eup %4176 }
 0x9c5   :  { %v2092_v38 = vsub.f32 %v5516_v34, %v4177_v19  ;;  %v4179_v53 = vpop.eup %4178 }
 0x9c7   :  { %v2093_v7 = vmul.f32 %v4179_v53, %v2092_v38 }
 0x9c9   :  { %v5622_v35 = vadd.f32 %v4177_v19, %v2093_v7 }
 0x9cb   :  { %v5628_v6 = vsel %vm670_vm11, %v5622_v35, %v5516_v34 }
 0x9cc   :  { %v2101_v21 = vpack.c.bf16 %v5628_v6, %v5628_v6 }
 0x9ce   :  { %2135 = vmatmul.mubr.bf16.vlgmr.msra.gmra.mxu1 %v2101_v21  ;;  %3792 = vmatmul.mubr.bf16.vlgmr.msra.gmra.mxu0 %v2101_v21  ;;  %v1771_v21 = vadd.f32 %v5577_v29, %v5617_v32 }
 0x9cf   :  { %2212 = vmatpush1.bf16.msra.mxu1 %v5346_v50  ;;  %3796 = vmatpush3.bf16.msra.mxu0 %v5352_v1 }
 0x9d0   :  { %2213 = vmatprep.subr.bf16.mxu1 %v5359_v26  ;;  %3797 = vmatprep.subr.bf16.mxu0 %v6167_v56 }
 0x9d1   :  { %2243 = vmatprep.mubr.bf16.mxu1 %v6168_v60  ;;  %3811 = vmatprep.mubr.msk.bf16.mxu0 %vm4301_vm0, %v6167_v56 }
 0x9d3   :  { %2214 = vmatpush1.bf16.msra.mxu1 %v5364_v20  ;;  %3798 = vmatpush3.bf16.msra.mxu0 %v5370_v22 }
 0x9d4   :  { %2215 = vmatprep.subr.bf16.mxu1 %v5378_v23  ;;  %3799 = vmatprep.subr.bf16.mxu0 %v6167_v56 }
 0x9d7   :  { %2216 = vmatpush1.bf16.msra.mxu1 %v5383_v24  ;;  %3800 = vmatpush3.bf16.msra.mxu0 %v5389_v39 }
 0x9d8   :  { %2217 = vmatprep.subr.bf16.mxu1 %v5397_v40  ;;  %3801 = vmatprep.subr.bf16.mxu0 %v6167_v56 }
 0x9db   :  { %2218 = vmatpush1.bf16.msra.mxu1 %v5402_v41  ;;  %3802 = vmatpush3.bf16.msra.mxu0 %v5408_v42 }
 0x9dc   :  { %2219 = vmatprep.subr.bf16.mxu1 %v5416_v43  ;;  %3803 = vmatprep.subr.bf16.mxu0 %v6167_v56 }
 0x9df   :  { %2220 = vmatpush1.bf16.msra.mxu1 %v5421_v44  ;;  %3804 = vmatpush3.bf16.msra.mxu0 %v5427_v45 }
 0x9e0   :  { %2221 = vmatprep.subr.bf16.mxu1 %v5434_v27  ;;  %3805 = vmatprep.subr.bf16.mxu0 %v6167_v56 }
 0x9e3   :  { %2222 = vmatpush1.bf16.msra.mxu1 %v5439_v63  ;;  %3806 = vmatpush3.bf16.msra.mxu0 %v5445_v46 }
 0x9e4   :  { %2223 = vmatprep.subr.bf16.mxu1 %v5450_v28  ;;  %3807 = vmatprep.subr.bf16.mxu0 %v6167_v56 }
 0x9e7   :  { %2224 = vmatpush1.bf16.msra.mxu1 %v5460_v47  ;;  %3808 = vmatpush3.bf16.msra.mxu0 %v5466_v30 }
 0x9e8   :  { %2225 = vmatprep.subr.bf16.mxu1 %v5471_v48  ;;  %3809 = vmatprep.subr.bf16.mxu0 %v6167_v56 }
 0x9eb   :  { %2226 = vmatpush1.bf16.msra.mxu1 %v5477_v33  ;;  %3810 = vmatpush3.bf16.msra.mxu0 %v5484_v17 }
 0x9ec   :  { %2320 = vmatprep.subr.bf16.mxu1 %v5341_v31  ;;  %3815 = vmatprep.subr.bf16.mxu0 %v6167_v56 }
 0xa8e   :  { %v2136_v34 = vpop.f32.mrf.mxu1  ;;  %v2177_v16 = vpop.f32.mrf.mxu0 }
 0xa8f   :  { %v2183_v36 = vadd.f32 %v2136_v34, %v1699_v18  ;;  %v2197_v53 = vadd.f32 %v5613_v59, %v2177_v16 }
 0xa90   :  { %v2138_v13 = vpop.f32.mrf.mxu1  ;;  %v3793_v14 = vpop.f32.mrf.mxu0 }
 0xa91   :  { %v3294_v8 = vmul.f32 -1.442695, %v2183_v36  ;;  %v2184_v4 = vadd.f32 %v2138_v13, %v1701_v58 }
 0xa92   :  { %v2140_v10 = vpop.f32.mrf.mxu1  ;;  %v2180_v15 = vpop.f32.mrf.mxu0 }
 0xa93   :  { %4180 = vpow2.f32 %v3294_v8  ;;  %v3295_v37 = vmul.f32 -1.442695, %v2184_v4 }
 0xa94   :  { %v2141_v5 = vpop.f32.mrf.mxu1  ;;  %v3794_v55 = vpop.f32.mrf.mxu0 }
 0xa95   :  { %4182 = vpow2.f32 %v3295_v37 }
 0xaa0   :  { %v4181_v19 = vpop.eup %4180 }
 0xaa1   :  { %v2191_v38 = vadd.f32 1.0, %v4181_v19 }
 0xaa2   :  { %v4183_v54 = vpop.eup %4182 }
 0xaa3   :  { %4184 = vrcp.f32 %v2191_v38  ;;  %v2192_v36 = vadd.f32 1.0, %v4183_v54 }
 0xab0   :  { %v4185_v7 = vpop.eup %4184 }
 0xab1   :  { %v2198_v18 = vmul.f32 %v4185_v7, %v2197_v53  ;;  %v1707_v53 = vadd.f32 %v5561_v12, %v5607_v25 }
 0xab3   :  { %v2199_v34 = vadd.f32 %v2198_v18, %v1771_v21 }
 0xab5   :  { %4186 = vtanh.f32 %v2199_v34 }
 0xab6   :  { %4188 = vrcp.f32 %v2192_v36 }
 0xac2   :  { %v4187_v14 = vpop.eup %4186 }
 0xac3   :  { %v2201_v57 = vsub.f32 %v5628_v6, %v4187_v14  ;;  %v4189_v13 = vpop.eup %4188 }
 0xac5   :  { %v2202_v8 = vmul.f32 %v4189_v13, %v2201_v57  ;;  %v1776_v57 = vadd.f32 %v5567_v11, %v5617_v32 }
 0xac7   :  { %v5675_v10 = vadd.f32 %v4187_v14, %v2202_v8 }
 0xac9   :  { %v5681_v16 = vsel %vm784_vm12, %v5675_v10, %v5628_v6 }
 0xaca   :  { %v2210_v29 = vpack.c.bf16 %v5681_v16, %v5681_v16 }
 0xacc   :  { %2244 = vmatmul.mubr.bf16.vlgmr.msra.gmra.mxu1 %v2210_v29  ;;  %3812 = vmatmul.mubr.bf16.vlgmr.msra.gmra.mxu0 %v2210_v29 }
 0xacd   :  { %2321 = vmatpush1.bf16.msra.mxu1 %v5346_v50  ;;  %3816 = vmatpush3.bf16.msra.mxu0 %v5352_v1 }
 0xace   :  { %2322 = vmatprep.subr.bf16.mxu1 %v5359_v26  ;;  %3817 = vmatprep.subr.bf16.mxu0 %v6167_v56 }
 0xacf   :  { %2352 = vmatprep.mubr.bf16.mxu1 %v6168_v60  ;;  %3831 = vmatprep.mubr.msk.bf16.mxu0 %vm4301_vm0, %v6167_v56 }
 0xad1   :  { %2323 = vmatpush1.bf16.msra.mxu1 %v5364_v20  ;;  %3818 = vmatpush3.bf16.msra.mxu0 %v5370_v22 }
 0xad2   :  { %2324 = vmatprep.subr.bf16.mxu1 %v5378_v23  ;;  %3819 = vmatprep.subr.bf16.mxu0 %v6167_v56 }
 0xad5   :  { %2325 = vmatpush1.bf16.msra.mxu1 %v5383_v24  ;;  %3820 = vmatpush3.bf16.msra.mxu0 %v5389_v39 }
 0xad6   :  { %2326 = vmatprep.subr.bf16.mxu1 %v5397_v40  ;;  %3821 = vmatprep.subr.bf16.mxu0 %v6167_v56 }
 0xad9   :  { %2327 = vmatpush1.bf16.msra.mxu1 %v5402_v41  ;;  %3822 = vmatpush3.bf16.msra.mxu0 %v5408_v42 }
 0xada   :  { %2328 = vmatprep.subr.bf16.mxu1 %v5416_v43  ;;  %3823 = vmatprep.subr.bf16.mxu0 %v6167_v56 }
 0xadd   :  { %2329 = vmatpush1.bf16.msra.mxu1 %v5421_v44  ;;  %3824 = vmatpush3.bf16.msra.mxu0 %v5427_v45 }
 0xade   :  { %2330 = vmatprep.subr.bf16.mxu1 %v5434_v27  ;;  %3825 = vmatprep.subr.bf16.mxu0 %v6167_v56 }
 0xae1   :  { %2331 = vmatpush1.bf16.msra.mxu1 %v5439_v63  ;;  %3826 = vmatpush3.bf16.msra.mxu0 %v5445_v46 }
 0xae2   :  { %2332 = vmatprep.subr.bf16.mxu1 %v5450_v28  ;;  %3827 = vmatprep.subr.bf16.mxu0 %v6167_v56 }
 0xae5   :  { %2333 = vmatpush1.bf16.msra.mxu1 %v5460_v47  ;;  %3828 = vmatpush3.bf16.msra.mxu0 %v5466_v30 }
 0xae6   :  { %2334 = vmatprep.subr.bf16.mxu1 %v5471_v48  ;;  %3829 = vmatprep.subr.bf16.mxu0 %v6167_v56 }
 0xae9   :  { %2335 = vmatpush1.bf16.msra.mxu1 %v5477_v33  ;;  %3830 = vmatpush3.bf16.msra.mxu0 %v5484_v17 }
 0xaea   :  { %2429 = vmatprep.subr.bf16.mxu1 %v5341_v31  ;;  %3835 = vmatprep.subr.bf16.mxu0 %v6167_v56 }
 0xb8c   :  { %v2245_v6 = vpop.f32.mrf.mxu1  ;;  %v2286_v15 = vpop.f32.mrf.mxu0 }
 0xb8d   :  { %v2292_v5 = vadd.f32 %v2245_v6, %v1705_v9  ;;  %v2306_v36 = vadd.f32 %v5613_v59, %v2286_v15 }
 0xb8e   :  { %v2247_v55 = vpop.f32.mrf.mxu1  ;;  %v3813_v58 = vpop.f32.mrf.mxu0 }
 0xb8f   :  { %v3296_v4 = vmul.f32 -1.442695, %v2292_v5  ;;  %v2293_v7 = vadd.f32 %v2247_v55, %v1707_v53 }
 0xb90   :  { %v2249_v37 = vpop.f32.mrf.mxu1  ;;  %v2289_v19 = vpop.f32.mrf.mxu0 }
 0xb91   :  { %4190 = vpow2.f32 %v3296_v4  ;;  %v3297_v21 = vmul.f32 -1.442695, %v2293_v7 }
 0xb92   :  { %v2250_v38 = vpop.f32.mrf.mxu1  ;;  %v3814_v54 = vpop.f32.mrf.mxu0 }
 0xb93   :  { %4192 = vpow2.f32 %v3297_v21 }
 0xb9e   :  { %v4191_v18 = vpop.eup %4190 }
 0xb9f   :  { %v2300_v34 = vadd.f32 1.0, %v4191_v18  ;;  %v1711_v18 = vadd.f32 %v5565_v0, %v5607_v25 }
 0xba0   :  { %v4193_v62 = vpop.eup %4192 }
 0xba1   :  { %4194 = vrcp.f32 %v2300_v34  ;;  %v2301_v29 = vadd.f32 1.0, %v4193_v62 }
 0xbae   :  { %v4195_v14 = vpop.eup %4194 }
 0xbaf   :  { %v2307_v13 = vmul.f32 %v4195_v14, %v2306_v36 }
 0xbb1   :  { %v2308_v8 = vadd.f32 %v2307_v13, %v1776_v57 }
 0xbb3   :  { %4196 = vtanh.f32 %v2308_v8  ;;  %v1779_v8 = vadd.f32 %v5573_v51, %v5617_v32 }
 0xbb4   :  { %4198 = vrcp.f32 %v2301_v29 }
 0xbc0   :  { %v4197_v9 = vpop.eup %4196 }
 0xbc1   :  { %v2310_v12 = vsub.f32 %v5681_v16, %v4197_v9  ;;  %v4199_v6 = vpop.eup %4198 }
 0xbc3   :  { %v2311_v5 = vmul.f32 %v4199_v6, %v2310_v12 }
 0xbc5   :  { %v5728_v55 = vadd.f32 %v4197_v9, %v2311_v5 }
 0xbc7   :  { %v5734_v15 = vsel %vm898_vm13, %v5728_v55, %v5681_v16 }
 0xbc8   :  { %v2319_v11 = vpack.c.bf16 %v5734_v15, %v5734_v15 }
 0xbca   :  { %2353 = vmatmul.mubr.bf16.vlgmr.msra.gmra.mxu1 %v2319_v11  ;;  %3832 = vmatmul.mubr.bf16.vlgmr.msra.gmra.mxu0 %v2319_v11 }
 0xbcb   :  { %2430 = vmatpush1.bf16.msra.mxu1 %v5346_v50  ;;  %3836 = vmatpush3.bf16.msra.mxu0 %v5352_v1 }
 0xbcc   :  { %2431 = vmatprep.subr.bf16.mxu1 %v5359_v26  ;;  %3837 = vmatprep.subr.bf16.mxu0 %v6167_v56 }
 0xbcd   :  { %2461 = vmatprep.mubr.bf16.mxu1 %v6168_v60  ;;  %3851 = vmatprep.mubr.msk.bf16.mxu0 %vm4301_vm0, %v6167_v56 }
 0xbcf   :  { %2432 = vmatpush1.bf16.msra.mxu1 %v5364_v20  ;;  %3838 = vmatpush3.bf16.msra.mxu0 %v5370_v22 }
 0xbd0   :  { %2433 = vmatprep.subr.bf16.mxu1 %v5378_v23  ;;  %3839 = vmatprep.subr.bf16.mxu0 %v6167_v56 }
 0xbd3   :  { %2434 = vmatpush1.bf16.msra.mxu1 %v5383_v24  ;;  %3840 = vmatpush3.bf16.msra.mxu0 %v5389_v39 }
 0xbd4   :  { %2435 = vmatprep.subr.bf16.mxu1 %v5397_v40  ;;  %3841 = vmatprep.subr.bf16.mxu0 %v6167_v56 }
 0xbd7   :  { %2436 = vmatpush1.bf16.msra.mxu1 %v5402_v41  ;;  %3842 = vmatpush3.bf16.msra.mxu0 %v5408_v42 }
 0xbd8   :  { %2437 = vmatprep.subr.bf16.mxu1 %v5416_v43  ;;  %3843 = vmatprep.subr.bf16.mxu0 %v6167_v56 }
 0xbdb   :  { %2438 = vmatpush1.bf16.msra.mxu1 %v5421_v44  ;;  %3844 = vmatpush3.bf16.msra.mxu0 %v5427_v45 }
 0xbdc   :  { %2439 = vmatprep.subr.bf16.mxu1 %v5434_v27  ;;  %3845 = vmatprep.subr.bf16.mxu0 %v6167_v56 }
 0xbdf   :  { %2440 = vmatpush1.bf16.msra.mxu1 %v5439_v63  ;;  %3846 = vmatpush3.bf16.msra.mxu0 %v5445_v46 }
 0xbe0   :  { %2441 = vmatprep.subr.bf16.mxu1 %v5450_v28  ;;  %3847 = vmatprep.subr.bf16.mxu0 %v6167_v56 }
 0xbe3   :  { %2442 = vmatpush1.bf16.msra.mxu1 %v5460_v47  ;;  %3848 = vmatpush3.bf16.msra.mxu0 %v5466_v30 }
 0xbe4   :  { %2443 = vmatprep.subr.bf16.mxu1 %v5471_v48  ;;  %3849 = vmatprep.subr.bf16.mxu0 %v6167_v56 }
 0xbe7   :  { %2444 = vmatpush1.bf16.msra.mxu1 %v5477_v33  ;;  %3850 = vmatpush3.bf16.msra.mxu0 %v5484_v17 }
 0xbe8   :  { %2538 = vmatprep.subr.bf16.mxu1 %v5341_v31  ;;  %3855 = vmatprep.subr.bf16.mxu0 %v6167_v56 }
 0xc8a   :  { %v2354_v16 = vpop.f32.mrf.mxu1  ;;  %v2395_v58 = vpop.f32.mrf.mxu0 }
 0xc8b   :  { %v2401_v4 = vadd.f32 %v2354_v16, %v1709_v61  ;;  %v2415_v57 = vadd.f32 %v5613_v59, %v2395_v58 }
 0xc8c   :  { %v2356_v37 = vpop.f32.mrf.mxu1  ;;  %v3833_v19 = vpop.f32.mrf.mxu0 }
 0xc8d   :  { %v3298_v38 = vmul.f32 -1.442695, %v2401_v4  ;;  %v2402_v34 = vadd.f32 %v2356_v37, %v1711_v18 }
 0xc8e   :  { %v2358_v54 = vpop.f32.mrf.mxu1  ;;  %v2398_v53 = vpop.f32.mrf.mxu0 }
 0xc8f   :  { %4200 = vpow2.f32 %v3298_v38  ;;  %v3299_v62 = vmul.f32 -1.442695, %v2402_v34 }
 0xc90   :  { %v2359_v7 = vpop.f32.mrf.mxu1  ;;  %v3834_v21 = vpop.f32.mrf.mxu0 }
 0xc91   :  { %4202 = vpow2.f32 %v3299_v62  ;;  %v6206_v7 = vld [vmem:[#allocation6_spill] sm:$0xff] }
 0xc92   :  { %v1717_v21 = vadd.f32 %v6206_v7, %v5607_v25 }
 0xc9c   :  { %v4201_v36 = vpop.eup %4200 }
 0xc9d   :  { %v2409_v14 = vadd.f32 1.0, %v4201_v36 }
 0xc9e   :  { %v4203_v49 = vpop.eup %4202 }
 0xc9f   :  { %4204 = vrcp.f32 %v2409_v14  ;;  %v2410_v12 = vadd.f32 1.0, %v4203_v49  ;;  %v6207_v49 = vld [vmem:[#allocation18_spill] sm:$0xff] }
 0xcac   :  { %v4205_v13 = vpop.eup %4204 }
 0xcad   :  { %v2416_v29 = vmul.f32 %v4205_v13, %v2415_v57  ;;  %v1784_v57 = vadd.f32 %v6207_v49, %v5617_v32  ;;  %v4283_v49 = vld [vmem:[%s6125_s10 + $0x80] ss:$12 sps:$4 sm:$0xff]  }
 0xcaf   :  { %v2417_v9 = vadd.f32 %v2416_v29, %v1779_v8 }
 0xcb1   :  { %4206 = vtanh.f32 %v2417_v9 }
 0xcb2   :  { %4208 = vrcp.f32 %v2410_v12 }
 0xcbe   :  { %v4207_v6 = vpop.eup %4206 }
 0xcbf   :  { %v2419_v0 = vsub.f32 %v5734_v15, %v4207_v6  ;;  %v4209_v5 = vpop.eup %4208 }
 0xcc1   :  { %v2420_v11 = vmul.f32 %v4209_v5, %v2419_v0 }
 0xcc3   :  { %v5781_v61 = vadd.f32 %v4207_v6, %v2420_v11  ;;  %v4292_v11 = vld [vmem:[%s6125_s10 + $0x38] ss:$12 sps:$4 sm:$0xff]  }
 0xcc5   :  { %v5787_v16 = vsel %vm1012_vm14, %v5781_v61, %v5734_v15 }
 0xcc6   :  { %v2428_v51 = vpack.c.bf16 %v5787_v16, %v5787_v16 }
 0xcc8   :  { %2462 = vmatmul.mubr.bf16.vlgmr.msra.gmra.mxu1 %v2428_v51  ;;  %3852 = vmatmul.mubr.bf16.vlgmr.msra.gmra.mxu0 %v2428_v51 }
 0xcc9   :  { %2539 = vmatpush1.bf16.msra.mxu1 %v5346_v50  ;;  %3856 = vmatpush3.bf16.msra.mxu0 %v5352_v1 }
 0xcca   :  { %2540 = vmatprep.subr.bf16.mxu1 %v5359_v26  ;;  %3857 = vmatprep.subr.bf16.mxu0 %v6167_v56 }
 0xccb   :  { %2570 = vmatprep.mubr.bf16.mxu1 %v6168_v60  ;;  %3871 = vmatprep.mubr.msk.bf16.mxu0 %vm4301_vm0, %v6167_v56 }
 0xccd   :  { %2541 = vmatpush1.bf16.msra.mxu1 %v5364_v20  ;;  %3858 = vmatpush3.bf16.msra.mxu0 %v5370_v22 }
 0xcce   :  { %2542 = vmatprep.subr.bf16.mxu1 %v5378_v23  ;;  %3859 = vmatprep.subr.bf16.mxu0 %v6167_v56 }
 0xcd1   :  { %2543 = vmatpush1.bf16.msra.mxu1 %v5383_v24  ;;  %3860 = vmatpush3.bf16.msra.mxu0 %v5389_v39 }
 0xcd2   :  { %2544 = vmatprep.subr.bf16.mxu1 %v5397_v40  ;;  %3861 = vmatprep.subr.bf16.mxu0 %v6167_v56 }
 0xcd5   :  { %2545 = vmatpush1.bf16.msra.mxu1 %v5402_v41  ;;  %3862 = vmatpush3.bf16.msra.mxu0 %v5408_v42 }
 0xcd6   :  { %2546 = vmatprep.subr.bf16.mxu1 %v5416_v43  ;;  %3863 = vmatprep.subr.bf16.mxu0 %v6167_v56 }
 0xcd9   :  { %2547 = vmatpush1.bf16.msra.mxu1 %v5421_v44  ;;  %3864 = vmatpush3.bf16.msra.mxu0 %v5427_v45 }
 0xcda   :  { %2548 = vmatprep.subr.bf16.mxu1 %v5434_v27  ;;  %3865 = vmatprep.subr.bf16.mxu0 %v6167_v56 }
 0xcdd   :  { %2549 = vmatpush1.bf16.msra.mxu1 %v5439_v63  ;;  %3866 = vmatpush3.bf16.msra.mxu0 %v5445_v46 }
 0xcde   :  { %2550 = vmatprep.subr.bf16.mxu1 %v5450_v28  ;;  %3867 = vmatprep.subr.bf16.mxu0 %v6167_v56 }
 0xce1   :  { %2551 = vmatpush1.bf16.msra.mxu1 %v5460_v47  ;;  %3868 = vmatpush3.bf16.msra.mxu0 %v5466_v30 }
 0xce2   :  { %2552 = vmatprep.subr.bf16.mxu1 %v5471_v48  ;;  %3869 = vmatprep.subr.bf16.mxu0 %v6167_v56 }
 0xce5   :  { %2553 = vmatpush1.bf16.msra.mxu1 %v5477_v33  ;;  %3870 = vmatpush3.bf16.msra.mxu0 %v5484_v17 }
 0xce6   :  { %2647 = vmatprep.subr.bf16.mxu1 %v5341_v31  ;;  %3875 = vmatprep.subr.bf16.mxu0 %v6167_v56 }
 0xd88   :  { %v2463_v50 = vpop.f32.mrf.mxu1  ;;  %v2504_v1 = vpop.f32.mrf.mxu0 }
 0xd89   :  { %v2510_v15 = vadd.f32 %v2463_v50, %v1715_v52  ;;  %v2524_v36 = vadd.f32 %v5613_v59, %v2504_v1  ;;  %v5847_v50 = vld [vmem:[%s6125_s10 + $0xa8] ss:$12 sps:$4 sm:$0xff]   ;;  %v5853_v1 = vld [vmem:[%s6125_s10 + $0xb0] ss:$12 sps:$4 sm:$0xff]  }
 0xd8a   :  { %v2465_v58 = vpop.f32.mrf.mxu1  ;;  %v3853_v4 = vpop.f32.mrf.mxu0 }
 0xd8b   :  { %v3300_v37 = vmul.f32 -1.442695, %v2510_v15  ;;  %v2511_v31 = vadd.f32 %v2465_v58, %v1717_v21  ;;  %v6211_v15 = vld [vmem:[#allocation21_spill] sm:$0xff] }
 0xd8c   :  { %v2467_v19 = vpop.f32.mrf.mxu1  ;;  %v2507_v38 = vpop.f32.mrf.mxu0  ;;  %v1787_v58 = vadd.f32 %v6211_v15, %v5617_v32 }
 0xd8d   :  { %4210 = vpow2.f32 %v3300_v37  ;;  %v3301_v18 = vmul.f32 -1.442695, %v2511_v31 }
 0xd8e   :  { %v2468_v54 = vpop.f32.mrf.mxu1  ;;  %v3854_v53 = vpop.f32.mrf.mxu0 }
 0xd8f   :  { %4212 = vpow2.f32 %v3301_v18 }
 0xd9a   :  { %v4211_v34 = vpop.eup %4210 }
 0xd9b   :  { %v2518_v62 = vadd.f32 1.0, %v4211_v34 }
 0xd9c   :  { %v4213_v2 = vpop.eup %4212 }
 0xd9d   :  { %4214 = vrcp.f32 %v2518_v62  ;;  %v2519_v29 = vadd.f32 1.0, %v4213_v2  ;;  %v4278_v62 = vld [vmem:[%s6125_s10 + $0x94] ss:$12 sps:$4 sm:$0xff]   ;;  %v4279_v2 = vld [vmem:[%s6125_s10 + $0x90] ss:$12 sps:$4 sm:$0xff]  }
 0xdaa   :  { %v4215_v14 = vpop.eup %4214 }
 0xdab   :  { %v2525_v13 = vmul.f32 %v4215_v14, %v2524_v36  ;;  %v4280_v36 = vld [vmem:[%s6125_s10 + $0x98] ss:$12 sps:$4 sm:$0xff]   ;;  %v4281_v14 = vld [vmem:[%s6125_s10 + $0x7c] ss:$12 sps:$4 sm:$0xff]  }
 0xdad   :  { %v2526_v8 = vadd.f32 %v2525_v13, %v1784_v57  ;;  %v4284_v57 = vld [vmem:[%s6125_s10 + $0x64] ss:$12 sps:$4 sm:$0xff]   ;;  %v4285_v13 = vld [vmem:[%s6125_s10 + $0x60] ss:$12 sps:$4 sm:$0xff]  }
 0xdaf   :  { %4216 = vtanh.f32 %v2526_v8  ;;  %v4286_v8 = vld [vmem:[%s6125_s10 + $0x68] ss:$12 sps:$4 sm:$0xff]  }
 0xdb0   :  { %4218 = vrcp.f32 %v2519_v29  ;;  %v4287_v29 = vld [vmem:[%s6125_s10 + $0x4c] ss:$12 sps:$4 sm:$0xff]  }
 0xdbc   :  { %v4217_v9 = vpop.eup %4216 }
 0xdbd   :  { %v2528_v12 = vsub.f32 %v5787_v16, %v4217_v9  ;;  %v4219_v6 = vpop.eup %4218 }
 0xdbf   :  { %v2529_v0 = vmul.f32 %v4219_v6, %v2528_v12  ;;  %v4289_v12 = vld [vmem:[%s6125_s10 + $0x50] ss:$12 sps:$4 sm:$0xff]   ;;  %v4290_v6 = vld [vmem:[%s6125_s10 + $0x34] ss:$12 sps:$4 sm:$0xff]  }
 0xdc1   :  { %v5834_v5 = vadd.f32 %v4217_v9, %v2529_v0  ;;  %v4288_v9 = vld [vmem:[%s6125_s10 + $0x48] ss:$12 sps:$4 sm:$0xff]   ;;  %v4291_v0 = vld [vmem:[%s6125_s10 + $0x30] ss:$12 sps:$4 sm:$0xff]  }
 0xdc3   :  { %v5840_v51 = vsel %vm1126_vm15, %v5834_v5, %v5787_v16 }
 0xdc4   :  { %v2537_v52 = vpack.c.bf16 %v5840_v51, %v5840_v51 }
 0xdc6   :  { %2571 = vmatmul.mubr.bf16.vlgmr.msra.gmra.mxu1 %v2537_v52  ;;  %3872 = vmatmul.mubr.bf16.vlgmr.msra.gmra.mxu0 %v2537_v52  ;;  %v4294_v52 = vld [vmem:[%s6125_s10 + $0x18] ss:$12 sps:$4 sm:$0xff]  }
 0xdc7   :  { %2648 = vmatpush1.bf16.msra.mxu1 %v5847_v50  ;;  %3876 = vmatpush3.bf16.msra.mxu0 %v5853_v1 }
 0xdc8   :  { %2649 = vmatprep.subr.bf16.mxu1 %v5359_v26  ;;  %3877 = vmatprep.subr.bf16.mxu0 %v6167_v56  ;;  %v4277_v26 = vld [vmem:[%s6125_s10 + $0xac] ss:$12 sps:$4 sm:$0xff]  }
 0xdc9   :  { %2679 = vmatprep.mubr.bf16.mxu1 %v6168_v60  ;;  %3891 = vmatprep.mubr.msk.bf16.mxu0 %vm4301_vm0, %v6167_v56 }
 0xdcb   :  { %2650 = vmatpush1.bf16.msra.mxu1 %v5364_v20  ;;  %3878 = vmatpush3.bf16.msra.mxu0 %v5370_v22  ;;  %v6209_v20 = vld [vmem:[#allocation10_spill] sm:$0xff] }
 0xdcc   :  { %2651 = vmatprep.subr.bf16.mxu1 %v5378_v23  ;;  %3879 = vmatprep.subr.bf16.mxu0 %v6167_v56  ;;  %v1719_v22 = vadd.f32 %v6209_v20, %v5594_v3  ;;  %v4298_v20 = vld [vmem:[%s6125_s10 + $0x8] ss:$12 sps:$4 sm:$0xff]  }
 0xdcf   :  { %2652 = vmatpush1.bf16.msra.mxu1 %v5383_v24  ;;  %3880 = vmatpush3.bf16.msra.mxu0 %v5389_v39 }
 0xdd0   :  { %2653 = vmatprep.subr.bf16.mxu1 %v5397_v40  ;;  %3881 = vmatprep.subr.bf16.mxu0 %v6167_v56 }
 0xdd3   :  { %2654 = vmatpush1.bf16.msra.mxu1 %v5402_v41  ;;  %3882 = vmatpush3.bf16.msra.mxu0 %v5408_v42 }
 0xdd4   :  { %2655 = vmatprep.subr.bf16.mxu1 %v5416_v43  ;;  %3883 = vmatprep.subr.bf16.mxu0 %v6167_v56 }
 0xdd7   :  { %2656 = vmatpush1.bf16.msra.mxu1 %v5421_v44  ;;  %3884 = vmatpush3.bf16.msra.mxu0 %v5427_v45 }
 0xdd8   :  { %2657 = vmatprep.subr.bf16.mxu1 %v5434_v27  ;;  %3885 = vmatprep.subr.bf16.mxu0 %v6167_v56 }
 0xddb   :  { %2658 = vmatpush1.bf16.msra.mxu1 %v5439_v63  ;;  %3886 = vmatpush3.bf16.msra.mxu0 %v5445_v46  ;;  %v6210_v63 = vld [vmem:[#allocation8_spill] sm:$0xff] }
 0xddc   :  { %2659 = vmatprep.subr.bf16.mxu1 %v5450_v28  ;;  %3887 = vmatprep.subr.bf16.mxu0 %v6167_v56  ;;  %v1721_v46 = vadd.f32 %v6210_v63, %v5607_v25 }
 0xddf   :  { %2660 = vmatpush1.bf16.msra.mxu1 %v5460_v47  ;;  %3888 = vmatpush3.bf16.msra.mxu0 %v5466_v30 }
 0xde0   :  { %2661 = vmatprep.subr.bf16.mxu1 %v5471_v48  ;;  %3889 = vmatprep.subr.bf16.mxu0 %v6167_v56 }
 0xde3   :  { %2662 = vmatpush1.bf16.msra.mxu1 %v5477_v33  ;;  %3890 = vmatpush3.bf16.msra.mxu0 %v5484_v17 }
 0xde4   :  { %2756 = vmatprep.subr.bf16.mxu1 %v4277_v26  ;;  %3895 = vmatprep.subr.bf16.mxu0 %v6167_v56  ;;  %v4297_v26 = vld [vmem:[%s6125_s10] ss:$12 sps:$4 sm:$0xff]  }
 0xe86   :  { %v2572_v23 = vpop.f32.mrf.mxu1  ;;  %v2613_v24 = vpop.f32.mrf.mxu0 }
 0xe87   :  { %v2619_v39 = vadd.f32 %v2572_v23, %v1719_v22  ;;  %v2633_v17 = vadd.f32 %v5613_v59, %v2613_v24  ;;  %v4074_v22 = vld [vmem:[%s6128_s13 + $0x38] sm:$0xff]   ;;  %v6213_v23 = vld [vmem:[#allocation5_spill] sm:$0xff] }
 0xe88   :  { %v2574_v40 = vpop.f32.mrf.mxu1  ;;  %v3873_v41 = vpop.f32.mrf.mxu0  ;;  %v1725_v24 = vadd.f32 %v6213_v23, %v5594_v3 }
 0xe89   :  { %v3302_v42 = vmul.f32 -1.442695, %v2619_v39  ;;  %v2620_v28 = vadd.f32 %v2574_v40, %v1721_v46  ;;  %v6214_v46 = vld [vmem:[#allocation17_spill] sm:$0xff] }
 0xe8a   :  { %v2576_v43 = vpop.f32.mrf.mxu1  ;;  %v2616_v44 = vpop.f32.mrf.mxu0 }
 0xe8b   :  { %4220 = vpow2.f32 %v3302_v42  ;;  %v3303_v47 = vmul.f32 -1.442695, %v2620_v28  ;;  %v1727_v28 = vadd.f32 %v6214_v46, %v5607_v25 }
 0xe8c   :  { %v2577_v45 = vpop.f32.mrf.mxu1  ;;  %v3874_v27 = vpop.f32.mrf.mxu0 }
 0xe8d   :  { %4222 = vpow2.f32 %v3303_v47 }
 0xe98   :  { %v4221_v30 = vpop.eup %4220 }
 0xe99   :  { %v2627_v48 = vadd.f32 1.0, %v4221_v30 }
 0xe9a   :  { %v4223_v33 = vpop.eup %4222 }
 0xe9b   :  { %4224 = vrcp.f32 %v2627_v48  ;;  %v2628_v19 = vadd.f32 1.0, %v4223_v33 }
 0xea8   :  { %v4225_v16 = vpop.eup %4224 }
 0xea9   :  { %v2634_v4 = vmul.f32 %v4225_v16, %v2633_v17 }
 0xeab   :  { %v2635_v37 = vadd.f32 %v2634_v4, %v1787_v58  ;;  %v6215_v58 = vld [vmem:[#allocation16_spill] sm:$0xff] }
 0xeac   :  { %v1792_v4 = vadd.f32 %v6215_v58, %v5617_v32 }
 0xead   :  { %4226 = vtanh.f32 %v2635_v37 }
 0xeae   :  { %4228 = vrcp.f32 %v2628_v19 }
 0xeba   :  { %v4227_v38 = vpop.eup %4226 }
 0xebb   :  { %v2637_v54 = vsub.f32 %v5840_v51, %v4227_v38  ;;  %v4229_v53 = vpop.eup %4228 }
 0xebd   :  { %v2638_v7 = vmul.f32 %v4229_v53, %v2637_v54 }
 0xebf   :  { %v5899_v21 = vadd.f32 %v4227_v38, %v2638_v7 }
 0xec1   :  { %v5905_v18 = vsel %vm1240_vm1, %v5899_v21, %v5840_v51  ;;  %v4293_v51 = vld [vmem:[%s6125_s10 + $0x1c] ss:$12 sps:$4 sm:$0xff]  }
 0xec2   :  { %v2646_v34 = vpack.c.bf16 %v5905_v18, %v5905_v18 }
 0xec4   :  { %2680 = vmatmul.mubr.bf16.vlgmr.msra.gmra.mxu1 %v2646_v34  ;;  %3892 = vmatmul.mubr.bf16.vlgmr.msra.gmra.mxu0 %v2646_v34 }
 0xec5   :  { %2757 = vmatpush1.bf16.msra.mxu1 %v5847_v50  ;;  %3896 = vmatpush3.bf16.msra.mxu0 %v5853_v1  ;;  %v4295_v50 = vld [vmem:[%s6125_s10 + $0x20] ss:$12 sps:$4 sm:$0xff]   ;;  %v4296_v1 = vld [vmem:[%s6125_s10 + $0x4] ss:$12 sps:$4 sm:$0xff]  }
 0xec6   :  { %2758 = vmatprep.subr.bf16.mxu1 %v4278_v62  ;;  %3897 = vmatprep.subr.bf16.mxu0 %v6167_v56 }
 0xec7   :  { %2788 = vmatprep.mubr.bf16.mxu1 %v6168_v60  ;;  %3911 = vmatprep.mubr.msk.bf16.mxu0 %vm4301_vm0, %v6167_v56  ;;  %v4282_v60 = vld [vmem:[%s6125_s10 + $0x78] ss:$12 sps:$4 sm:$0xff]  }
 0xec9   :  { %2759 = vmatpush1.bf16.msra.mxu1 %v4279_v2  ;;  %3898 = vmatpush3.bf16.msra.mxu0 %v4280_v36  ;;  %v4075_v36 = vld [vmem:[%s6128_s13 + $0x30] sm:$0xff]  }
 0xeca   :  { %2760 = vmatprep.subr.bf16.mxu1 %v4281_v14  ;;  %3899 = vmatprep.subr.bf16.mxu0 %v6167_v56  ;;  %v3351_v14 = vpack.c.bf16 %v5675_v10, %v5622_v35  ;;  %v4078_v35 = vld [vmem:[%s6128_s13 + $0x18] sm:$0xff]   ;;  %v4079_v10 = vld [vmem:[%s6128_s13 + $0x10] sm:$0xff]  }
 0xecd   :  { %2761 = vmatpush1.bf16.msra.mxu1 %v4282_v60  ;;  %3900 = vmatpush3.bf16.msra.mxu0 %v4283_v49  ;;  %v4077_v49 = vld [vmem:[%s6128_s13 + $0x20] sm:$0xff]  }
 0xece   :  { %2762 = vmatprep.subr.bf16.mxu1 %v4284_v57  ;;  %3901 = vmatprep.subr.bf16.mxu0 %v6167_v56  ;;  %v4080_v57 = vld [vmem:[%s6128_s13 + $0x8] sm:$0xff]  }
 0xed1   :  { %2763 = vmatpush1.bf16.msra.mxu1 %v4285_v13  ;;  %3902 = vmatpush3.bf16.msra.mxu0 %v4286_v8  ;;  %v4081_v13 = vld [vmem:[%s6128_s13] sm:$0xff]   ;;  %v3354_v8 = vpack.c.bf16 %v5781_v61, %v5728_v55  ;;  %v4084_v55 = vld [vmem:[%s6129_s15 + $0x28] sm:$0xff]  }
 0xed2   :  { %2764 = vmatprep.subr.bf16.mxu1 %v4287_v29  ;;  %3903 = vmatprep.subr.bf16.mxu0 %v6167_v56  ;;  %v3357_v29 = vpack.c.bf16 %v5899_v21, %v5834_v5  ;;  %v4085_v61 = vld [vmem:[%s6129_s15 + $0x20] sm:$0xff]   ;;  %v4086_v5 = vld [vmem:[%s6129_s15 + $0x18] sm:$0xff]   ;;  %v4087_v21 = vld [vmem:[%s6129_s15 + $0x10] sm:$0xff]  }
 0xed5   :  { %2765 = vmatpush1.bf16.msra.mxu1 %v4288_v9  ;;  %3904 = vmatpush3.bf16.msra.mxu0 %v4289_v12  ;;  %v3317_v12 = vld [vmem:[%s6131_s16] ss:$0 sm:$0xff] }
 0xed6   :  { %2766 = vmatprep.subr.bf16.mxu1 %v4290_v6  ;;  %3905 = vmatprep.subr.bf16.mxu0 %v6167_v56  ;;  %v4082_v6 = vld [vmem:[%s6129_s15 + $0x38] sm:$0xff]  }
 0xed9   :  { %2767 = vmatpush1.bf16.msra.mxu1 %v4291_v0  ;;  %3906 = vmatpush3.bf16.msra.mxu0 %v4292_v11  ;;  %v4083_v0 = vld [vmem:[%s6129_s15 + $0x30] sm:$0xff]   ;;  %v4088_v11 = vld [vmem:[%s6129_s15 + $0x8] sm:$0xff]  }
 0xeda   :  { %2768 = vmatprep.subr.bf16.mxu1 %v4293_v51  ;;  %3907 = vmatprep.subr.bf16.mxu0 %v6167_v56  ;;  %v4089_v51 = vld [vmem:[%s6129_s15] sm:$0xff]  }
 0xedd   :  { %2769 = vmatpush1.bf16.msra.mxu1 %v4294_v52  ;;  %3908 = vmatpush3.bf16.msra.mxu0 %v4295_v50  ;;  %v6220_v52 = vld [vmem:[#allocation4_spill] sm:$0xff] }
 0xede   :  { %2770 = vmatprep.subr.bf16.mxu1 %v4296_v1  ;;  %3909 = vmatprep.subr.bf16.mxu0 %v6167_v56  ;;  %v1729_v50 = vadd.f32 %v6220_v52, %v5594_v3 }
 0xee1   :  { %2771 = vmatpush1.bf16.msra.mxu1 %v4297_v26  ;;  %3910 = vmatpush3.bf16.msra.mxu0 %v4298_v20 }
 0xee2   :  { %3915 = vmatprep.subr.bf16.mxu1 %v4074_v22  ;;  %3939 = vmatprep.subr.bf16.mxu0 %v4082_v6 }
 0xf84   :  { %v2681_v39 = vpop.f32.mrf.mxu1  ;;  %v2722_v56 = vpop.f32.mrf.mxu0 }
 0xf85   :  { %v2728_v40 = vadd.f32 %v2681_v39, %v1725_v24  ;;  %v2742_v16 = vadd.f32 %v5613_v59, %v2722_v56 }
 0xf86   :  { %v2683_v41 = vpop.f32.mrf.mxu1  ;;  %v3893_v42 = vpop.f32.mrf.mxu0 }
 0xf87   :  { %v3304_v43 = vmul.f32 -1.442695, %v2728_v40  ;;  %v2729_v47 = vadd.f32 %v2683_v41, %v1727_v28  ;;  %v6221_v42 = vld [vmem:[#allocation20_spill] sm:$0xff] }
 0xf88   :  { %v2685_v44 = vpop.f32.mrf.mxu1  ;;  %v2725_v45 = vpop.f32.mrf.mxu0  ;;  %v4299_v28 = vld [vmem:[%s6127_s12] ss:$0 sm:$0xff] }
 0xf89   :  { %4230 = vpow2.f32 %v3304_v43  ;;  %v3305_v30 = vmul.f32 -1.442695, %v2729_v47  ;;  %v1731_v43 = vadd.f32 %v6221_v42, %v5607_v25 }
 0xf8a   :  { %v2686_v27 = vpop.f32.mrf.mxu1  ;;  %v3894_v63 = vpop.f32.mrf.mxu0 }
 0xf8b   :  { %4232 = vpow2.f32 %v3305_v30  ;;  %v6072_v30 = vld [vmem:[%s6130_s14] ss:$0 sm:$0xff] }
 0xf96   :  { %v4231_v48 = vpop.eup %4230 }
 0xf97   :  { %v2736_v33 = vadd.f32 1.0, %v4231_v48 }
 0xf98   :  { %v4233_v17 = vpop.eup %4232 }
 0xf99   :  { %4234 = vrcp.f32 %v2736_v33  ;;  %v2737_v38 = vadd.f32 1.0, %v4233_v17  ;;  %v6222_v33 = vld [vmem:[#allocation19_spill] sm:$0xff] }
 0xf9a   :  { %v1795_v17 = vadd.f32 %v6222_v33, %v5617_v32 }
 0xfa6   :  { %v4235_v15 = vpop.eup %4234 }
 0xfa7   :  { %v2743_v37 = vmul.f32 %v4235_v15, %v2742_v16 }
 0xfa9   :  { %v2744_v19 = vadd.f32 %v2743_v37, %v1792_v4 }
 0xfab   :  { %4236 = vtanh.f32 %v2744_v19 }
 0xfac   :  { %4238 = vrcp.f32 %v2737_v38 }
 0xfb8   :  { %v4237_v54 = vpop.eup %4236 }
 0xfb9   :  { %v2746_v53 = vsub.f32 %v5905_v18, %v4237_v54  ;;  %v4239_v7 = vpop.eup %4238 }
 0xfbb   :  { %v2747_v31 = vmul.f32 %v4239_v7, %v2746_v53 }
 0xfbd   :  { %v5995_v34 = vadd.f32 %v4237_v54, %v2747_v31 }
 0xfbf   :  { %v6001_v59 = vsel %vm1354_vm2, %v5995_v34, %v5905_v18  ;;  %v4076_v18 = vld [vmem:[%s6128_s13 + $0x28] sm:$0xff]  }
 0xfc0   :  { %v2755_v2 = vpack.c.bf16 %v6001_v59, %v6001_v59 }
 0xfc2   :  { %2789 = vmatmul.mubr.bf16.vlgmr.msra.gmra.mxu1 %v2755_v2  ;;  %3912 = vmatmul.mubr.bf16.vlgmr.msra.gmra.mxu0 %v2755_v2 }
 0xfc3   :  { %3916 = vmatpush3.bf16.msra.mxu1 %v4074_v22  ;;  %3931 = vmatprep.mubr.msk.bf16.mxu1 %vm5240_vm3, %v3351_v14 }
 0xfc4   :  { %3917 = vmatprep.subr.bf16.mxu1 %v4075_v36  ;;  %3940 = vmatpush3.bf16.msra.mxu0 %v4082_v6 }
 0xfc5   :  { %3941 = vmatprep.subr.bf16.mxu0 %v4083_v0 }
 0xfc7   :  { %3918 = vmatpush3.bf16.msra.mxu1 %v4075_v36 }
 0xfc8   :  { %3919 = vmatprep.subr.bf16.mxu1 %v4076_v18  ;;  %3942 = vmatpush3.bf16.msra.mxu0 %v4083_v0 }
 0xfc9   :  { %3943 = vmatprep.subr.bf16.mxu0 %v4084_v55 }
 0xfcb   :  { %3920 = vmatpush3.bf16.msra.mxu1 %v4076_v18 }
 0xfcc   :  { %3921 = vmatprep.subr.bf16.mxu1 %v4077_v49  ;;  %3944 = vmatpush3.bf16.msra.mxu0 %v4084_v55 }
 0xfcd   :  { %3945 = vmatprep.subr.bf16.mxu0 %v4085_v61 }
 0xfcf   :  { %3922 = vmatpush3.bf16.msra.mxu1 %v4077_v49 }
 0xfd0   :  { %3923 = vmatprep.subr.bf16.mxu1 %v4078_v35  ;;  %3946 = vmatpush3.bf16.msra.mxu0 %v4085_v61 }
 0xfd1   :  { %3947 = vmatprep.subr.bf16.mxu0 %v4086_v5 }
 0xfd3   :  { %3924 = vmatpush3.bf16.msra.mxu1 %v4078_v35 }
 0xfd4   :  { %3925 = vmatprep.subr.bf16.mxu1 %v4079_v10  ;;  %3948 = vmatpush3.bf16.msra.mxu0 %v4086_v5 }
 0xfd5   :  { %3949 = vmatprep.subr.bf16.mxu0 %v4087_v21 }
 0xfd7   :  { %3926 = vmatpush3.bf16.msra.mxu1 %v4079_v10 }
 0xfd8   :  { %3927 = vmatprep.subr.bf16.mxu1 %v4080_v57  ;;  %3950 = vmatpush3.bf16.msra.mxu0 %v4087_v21 }
 0xfd9   :  { %3951 = vmatprep.subr.bf16.mxu0 %v4088_v11 }
 0xfdb   :  { %3928 = vmatpush3.bf16.msra.mxu1 %v4080_v57 }
 0xfdc   :  { %3929 = vmatprep.subr.bf16.mxu1 %v4081_v13  ;;  %3952 = vmatpush3.bf16.msra.mxu0 %v4088_v11 }
 0xfdd   :  { %3953 = vmatprep.subr.bf16.mxu0 %v4089_v51 }
 0xfdf   :  { %3930 = vmatpush3.bf16.msra.mxu1 %v4081_v13 }
 0xfe0   :  { %3954 = vmatpush3.bf16.msra.mxu0 %v4089_v51 }
 0xfe2   :  { %3932 = vmatmul.mubr.msk.bf16.vlgmr.msra.gmra.mxu1 %vm5311_vm4, %v3354_v8 }
 0xfe3   :  { %3935 = vmatprep.mubr.msk.bf16.mxu1 %vm5321_vm5, %v3357_v29 }
0x1082   :  { %v2790_v1 = vpop.f32.mrf.mxu1  ;;  %v2831_v26 = vpop.f32.mrf.mxu0 }
0x1083   :  { %v2837_v20 = vadd.f32 %v2790_v1, %v1729_v50  ;;  %v2851_v47 = vadd.f32 %v4299_v28, %v2831_v26 }
0x1084   :  { %v2792_v22 = vpop.f32.mrf.mxu1  ;;  %v3913_v23 = vpop.f32.mrf.mxu0 }
0x1085   :  { %v3306_v24 = vmul.f32 -1.442695, %v2837_v20  ;;  %v2838_v44 = vadd.f32 %v2792_v22, %v1731_v43 }
0x1086   :  { %v2794_v39 = vpop.f32.mrf.mxu1  ;;  %v2834_v56 = vpop.f32.mrf.mxu0 }
0x1087   :  { %4240 = vpow2.f32 %v3306_v24  ;;  %v3307_v45 = vmul.f32 -1.442695, %v2838_v44 }
0x1088   :  { %v2795_v40 = vpop.f32.mrf.mxu1  ;;  %v3914_v41 = vpop.f32.mrf.mxu0 }
0x1089   :  { %4242 = vpow2.f32 %v3307_v45 }
0x1094   :  { %v4241_v27 = vpop.eup %4240 }
0x1095   :  { %v2845_v63 = vadd.f32 1.0, %v4241_v27 }
0x1096   :  { %v4243_v46 = vpop.eup %4242 }
0x1097   :  { %4244 = vrcp.f32 %v2845_v63  ;;  %v2846_v19 = vadd.f32 1.0, %v4243_v46 }
0x10a2   :  { %v3933_v3 = vpop.f32.mrf.mxu1 }
0x10a3   :  { %v2986_v58 = vadd.f32 %v3933_v3, %v6072_v30 }
0x10a4   :  { %v4245_v48 = vpop.eup %4244  ;;  %v2977_v25 = vpop.f32.mrf.mxu1 }
0x10a5   :  { %v2852_v16 = vmul.f32 %v4245_v48, %v2851_v47  ;;  %v2978_v15 = vadd.f32 %v6072_v30, %v2977_v25  ;;  %v3018_v31 = vmul.f32 0.01, %v2986_v58  ;;  %vm3010_vm10 = vcmp.ge.f32.partialorder %v2986_v58, 0.0 }
0x10a6   :  { %v3934_v4 = vpop.f32.mrf.mxu1 }
0x10a7   :  { %v2853_v37 = vadd.f32 %v2852_v16, %v1795_v17  ;;  %v2989_v38 = vadd.f32 %v3934_v4, %v6072_v30  ;;  %v3016_v53 = vmul.f32 0.01, %v2978_v15  ;;  %vm3008_vm0 = vcmp.ge.f32.partialorder %v2978_v15, 0.0 }
0x10a8   :  { %v2980_v54 = vpop.f32.mrf.mxu1  ;;  %v3026_v60 = vsel %vm3010_vm10, %v2986_v58, %v3018_v31 }
0x10a9   :  { %4246 = vtanh.f32 %v2853_v37  ;;  %v2981_v7 = vadd.f32 %v6072_v30, %v2980_v54  ;;  %vm3011_vm9 = vcmp.ge.f32.partialorder %v2989_v38, 0.0  ;;  %v3019_v62 = vmul.f32 0.01, %v2989_v38 }
0x10aa   :  { %4248 = vrcp.f32 %v2846_v19  ;;  %v3024_v36 = vsel %vm3008_vm0, %v2978_v15, %v3016_v53 }
0x10ab   :  { %vm3009_vm11 = vcmp.ge.f32.partialorder %v2981_v7, 0.0  ;;  %v3017_v32 = vmul.f32 0.01, %v2981_v7  ;;  %v3027_v2 = vsel %vm3011_vm9, %v2989_v38, %v3019_v62 }
0x10ac   :  { %v3033_v49 = vpack.c.bf16 %v3027_v2, %v3026_v60 }
0x10ad   :  { %v3025_v14 = vsel %vm3009_vm11, %v2981_v7, %v3017_v32 }
0x10ae   :  { %v3032_v18 = vpack.c.bf16 %v3025_v14, %v3024_v36 }
0x10b0   :  { %3955 = vmatprep.mubr.bf16.mxu0 %v3032_v18 }
0x10b1   :  { %3956 = vmatmul.mubr.bf16.vlgmr.msra.gmra.mxu0 %v3033_v49 }
0x10b6   :  { %v4247_v35 = vpop.eup %4246 }
0x10b7   :  { %v2855_v10 = vsub.f32 %v6001_v59, %v4247_v35  ;;  %v4249_v57 = vpop.eup %4248 }
0x10b9   :  { %v2856_v13 = vmul.f32 %v4249_v57, %v2855_v10 }
0x10bb   :  { %v2857_v8 = vadd.f32 %v4247_v35, %v2856_v13 }
0x10bd   :  { %v3360_v29 = vpack.c.bf16 %v2857_v8, %v5995_v34 }
0x10bf   :  { %3936 = vmatmul.mubr.msk.bf16.gmra.mxu1 %vm5503_vm7, %v3360_v29 }
0x1171   :  { %v3957_v6 = vpop.f32.mrf.mxu0 }
0x1172   :  { %v3150_v0 = vadd.f32 %v3957_v6, %v3317_v12 }
0x1173   :  { %v3141_v55 = vpop.f32.mrf.mxu0 }
0x1174   :  { %3174 = vst [vmem:[%s6132_s17 + $0x10] sm:$0xff] %v3150_v0  ;;  %v3142_v59 = vadd.f32 %v3317_v12, %v3141_v55 }
0x1175   :  { %v3958_v61 = vpop.f32.mrf.mxu0 }
0x1176   :  { %3172 = vst [vmem:[%s6132_s17] sm:$0xff] %v3142_v59  ;;  %v3153_v34 = vadd.f32 %v3958_v61, %v3317_v12 }
0x1177   :  { %v3144_v5 = vpop.f32.mrf.mxu0 }
0x1178   :  { %3175 = vst [vmem:[%s6132_s17 + $0x18] sm:$0xff] %v3153_v34  ;;  %v3145_v21 = vadd.f32 %v3317_v12, %v3144_v5 }
0x117a   :  { %3173 = vst [vmem:[%s6132_s17 + $0x8] sm:$0xff] %v3145_v21 }
0x117f   :  { %v3937_v11 = vpop.f32.mrf.mxu1 }
0x1180   :  { %v3002_v50 = vadd.f32 %v3937_v11, %v6072_v30 }
0x1181   :  { %v2993_v51 = vpop.f32.mrf.mxu1 }
0x1182   :  { %v2994_v52 = vadd.f32 %v6072_v30, %v2993_v51  ;;  %v3022_v39 = vmul.f32 0.01, %v3002_v50  ;;  %vm3014_vm14 = vcmp.ge.f32.partialorder %v3002_v50, 0.0 }
0x1183   :  { %v3938_v1 = vpop.f32.mrf.mxu1 }
0x1184   :  { %v3005_v26 = vadd.f32 %v3938_v1, %v6072_v30  ;;  %v3020_v22 = vmul.f32 0.01, %v2994_v52  ;;  %vm3012_vm13 = vcmp.ge.f32.partialorder %v2994_v52, 0.0  ;;  %v3030_v44 = vsel %vm3014_vm14, %v3002_v50, %v3022_v39 }
0x1185   :  { %v2996_v20 = vpop.f32.mrf.mxu1 }
0x1186   :  { %vm3015_vm12 = vcmp.ge.f32.partialorder %v3005_v26, 0.0  ;;  %v3023_v23 = vmul.f32 0.01, %v3005_v26  ;;  %v2997_v24 = vadd.f32 %v6072_v30, %v2996_v20  ;;  %v3028_v41 = vsel %vm3012_vm13, %v2994_v52, %v3020_v22 }
0x1188   :  { %vm3013_vm15 = vcmp.ge.f32.partialorder %v2997_v24, 0.0  ;;  %v3021_v56 = vmul.f32 0.01, %v2997_v24  ;;  %v3031_v40 = vsel %vm3015_vm12, %v3005_v26, %v3023_v23 }
0x1189   :  { %v3035_v45 = vpack.c.bf16 %v3031_v40, %v3030_v44 }
0x118a   :  { %v3029_v42 = vsel %vm3013_vm15, %v2997_v24, %v3021_v56 }
0x118b   :  { %v3034_v43 = vpack.c.bf16 %v3029_v42, %v3028_v41 }
0x118d   :  { %3959 = vmatprep.mubr.bf16.mxu0 %v3034_v43 }
0x118e   :  { %3960 = vmatmul.mubr.bf16.gmra.mxu0 %v3035_v45 }
0x124e   :  { %v3961_v27 = vpop.f32.mrf.mxu0 }
0x124f   :  { %v3166_v63 = vadd.f32 %v3961_v27, %v3317_v12 }
0x1250   :  { %v3157_v3 = vpop.f32.mrf.mxu0 }
0x1251   :  { %3178 = vst [vmem:[%s6132_s17 + $0x30] sm:$0xff] %v3166_v63  ;;  %v3158_v46 = vadd.f32 %v3317_v12, %v3157_v3 }
0x1252   :  { %v3962_v28 = vpop.f32.mrf.mxu0 }
0x1253   :  { %3176 = vst [vmem:[%s6132_s17 + $0x20] sm:$0xff] %v3158_v46  ;;  %v3169_v47 = vadd.f32 %v3962_v28, %v3317_v12 }
0x1254   :  { %v3160_v30 = vpop.f32.mrf.mxu0 }
0x1255   :  { %3179 = vst [vmem:[%s6132_s17 + $0x38] sm:$0xff] %v3169_v47  ;;  %v3161_v48 = vadd.f32 %v3317_v12, %v3160_v30 }
0x1257   :  { %3177 = vst [vmem:[%s6132_s17 + $0x28] sm:$0xff] %v3161_v48 }

</bundles_post_ra>
